<compile_context>
chip_gen: v7x
topology: tpu7x:2x2x1
jax: 0.10.0
libtpu: 0.0.40
codegen_flags: <defaults>
</compile_context>

<pallas_src>
import jax
import jax.numpy as jnp
from jax.experimental import pallas as pl
from jax.experimental.pallas import tpu as pltpu

HEAD_DIMS = (10, 34, 3, 6)      # l0, l1, l2, l3 output widths
C_IN = 2048
SEG = 128                       # lane-aligned segment width per head
N_HEADS = len(HEAD_DIMS)
PACKED = SEG * N_HEADS          # 512 packed logit lanes
NEG_FILL = -1e30                # padded-lane bias: exp underflows to exactly 0


def _heads_kernel(x_ref, w_ref, b_ref, o_ref):
    # x_ref: (B_T, 2048) pooled features
    # w_ref: (2048, 512) packed head weights; b_ref: (1, 512) packed biases (NEG_FILL pad)
    # o_ref: (B_T, 512) packed per-head softmax outputs
    logits = jnp.dot(x_ref[...], w_ref[...],
                     preferred_element_type=jnp.float32) + b_ref[...]   # (B_T, 512)
    for k in range(N_HEADS):                        # unrolled; static 128-aligned slices
        seg = logits[:, k * SEG:(k + 1) * SEG]      # (B_T, 128), one vreg column block
        m = jnp.max(seg, axis=-1, keepdims=True)
        e = jnp.exp(seg - m)                        # padded lanes: exp(-1e30 - m) == 0
        s = jnp.sum(e, axis=-1, keepdims=True)
        o_ref[:, k * SEG:(k + 1) * SEG] = e * pl.reciprocal(s, approx=False)


def _round_up(x, m):
    return (x + m - 1) // m * m


def multihead_resnet_bottoms_heads(feat_nchw, head_weights, head_biases):
    """feat_nchw: (B, 2048, H, W) backbone features (PyTorch NCHW layout).
    Returns (l0, l1, l2, l3) softmax outputs, matching MultiHeadResNet_Bottoms.forward."""
    B, C, H, W = feat_nchw.shape
    assert C == C_IN

    # AdaptiveAvgPool2d((1,1)) + flatten == mean over spatial dims. Done here as a single
    # XLA reduce on NCHW: one HBM read of the feature map, no transpose pass.
    pooled = jnp.mean(feat_nchw.astype(jnp.float32), axis=(2, 3))          # (B, 2048)

    # Pack the four (n_out, 2048) PyTorch-layout weights into one lane-padded (2048, 512)
    # matrix; biases into (1, 512) with -1e30 in the padded lanes.
    w_packed = jnp.zeros((C_IN, PACKED), jnp.float32)
    b_packed = jnp.full((1, PACKED), NEG_FILL, jnp.float32)
    for k, (w, b, n) in enumerate(zip(head_weights, head_biases, HEAD_DIMS)):
        w_packed = w_packed.at[:, k * SEG:k * SEG + n].set(w.T.astype(jnp.float32))
        b_packed = b_packed.at[:, k * SEG:k * SEG + n].set(b.astype(jnp.float32))

    # Batch tiling: multiple of 8 sublanes, up to 128 rows (fills MXU M on v6e/v7x).
    B_T = min(128, _round_up(B, 8))
    B_pad = _round_up(B, B_T)
    if B_pad != B:
        # Zero rows -> logits == bias -> finite softmax (no NaN); sliced off below.
        pooled = jnp.pad(pooled, ((0, B_pad - B), (0, 0)))

    cost = pl.CostEstimate(
        flops=2 * B_pad * C_IN * PACKED,
        transcendentals=B_pad * PACKED,
        bytes_accessed=4 * (B_pad * C_IN + C_IN * PACKED + PACKED + B_pad * PACKED),
    )

    packed_out = pl.pallas_call(
        _heads_kernel,
        out_shape=jax.ShapeDtypeStruct((B_pad, PACKED), jnp.float32),
        grid_spec=pltpu.PrefetchScalarGridSpec(
            num_scalar_prefetch=0,
            grid=(B_pad // B_T,),
            in_specs=[
                pl.BlockSpec((B_T, C_IN), lambda i: (i, 0)),      # pooled: batch-tiled
                pl.BlockSpec((C_IN, PACKED), lambda i: (0, 0)),   # weights: resident
                pl.BlockSpec((1, PACKED), lambda i: (0, 0)),      # biases: resident
            ],
            out_specs=pl.BlockSpec((B_T, PACKED), lambda i: (i, 0)),
        ),
        compiler_params=pltpu.CompilerParams(
            dimension_semantics=("parallel",)),                   # megacore sharding on v7x
        cost_estimate=cost,
    )(pooled, w_packed, b_packed)

    return tuple(packed_out[:B, k * SEG:k * SEG + n]
                 for k, n in enumerate(HEAD_DIMS))


def _reference(feat_nchw, head_weights, head_biases):
    pooled = jnp.mean(feat_nchw.astype(jnp.float32), axis=(2, 3))          # (B, 2048)
    outs = []
    for w, b in zip(head_weights, head_biases):
        logits = pooled @ w.T.astype(jnp.float32) + b.astype(jnp.float32)
        outs.append(jax.nn.softmax(logits, axis=1))
    return tuple(outs)


if __name__ == "__main__":
    key = jax.random.PRNGKey(0)
    k_x, *k_heads = jax.random.split(key, 1 + 2 * len(HEAD_DIMS))

    # Small synthetic backbone feature map: (B=2, C=2048, H=4, W=4), NCHW like PyTorch.
    B, H, W = 2, 4, 4
    feat = jax.random.normal(k_x, (B, C_IN, H, W), dtype=jnp.float32)

    # Deterministic head parameters (PyTorch nn.Linear layout: weight (out, in), bias (out,)).
    head_weights, head_biases = [], []
    for i, n in enumerate(HEAD_DIMS):
        kw, kb = k_heads[2 * i], k_heads[2 * i + 1]
        bound = 1.0 / (C_IN ** 0.5)
        head_weights.append(jax.random.uniform(kw, (n, C_IN), jnp.float32, -bound, bound))
        head_biases.append(jax.random.uniform(kb, (n,), jnp.float32, -bound, bound))

    outs = multihead_resnet_bottoms_heads(feat, head_weights, head_biases)
    outs = jax.block_until_ready(outs)

    refs = _reference(feat, head_weights, head_biases)
    for o, r, n in zip(outs, refs, HEAD_DIMS):
        assert o.shape == (B, n), (o.shape, n)
        assert jnp.allclose(o, r, atol=1e-5, rtol=1e-5), f"mismatch on head of width {n}"
        assert jnp.allclose(jnp.sum(o, axis=1), 1.0, atol=1e-5)

    print("KERNEL_OK")
</pallas_src>

<mosaic_0001>
module attributes {stable_mosaic.version = 11 : i64} {
  func.func @_heads_kernel(%arg0: i32, %arg1: memref<8x2048xf32, #tpu.memory_space<vmem>>, %arg2: memref<2048x512xf32, #tpu.memory_space<vmem>>, %arg3: memref<1x512xf32, #tpu.memory_space<vmem>>, %arg4: memref<8x512xf32, #tpu.memory_space<vmem>>) attributes {dimension_semantics = [#tpu.dimension_semantics<parallel>], iteration_bounds = array<i64: 1>, scalar_prefetch = 0 : i64, scratch_operands = 0 : i64, tpu.core_type = #tpu.core_type<tc>, window_params = [{transform_indices = @transform_0, window_bounds = array<i64: 8, 2048>}, {pipeline_mode = #tpu.pipeline_mode<synchronous>, transform_indices = @transform_1, window_bounds = array<i64: 2048, 512>}, {pipeline_mode = #tpu.pipeline_mode<synchronous>, transform_indices = @transform_2, window_bounds = array<i64: 1, 512>}, {transform_indices = @transform_3, window_bounds = array<i64: 8, 512>}]} {
    %c0 = arith.constant 0 : index
    %c0_0 = arith.constant 0 : index
    %0 = vector.load %arg1[%c0, %c0_0] : memref<8x2048xf32, #tpu.memory_space<vmem>>, vector<8x2048xf32>
    %c0_1 = arith.constant 0 : index
    %c0_2 = arith.constant 0 : index
    %1 = vector.load %arg2[%c0_1, %c0_2] : memref<2048x512xf32, #tpu.memory_space<vmem>>, vector<2048x512xf32>
    %cst = arith.constant dense<0.000000e+00> : vector<8x512xf32>
    %2 = tpu.matmul %0, %1, %cst {dimension_numbers = #tpu.dot_dimension_numbers<[1], [0], [0], [1], [0, 0, 1, 1], [], []>} : vector<8x2048xf32>, vector<2048x512xf32>, vector<8x512xf32> -> vector<8x512xf32>
    %c0_3 = arith.constant 0 : index
    %c0_4 = arith.constant 0 : index
    %3 = vector.load %arg3[%c0_3, %c0_4] : memref<1x512xf32, #tpu.memory_space<vmem>>, vector<1x512xf32>
    %4 = vector.broadcast %3 : vector<1x512xf32> to vector<8x512xf32>
    %5 = arith.addf %2, %4 : vector<8x512xf32>
    %6 = vector.extract_strided_slice %5 {offsets = [0, 0], sizes = [8, 128], strides = [1, 1]} : vector<8x512xf32> to vector<8x128xf32>
    %cst_5 = arith.constant dense<0xFF800000> : vector<8xf32>
    %7 = vector.multi_reduction <maximumf>, %6, %cst_5 [1] : vector<8x128xf32> to vector<8xf32>
    %8 = vector.shape_cast %7 : vector<8xf32> to vector<8x1xf32>
    %9 = vector.broadcast %8 : vector<8x1xf32> to vector<8x128xf32>
    %10 = arith.subf %6, %9 : vector<8x128xf32>
    %11 = math.exp %10 : vector<8x128xf32>
    %cst_6 = arith.constant dense<0.000000e+00> : vector<8xf32>
    %12 = vector.multi_reduction <add>, %11, %cst_6 [1] : vector<8x128xf32> to vector<8xf32>
    %13 = vector.shape_cast %12 : vector<8xf32> to vector<8x1xf32>
    %14 = tpu.reciprocal %13 : vector<8x1xf32> -> vector<8x1xf32>
    %15 = vector.broadcast %14 : vector<8x1xf32> to vector<8x128xf32>
    %16 = arith.mulf %11, %15 : vector<8x128xf32>
    %c0_7 = arith.constant 0 : index
    %c0_8 = arith.constant 0 : index
    %17 = vector.load %arg4[%c0_7, %c0_8] : memref<8x512xf32, #tpu.memory_space<vmem>>, vector<8x128xf32>
    tpu.vector_store %arg4[%c0_7, %c0_8], %16 {strides = array<i32>} : memref<8x512xf32, #tpu.memory_space<vmem>>, vector<8x128xf32>,
    %18 = vector.extract_strided_slice %5 {offsets = [0, 128], sizes = [8, 128], strides = [1, 1]} : vector<8x512xf32> to vector<8x128xf32>
    %cst_9 = arith.constant dense<0xFF800000> : vector<8xf32>
    %19 = vector.multi_reduction <maximumf>, %18, %cst_9 [1] : vector<8x128xf32> to vector<8xf32>
    %20 = vector.shape_cast %19 : vector<8xf32> to vector<8x1xf32>
    %21 = vector.broadcast %20 : vector<8x1xf32> to vector<8x128xf32>
    %22 = arith.subf %18, %21 : vector<8x128xf32>
    %23 = math.exp %22 : vector<8x128xf32>
    %cst_10 = arith.constant dense<0.000000e+00> : vector<8xf32>
    %24 = vector.multi_reduction <add>, %23, %cst_10 [1] : vector<8x128xf32> to vector<8xf32>
    %25 = vector.shape_cast %24 : vector<8xf32> to vector<8x1xf32>
    %26 = tpu.reciprocal %25 : vector<8x1xf32> -> vector<8x1xf32>
    %27 = vector.broadcast %26 : vector<8x1xf32> to vector<8x128xf32>
    %28 = arith.mulf %23, %27 : vector<8x128xf32>
    %c0_11 = arith.constant 0 : index
    %c128 = arith.constant 128 : index
    %29 = vector.load %arg4[%c0_11, %c128] : memref<8x512xf32, #tpu.memory_space<vmem>>, vector<8x128xf32>
    tpu.vector_store %arg4[%c0_11, %c128], %28 {strides = array<i32>} : memref<8x512xf32, #tpu.memory_space<vmem>>, vector<8x128xf32>,
    %30 = vector.extract_strided_slice %5 {offsets = [0, 256], sizes = [8, 128], strides = [1, 1]} : vector<8x512xf32> to vector<8x128xf32>
    %cst_12 = arith.constant dense<0xFF800000> : vector<8xf32>
    %31 = vector.multi_reduction <maximumf>, %30, %cst_12 [1] : vector<8x128xf32> to vector<8xf32>
    %32 = vector.shape_cast %31 : vector<8xf32> to vector<8x1xf32>
    %33 = vector.broadcast %32 : vector<8x1xf32> to vector<8x128xf32>
    %34 = arith.subf %30, %33 : vector<8x128xf32>
    %35 = math.exp %34 : vector<8x128xf32>
    %cst_13 = arith.constant dense<0.000000e+00> : vector<8xf32>
    %36 = vector.multi_reduction <add>, %35, %cst_13 [1] : vector<8x128xf32> to vector<8xf32>
    %37 = vector.shape_cast %36 : vector<8xf32> to vector<8x1xf32>
    %38 = tpu.reciprocal %37 : vector<8x1xf32> -> vector<8x1xf32>
    %39 = vector.broadcast %38 : vector<8x1xf32> to vector<8x128xf32>
    %40 = arith.mulf %35, %39 : vector<8x128xf32>
    %c0_14 = arith.constant 0 : index
    %c256 = arith.constant 256 : index
    %41 = vector.load %arg4[%c0_14, %c256] : memref<8x512xf32, #tpu.memory_space<vmem>>, vector<8x128xf32>
    tpu.vector_store %arg4[%c0_14, %c256], %40 {strides = array<i32>} : memref<8x512xf32, #tpu.memory_space<vmem>>, vector<8x128xf32>,
    %42 = vector.extract_strided_slice %5 {offsets = [0, 384], sizes = [8, 128], strides = [1, 1]} : vector<8x512xf32> to vector<8x128xf32>
    %cst_15 = arith.constant dense<0xFF800000> : vector<8xf32>
    %43 = vector.multi_reduction <maximumf>, %42, %cst_15 [1] : vector<8x128xf32> to vector<8xf32>
    %44 = vector.shape_cast %43 : vector<8xf32> to vector<8x1xf32>
    %45 = vector.broadcast %44 : vector<8x1xf32> to vector<8x128xf32>
    %46 = arith.subf %42, %45 : vector<8x128xf32>
    %47 = math.exp %46 : vector<8x128xf32>
    %cst_16 = arith.constant dense<0.000000e+00> : vector<8xf32>
    %48 = vector.multi_reduction <add>, %47, %cst_16 [1] : vector<8x128xf32> to vector<8xf32>
    %49 = vector.shape_cast %48 : vector<8xf32> to vector<8x1xf32>
    %50 = tpu.reciprocal %49 : vector<8x1xf32> -> vector<8x1xf32>
    %51 = vector.broadcast %50 : vector<8x1xf32> to vector<8x128xf32>
    %52 = arith.mulf %47, %51 : vector<8x128xf32>
    %c0_17 = arith.constant 0 : index
    %c384 = arith.constant 384 : index
    %53 = vector.load %arg4[%c0_17, %c384] : memref<8x512xf32, #tpu.memory_space<vmem>>, vector<8x128xf32>
    tpu.vector_store %arg4[%c0_17, %c384], %52 {strides = array<i32>} : memref<8x512xf32, #tpu.memory_space<vmem>>, vector<8x128xf32>,
    return
  }
  func.func @transform_0(%arg0: i32) -> (i32, i32) {
    %c0_i32 = arith.constant 0 : i32
    %c0_i32_0 = arith.constant 0 : i32
    return %arg0, %c0_i32 : i32, i32
  }
  func.func @transform_1(%arg0: i32) -> (i32, i32) {
    %c0_i32 = arith.constant 0 : i32
    %c0_i32_0 = arith.constant 0 : i32
    %c0_i32_1 = arith.constant 0 : i32
    return %c0_i32, %c0_i32_0 : i32, i32
  }
  func.func @transform_2(%arg0: i32) -> (i32, i32) {
    %c0_i32 = arith.constant 0 : i32
    %c0_i32_0 = arith.constant 0 : i32
    %c0_i32_1 = arith.constant 0 : i32
    return %c0_i32, %c0_i32_0 : i32, i32
  }
  func.func @transform_3(%arg0: i32) -> (i32, i32) {
    %c0_i32 = arith.constant 0 : i32
    %c0_i32_0 = arith.constant 0 : i32
    return %arg0, %c0_i32 : i32, i32
  }
}

</mosaic_0001>

<bundles_post_ra>
// kernel: tpu_custom_call.1
= control target key start
LH: loop header
LB: loop body
LE: loop exit
PB: predicated region body
PF: predicated region fallthrough
CT: control target
= control target key end

     0   :  { %8 = vsyncpa [#allocation3], 0  ;;  %s3552_s0 = inlined_call_operand.hbm [shape: f32[8,2048], index: 0, kind: input, shape index: {}]   ;;  %s3553_s1 = inlined_call_operand.hbm [shape: f32[2048,512], index: 1, kind: input, shape index: {}]   ;;  %s3554_s2 = inlined_call_operand.hbm [shape: f32[1,512], index: 2, kind: input, shape index: {}]   ;;  %s3555_s3 = inlined_call_operand.hbm [shape: f32[8,512], index: 3, kind: output, shape index: {}]  }
   0x1   :  { %9 = vsyncpa [#allocation6], 0 }
   0x2   :  { %10 = vsyncpa [#allocation4], 0  ;;  %s3478_s12 = smov [#allocation5]   ;;  %s3384_s16 = scalar_lea.hbm %s3553_s1, 131072 }
   0x3   :  { %s26_s13 = sshll.u32 %s3478_s12, 4  ;;  %p3385_p0 = scmp.ne.s32.totalorder %s3553_s1, %s3384_s16  ;;  %s27_s13 = int_to_ptr.vmem [resolvable:$true] %s26_s13 }
   0x4   :  { %p3388_p1 = scmp.lt.u32.totalorder %s3384_s16, %s3553_s1 }
   0x6   :  { %p3390_p2 = pnand %p3388_p1, %p3385_p0 }
   0x8   :  { %3393 = shalt.err (!%p3390_p2)
}
   0x9   :  { %s3394_s21 = scalar_lea.vmem %s27_s13, 131072  ;;  %p3399_p4 = scmp.lt.s32.totalorder %s27_s13, %s27_s13 }
   0xa   :  { %p3395_p3 = scmp.ne.s32.totalorder %s27_s13, %s3394_s21  ;;  %p3400_p5 = scmp.lt.s32.totalorder %s3394_s21, %s3394_s21 }
   0xc   :  { %p3401_p6 = por %p3400_p5, %p3399_p4 }
   0xe   :  { %p3402_p7 = pnand %p3401_p6, %p3395_p3 }
  0x10   :  { %3405 = shalt.err (!%p3402_p7)
}
  0x11   :  { %s3479_s22 = smov 512   ;;  %s3480_s23 = smov 32  }
  0x12   :  { %32 = dma.hbm_to_vmem [thread:$0]  %s3553_s1, 131072, %s27_s13, [#allocation6], %s3479_s22, %s3479_s22, %s3480_s23  }
  0x13   :  { %s3481_s26 = smov [#allocation2]   ;;  %s3482_s28 = smov [#allocation7]  }
  0x14   :  { %s17_s27 = sshll.u32 %s3481_s26, 4  ;;  %s39_s29 = sshll.u32 %s3482_s28, 4  ;;  %s18_s27 = int_to_ptr.vmem [resolvable:$true] %s17_s27  ;;  %s40_s29 = int_to_ptr.vmem [resolvable:$true] %s39_s29 }
  0x15   :  { %s3406_s5 = scalar_lea.hbm %s3552_s0, 2048 }
  0x16   :  { %p3407_p8 = scmp.ne.s32.totalorder %s3552_s0, %s3406_s5  ;;  %p3410_p9 = scmp.lt.u32.totalorder %s3406_s5, %s3552_s0 }
  0x18   :  { %p3412_p10 = pnand %p3410_p9, %p3407_p8 }
  0x1a   :  { %3415 = shalt.err (!%p3412_p10)
}
  0x1b   :  { %s3416_s1 = scalar_lea.vmem %s18_s27, 2048  ;;  %p3421_p12 = scmp.lt.s32.totalorder %s18_s27, %s18_s27 }
  0x1c   :  { %p3417_p11 = scmp.ne.s32.totalorder %s18_s27, %s3416_s1  ;;  %p3422_p13 = scmp.lt.s32.totalorder %s3416_s1, %s3416_s1 }
  0x1e   :  { %p3423_p0 = por %p3422_p13, %p3421_p12 }
  0x20   :  { %p3424_p1 = pnand %p3423_p0, %p3417_p11 }
  0x22   :  { %3427 = shalt.err (!%p3424_p1)
}
  0x23   :  { %20 = dma.hbm_to_vmem [thread:$0]  %s3552_s0, 2048, %s18_s27, [#allocation3]  }
  0x24   :  { %s3428_s14 = scalar_lea.hbm %s3554_s2, 64 }
  0x25   :  { %p3429_p2 = scmp.ne.s32.totalorder %s3554_s2, %s3428_s14  ;;  %p3432_p3 = scmp.lt.u32.totalorder %s3428_s14, %s3554_s2 }
  0x27   :  { %p3434_p4 = pnand %p3432_p3, %p3429_p2 }
  0x29   :  { %3437 = shalt.err (!%p3434_p4)
}
  0x2a   :  { %s3438_s19 = scalar_lea.vmem %s40_s29, 64  ;;  %p3443_p6 = scmp.lt.s32.totalorder %s40_s29, %s40_s29 }
  0x2b   :  { %p3439_p5 = scmp.ne.s32.totalorder %s40_s29, %s3438_s19  ;;  %p3444_p7 = scmp.lt.s32.totalorder %s3438_s19, %s3438_s19 }
  0x2d   :  { %p3445_p8 = por %p3444_p7, %p3443_p6 }
  0x2f   :  { %p3446_p9 = pnand %p3445_p8, %p3439_p5 }
  0x31   :  { %3449 = shalt.err (!%p3446_p9)
}
  0x32   :  { %42 = dma.hbm_to_vmem [thread:$0]  %s3554_s2, 64, %s40_s29, [#allocation6]  }
  0x33   :  { %3472 = dma.done.wait [#allocation3], 2048  }
  0x34   :  { %3473 = vsyncadd [#allocation3], 4294965248 }
  0x35   :  { %3474 = dma.done.wait [#allocation6], 131136  }
  0x36   :  { %3475 = vsyncadd [#allocation6], 4294836160  ;;  %v69_v0 = vld [vmem:[#allocation5 + $0x8] sm:$0xff]  ;;  %v71_v2 = vld [vmem:[#allocation5 + $0x18] sm:$0xff]  ;;  %s3483_s2 = smov [#allocation8]  }
  0x37   :  { %v73_v1 = vld [vmem:[#allocation5 + $0x28] sm:$0xff]  ;;  %v75_v4 = vld [vmem:[#allocation5 + $0x38] sm:$0xff]  ;;  %v68_v5 = vld [vmem:[#allocation5] sm:$0xff]  ;;  %s2296_s21 = sshll.u32 %s3483_s2, 4  ;;  %s2297_s21 = int_to_ptr.vmem [resolvable:$true] %s2296_s21 }
  0x38   :  { %v2306_v3 = vpack.c.bf16 %v73_v1, %v69_v0  ;;  %v72_v6 = vld [vmem:[#allocation5 + $0x20] sm:$0xff]  ;;  %v2818_v7 = vpack.c.bf16 %v75_v4, %v71_v2  ;;  %v70_v9 = vld [vmem:[#allocation5 + $0x10] sm:$0xff]  ;;  %v77_v11 = vld [vmem:[#allocation5 + $0x48] sm:$0xff]  ;;  %s3450_s22 = scalar_lea.vmem %s2297_s21, 512  ;;  %p3455_p11 = scmp.lt.s32.totalorder %s2297_s21, %s2297_s21 }
  0x39   :  { %v2308_v8 = vpack.c.bf16 %v72_v6, %v68_v5  ;;  %v74_v10 = vld [vmem:[#allocation5 + $0x30] sm:$0xff]  ;;  %v81_v13 = vld [vmem:[#allocation5 + $0x68] sm:$0xff]  ;;  %v79_v14 = vld [vmem:[#allocation5 + $0x58] sm:$0xff]  ;;  %p3451_p10 = scmp.ne.s32.totalorder %s2297_s21, %s3450_s22  ;;  %p3456_p12 = scmp.lt.s32.totalorder %s3450_s22, %s3450_s22 }
  0x3a   :  { %2307 = vmatprep.subr.bf16.mxu0 %v2306_v3  ;;  %v2820_v12 = vpack.c.bf16 %v74_v10, %v70_v9  ;;  %v83_v15 = vld [vmem:[#allocation5 + $0x78] sm:$0xff]  ;;  %2819 = vmatprep.subr.bf16.mxu1 %v2818_v7  ;;  %v2310_v16 = vpack.c.bf16 %v81_v13, %v77_v11  ;;  %v76_v18 = vld [vmem:[#allocation5 + $0x40] sm:$0xff]  ;;  %v78_v20 = vld [vmem:[#allocation5 + $0x50] sm:$0xff] }
  0x3b   :  { %2309 = vmatpush1.bf16.msra.mxu0 %v2308_v8  ;;  %v2822_v17 = vpack.c.bf16 %v83_v15, %v79_v14  ;;  %v80_v19 = vld [vmem:[#allocation5 + $0x60] sm:$0xff]  ;;  %v82_v22 = vld [vmem:[#allocation5 + $0x70] sm:$0xff]  ;;  %v85_v23 = vld [vmem:[#allocation5 + $0x88] sm:$0xff]  ;;  %p3457_p13 = por %p3456_p12, %p3455_p11 }
  0x3c   :  { %2821 = vmatpush1.bf16.msra.mxu1 %v2820_v12  ;;  %v2312_v21 = vpack.c.bf16 %v80_v19, %v76_v18  ;;  %v89_v24 = vld [vmem:[#allocation5 + $0xa8] sm:$0xff]  ;;  %2311 = vmatprep.subr.bf16.mxu0 %v2310_v16  ;;  %v2824_v25 = vpack.c.bf16 %v82_v22, %v78_v20  ;;  %v87_v27 = vld [vmem:[#allocation5 + $0x98] sm:$0xff]  ;;  %v84_v29 = vld [vmem:[#allocation5 + $0x80] sm:$0xff] }
  0x3d   :  { %2823 = vmatprep.subr.bf16.mxu1 %v2822_v17  ;;  %v2314_v26 = vpack.c.bf16 %v89_v24, %v85_v23  ;;  %v91_v28 = vld [vmem:[#allocation5 + $0xb8] sm:$0xff]  ;;  %v88_v31 = vld [vmem:[#allocation5 + $0xa0] sm:$0xff]  ;;  %v86_v32 = vld [vmem:[#allocation5 + $0x90] sm:$0xff]  ;;  %p3458_p0 = pnand %p3457_p13, %p3451_p10 }
  0x3e   :  { %v2826_v30 = vpack.c.bf16 %v91_v28, %v87_v27  ;;  %v90_v33 = vld [vmem:[#allocation5 + $0xb0] sm:$0xff]  ;;  %v2316_v34 = vpack.c.bf16 %v88_v31, %v84_v29  ;;  %v93_v35 = vld [vmem:[#allocation5 + $0xc8] sm:$0xff]  ;;  %v95_v37 = vld [vmem:[#allocation5 + $0xd8] sm:$0xff] }
  0x3f   :  { %2313 = vmatpush1.bf16.msra.mxu0 %v2312_v21  ;;  %v97_v36 = vld [vmem:[#allocation5 + $0xe8] sm:$0xff]  ;;  %v2828_v38 = vpack.c.bf16 %v90_v33, %v86_v32  ;;  %v99_v40 = vld [vmem:[#allocation5 + $0xf8] sm:$0xff]  ;;  %v92_v41 = vld [vmem:[#allocation5 + $0xc0] sm:$0xff] }
  0x40   :  { %2825 = vmatpush1.bf16.msra.mxu1 %v2824_v25  ;;  %2315 = vmatprep.subr.bf16.mxu0 %v2314_v26  ;;  %v2318_v39 = vpack.c.bf16 %v97_v36, %v93_v35  ;;  %v96_v42 = vld [vmem:[#allocation5 + $0xe0] sm:$0xff]  ;;  %v2830_v43 = vpack.c.bf16 %v99_v40, %v95_v37  ;;  %v94_v44 = vld [vmem:[#allocation5 + $0xd0] sm:$0xff]  ;;  %v101_v46 = vld [vmem:[#allocation5 + $0x108] sm:$0xff] }
  0x41   :  { %2827 = vmatprep.subr.bf16.mxu1 %v2826_v30  ;;  %v98_v45 = vld [vmem:[#allocation5 + $0xf0] sm:$0xff]  ;;  %v105_v47 = vld [vmem:[#allocation5 + $0x128] sm:$0xff]  ;;  %v103_v48 = vld [vmem:[#allocation5 + $0x118] sm:$0xff]  ;;  %v2320_v50 = vpack.c.bf16 %v96_v42, %v92_v41 }
  0x42   :  { %v107_v49 = vld [vmem:[#allocation5 + $0x138] sm:$0xff]  ;;  %v2832_v51 = vpack.c.bf16 %v98_v45, %v94_v44  ;;  %v2322_v52 = vpack.c.bf16 %v105_v47, %v101_v46  ;;  %v100_v53 = vld [vmem:[#allocation5 + $0x100] sm:$0xff]  ;;  %v102_v55 = vld [vmem:[#allocation5 + $0x110] sm:$0xff] }
  0x43   :  { %2317 = vmatpush1.bf16.msra.mxu0 %v2316_v34  ;;  %v104_v54 = vld [vmem:[#allocation5 + $0x120] sm:$0xff]  ;;  %v2834_v56 = vpack.c.bf16 %v107_v49, %v103_v48  ;;  %v106_v57 = vld [vmem:[#allocation5 + $0x130] sm:$0xff]  ;;  %v109_v58 = vld [vmem:[#allocation5 + $0x148] sm:$0xff] }
  0x44   :  { %2829 = vmatpush1.bf16.msra.mxu1 %v2828_v38  ;;  %2319 = vmatprep.subr.bf16.mxu0 %v2318_v39  ;;  %v113_v59 = vld [vmem:[#allocation5 + $0x168] sm:$0xff]  ;;  %v111_v60 = vld [vmem:[#allocation5 + $0x158] sm:$0xff]  ;;  %v2324_v62 = vpack.c.bf16 %v104_v54, %v100_v53  ;;  %v2836_v63 = vpack.c.bf16 %v106_v57, %v102_v55  ;;  %v108_v1 = vld [vmem:[#allocation5 + $0x140] sm:$0xff] }
  0x45   :  { %2831 = vmatprep.subr.bf16.mxu1 %v2830_v43  ;;  %v115_v61 = vld [vmem:[#allocation5 + $0x178] sm:$0xff]  ;;  %v2326_v0 = vpack.c.bf16 %v113_v59, %v109_v58  ;;  %v112_v2 = vld [vmem:[#allocation5 + $0x160] sm:$0xff]  ;;  %v110_v3 = vld [vmem:[#allocation5 + $0x150] sm:$0xff] }
  0x46   :  { %v2838_v4 = vpack.c.bf16 %v115_v61, %v111_v60  ;;  %v114_v5 = vld [vmem:[#allocation5 + $0x170] sm:$0xff]  ;;  %v117_v6 = vld [vmem:[#allocation5 + $0x188] sm:$0xff]  ;;  %v119_v8 = vld [vmem:[#allocation5 + $0x198] sm:$0xff]  ;;  %v2328_v10 = vpack.c.bf16 %v112_v2, %v108_v1 }
  0x47   :  { %2321 = vmatpush1.bf16.msra.mxu0 %v2320_v50  ;;  %v121_v7 = vld [vmem:[#allocation5 + $0x1a8] sm:$0xff]  ;;  %v123_v9 = vld [vmem:[#allocation5 + $0x1b8] sm:$0xff]  ;;  %v2840_v11 = vpack.c.bf16 %v114_v5, %v110_v3  ;;  %v116_v13 = vld [vmem:[#allocation5 + $0x180] sm:$0xff] }
  0x48   :  { %2833 = vmatpush1.bf16.msra.mxu1 %v2832_v51  ;;  %2323 = vmatprep.subr.bf16.mxu0 %v2322_v52  ;;  %v2330_v12 = vpack.c.bf16 %v121_v7, %v117_v6  ;;  %v120_v14 = vld [vmem:[#allocation5 + $0x1a0] sm:$0xff]  ;;  %v118_v15 = vld [vmem:[#allocation5 + $0x190] sm:$0xff]  ;;  %v2842_v16 = vpack.c.bf16 %v123_v9, %v119_v8  ;;  %v125_v18 = vld [vmem:[#allocation5 + $0x1c8] sm:$0xff] }
  0x49   :  { %2835 = vmatprep.subr.bf16.mxu1 %v2834_v56  ;;  %v122_v17 = vld [vmem:[#allocation5 + $0x1b0] sm:$0xff]  ;;  %v129_v19 = vld [vmem:[#allocation5 + $0x1e8] sm:$0xff]  ;;  %v127_v20 = vld [vmem:[#allocation5 + $0x1d8] sm:$0xff]  ;;  %v2332_v22 = vpack.c.bf16 %v120_v14, %v116_v13 }
  0x4a   :  { %v131_v21 = vld [vmem:[#allocation5 + $0x1f8] sm:$0xff]  ;;  %v2844_v23 = vpack.c.bf16 %v122_v17, %v118_v15  ;;  %v2334_v24 = vpack.c.bf16 %v129_v19, %v125_v18  ;;  %v124_v25 = vld [vmem:[#allocation5 + $0x1c0] sm:$0xff]  ;;  %v126_v27 = vld [vmem:[#allocation5 + $0x1d0] sm:$0xff] }
  0x4b   :  { %2325 = vmatpush1.bf16.msra.mxu0 %v2324_v62  ;;  %v128_v26 = vld [vmem:[#allocation5 + $0x1e0] sm:$0xff]  ;;  %v2846_v28 = vpack.c.bf16 %v131_v21, %v127_v20  ;;  %v130_v29 = vld [vmem:[#allocation5 + $0x1f0] sm:$0xff]  ;;  %v133_v30 = vld [vmem:[#allocation5 + $0x208] sm:$0xff] }
  0x4c   :  { %2837 = vmatpush1.bf16.msra.mxu1 %v2836_v63  ;;  %2327 = vmatprep.subr.bf16.mxu0 %v2326_v0  ;;  %v137_v31 = vld [vmem:[#allocation5 + $0x228] sm:$0xff]  ;;  %v135_v32 = vld [vmem:[#allocation5 + $0x218] sm:$0xff]  ;;  %v2336_v34 = vpack.c.bf16 %v128_v26, %v124_v25  ;;  %v2848_v35 = vpack.c.bf16 %v130_v29, %v126_v27  ;;  %v132_v37 = vld [vmem:[#allocation5 + $0x200] sm:$0xff] }
  0x4d   :  { %2839 = vmatprep.subr.bf16.mxu1 %v2838_v4  ;;  %v139_v33 = vld [vmem:[#allocation5 + $0x238] sm:$0xff]  ;;  %v2338_v36 = vpack.c.bf16 %v137_v31, %v133_v30  ;;  %v136_v38 = vld [vmem:[#allocation5 + $0x220] sm:$0xff]  ;;  %v134_v39 = vld [vmem:[#allocation5 + $0x210] sm:$0xff] }
  0x4e   :  { %v2850_v40 = vpack.c.bf16 %v139_v33, %v135_v32  ;;  %v138_v41 = vld [vmem:[#allocation5 + $0x230] sm:$0xff]  ;;  %v141_v42 = vld [vmem:[#allocation5 + $0x248] sm:$0xff]  ;;  %v143_v44 = vld [vmem:[#allocation5 + $0x258] sm:$0xff]  ;;  %v2340_v46 = vpack.c.bf16 %v136_v38, %v132_v37 }
  0x4f   :  { %2329 = vmatpush1.bf16.msra.mxu0 %v2328_v10  ;;  %v145_v43 = vld [vmem:[#allocation5 + $0x268] sm:$0xff]  ;;  %v147_v45 = vld [vmem:[#allocation5 + $0x278] sm:$0xff]  ;;  %v2852_v47 = vpack.c.bf16 %v138_v41, %v134_v39  ;;  %v140_v49 = vld [vmem:[#allocation5 + $0x240] sm:$0xff] }
  0x50   :  { %2841 = vmatpush1.bf16.msra.mxu1 %v2840_v11  ;;  %2331 = vmatprep.subr.bf16.mxu0 %v2330_v12  ;;  %v2342_v48 = vpack.c.bf16 %v145_v43, %v141_v42  ;;  %v144_v50 = vld [vmem:[#allocation5 + $0x260] sm:$0xff]  ;;  %v142_v51 = vld [vmem:[#allocation5 + $0x250] sm:$0xff]  ;;  %v2854_v52 = vpack.c.bf16 %v147_v45, %v143_v44  ;;  %v149_v54 = vld [vmem:[#allocation5 + $0x288] sm:$0xff] }
  0x51   :  { %2843 = vmatprep.subr.bf16.mxu1 %v2842_v16  ;;  %v146_v53 = vld [vmem:[#allocation5 + $0x270] sm:$0xff]  ;;  %v153_v55 = vld [vmem:[#allocation5 + $0x2a8] sm:$0xff]  ;;  %v151_v56 = vld [vmem:[#allocation5 + $0x298] sm:$0xff]  ;;  %v2344_v58 = vpack.c.bf16 %v144_v50, %v140_v49 }
  0x52   :  { %v155_v57 = vld [vmem:[#allocation5 + $0x2b8] sm:$0xff]  ;;  %v2856_v59 = vpack.c.bf16 %v146_v53, %v142_v51  ;;  %v2346_v60 = vpack.c.bf16 %v153_v55, %v149_v54  ;;  %v148_v61 = vld [vmem:[#allocation5 + $0x280] sm:$0xff]  ;;  %v150_v63 = vld [vmem:[#allocation5 + $0x290] sm:$0xff] }
  0x53   :  { %2333 = vmatpush1.bf16.msra.mxu0 %v2332_v22  ;;  %v152_v62 = vld [vmem:[#allocation5 + $0x2a0] sm:$0xff]  ;;  %v2858_v0 = vpack.c.bf16 %v155_v57, %v151_v56  ;;  %v154_v1 = vld [vmem:[#allocation5 + $0x2b0] sm:$0xff]  ;;  %v157_v2 = vld [vmem:[#allocation5 + $0x2c8] sm:$0xff] }
  0x54   :  { %2845 = vmatpush1.bf16.msra.mxu1 %v2844_v23  ;;  %2335 = vmatprep.subr.bf16.mxu0 %v2334_v24  ;;  %v161_v3 = vld [vmem:[#allocation5 + $0x2e8] sm:$0xff]  ;;  %v159_v4 = vld [vmem:[#allocation5 + $0x2d8] sm:$0xff]  ;;  %v2348_v6 = vpack.c.bf16 %v152_v62, %v148_v61  ;;  %v156_v7 = vld [vmem:[#allocation5 + $0x2c0] sm:$0xff]  ;;  %v2860_v8 = vpack.c.bf16 %v154_v1, %v150_v63 }
  0x55   :  { %2847 = vmatprep.subr.bf16.mxu1 %v2846_v28  ;;  %v163_v5 = vld [vmem:[#allocation5 + $0x2f8] sm:$0xff]  ;;  %v2350_v9 = vpack.c.bf16 %v161_v3, %v157_v2  ;;  %v160_v10 = vld [vmem:[#allocation5 + $0x2e0] sm:$0xff]  ;;  %v158_v11 = vld [vmem:[#allocation5 + $0x2d0] sm:$0xff] }
  0x56   :  { %v162_v12 = vld [vmem:[#allocation5 + $0x2f0] sm:$0xff]  ;;  %v2862_v13 = vpack.c.bf16 %v163_v5, %v159_v4  ;;  %v165_v14 = vld [vmem:[#allocation5 + $0x308] sm:$0xff]  ;;  %v167_v17 = vld [vmem:[#allocation5 + $0x318] sm:$0xff]  ;;  %v2352_v19 = vpack.c.bf16 %v160_v10, %v156_v7 }
  0x57   :  { %2337 = vmatpush1.bf16.msra.mxu0 %v2336_v34  ;;  %v169_v15 = vld [vmem:[#allocation5 + $0x328] sm:$0xff]  ;;  %v171_v18 = vld [vmem:[#allocation5 + $0x338] sm:$0xff]  ;;  %v2864_v20 = vpack.c.bf16 %v162_v12, %v158_v11  ;;  %v164_v22 = vld [vmem:[#allocation5 + $0x300] sm:$0xff] }
  0x58   :  { %2849 = vmatpush1.bf16.msra.mxu1 %v2848_v35  ;;  %2339 = vmatprep.subr.bf16.mxu0 %v2338_v36  ;;  %v53_v16 = vld [vmem:[#allocation2 + $0x8] sm:$0xff]  ;;  %v2354_v21 = vpack.c.bf16 %v169_v15, %v165_v14  ;;  %v168_v23 = vld [vmem:[#allocation5 + $0x320] sm:$0xff]  ;;  %v166_v24 = vld [vmem:[#allocation5 + $0x310] sm:$0xff]  ;;  %v2866_v25 = vpack.c.bf16 %v171_v18, %v167_v17 }
  0x59   :  { %2851 = vmatprep.subr.bf16.mxu1 %v2850_v40  ;;  %1178 = vmatprep.mubr.f32.mxu0 %v53_v16  ;;  %v170_v26 = vld [vmem:[#allocation5 + $0x330] sm:$0xff]  ;;  %v173_v27 = vld [vmem:[#allocation5 + $0x348] sm:$0xff]  ;;  %v175_v29 = vld [vmem:[#allocation5 + $0x358] sm:$0xff]  ;;  %v2356_v31 = vpack.c.bf16 %v168_v23, %v164_v22 }
  0x5a   :  { %1746 = vmatprep.mubr.f32.mxu1 %v53_v16  ;;  %v177_v28 = vld [vmem:[#allocation5 + $0x368] sm:$0xff]  ;;  %v179_v30 = vld [vmem:[#allocation5 + $0x378] sm:$0xff]  ;;  %v2868_v32 = vpack.c.bf16 %v170_v26, %v166_v24  ;;  %v172_v34 = vld [vmem:[#allocation5 + $0x340] sm:$0xff] }
  0x5b   :  { %2341 = vmatpush1.bf16.msra.mxu0 %v2340_v46  ;;  %v2358_v33 = vpack.c.bf16 %v177_v28, %v173_v27  ;;  %v176_v35 = vld [vmem:[#allocation5 + $0x360] sm:$0xff]  ;;  %v174_v36 = vld [vmem:[#allocation5 + $0x350] sm:$0xff]  ;;  %v2870_v37 = vpack.c.bf16 %v179_v30, %v175_v29  ;;  %v181_v39 = vld [vmem:[#allocation5 + $0x388] sm:$0xff] }
  0x5c   :  { %2853 = vmatpush1.bf16.msra.mxu1 %v2852_v47  ;;  %2343 = vmatprep.subr.bf16.mxu0 %v2342_v48  ;;  %v178_v38 = vld [vmem:[#allocation5 + $0x370] sm:$0xff]  ;;  %v185_v40 = vld [vmem:[#allocation5 + $0x3a8] sm:$0xff]  ;;  %v183_v41 = vld [vmem:[#allocation5 + $0x398] sm:$0xff]  ;;  %v2360_v43 = vpack.c.bf16 %v176_v35, %v172_v34 }
  0x5d   :  { %2855 = vmatprep.subr.bf16.mxu1 %v2854_v52  ;;  %v187_v42 = vld [vmem:[#allocation5 + $0x3b8] sm:$0xff]  ;;  %v2872_v44 = vpack.c.bf16 %v178_v38, %v174_v36  ;;  %v2362_v45 = vpack.c.bf16 %v185_v40, %v181_v39  ;;  %v180_v46 = vld [vmem:[#allocation5 + $0x380] sm:$0xff]  ;;  %v182_v48 = vld [vmem:[#allocation5 + $0x390] sm:$0xff] }
  0x5e   :  { %v184_v47 = vld [vmem:[#allocation5 + $0x3a0] sm:$0xff]  ;;  %v2874_v49 = vpack.c.bf16 %v187_v42, %v183_v41  ;;  %v186_v50 = vld [vmem:[#allocation5 + $0x3b0] sm:$0xff]  ;;  %v189_v51 = vld [vmem:[#allocation5 + $0x3c8] sm:$0xff] }
  0x5f   :  { %2345 = vmatpush1.bf16.msra.mxu0 %v2344_v58  ;;  %v193_v52 = vld [vmem:[#allocation5 + $0x3e8] sm:$0xff]  ;;  %v191_v53 = vld [vmem:[#allocation5 + $0x3d8] sm:$0xff]  ;;  %v2364_v55 = vpack.c.bf16 %v184_v47, %v180_v46  ;;  %v2876_v56 = vpack.c.bf16 %v186_v50, %v182_v48  ;;  %v188_v58 = vld [vmem:[#allocation5 + $0x3c0] sm:$0xff] }
  0x60   :  { %2857 = vmatpush1.bf16.msra.mxu1 %v2856_v59  ;;  %2347 = vmatprep.subr.bf16.mxu0 %v2346_v60  ;;  %v195_v54 = vld [vmem:[#allocation5 + $0x3f8] sm:$0xff]  ;;  %v2366_v57 = vpack.c.bf16 %v193_v52, %v189_v51  ;;  %v192_v59 = vld [vmem:[#allocation5 + $0x3e0] sm:$0xff]  ;;  %v190_v60 = vld [vmem:[#allocation5 + $0x3d0] sm:$0xff] }
  0x61   :  { %2859 = vmatprep.subr.bf16.mxu1 %v2858_v0  ;;  %v2878_v61 = vpack.c.bf16 %v195_v54, %v191_v53  ;;  %v194_v62 = vld [vmem:[#allocation5 + $0x3f0] sm:$0xff]  ;;  %v197_v63 = vld [vmem:[#allocation5 + $0x408] sm:$0xff]  ;;  %v199_v1 = vld [vmem:[#allocation5 + $0x418] sm:$0xff]  ;;  %v2368_v3 = vpack.c.bf16 %v192_v59, %v188_v58 }
  0x62   :  { %v201_v0 = vld [vmem:[#allocation5 + $0x428] sm:$0xff]  ;;  %v203_v2 = vld [vmem:[#allocation5 + $0x438] sm:$0xff]  ;;  %v2880_v4 = vpack.c.bf16 %v194_v62, %v190_v60  ;;  %v200_v7 = vld [vmem:[#allocation5 + $0x420] sm:$0xff] }
  0x63   :  { %2349 = vmatpush1.bf16.msra.mxu0 %v2348_v6  ;;  %v2370_v5 = vpack.c.bf16 %v201_v0, %v197_v63  ;;  %v196_v6 = vld [vmem:[#allocation5 + $0x400] sm:$0xff]  ;;  %v202_v10 = vld [vmem:[#allocation5 + $0x430] sm:$0xff]  ;;  %v205_v11 = vld [vmem:[#allocation5 + $0x448] sm:$0xff] }
  0x64   :  { %2861 = vmatpush1.bf16.msra.mxu1 %v2860_v8  ;;  %2351 = vmatprep.subr.bf16.mxu0 %v2350_v9  ;;  %v198_v8 = vld [vmem:[#allocation5 + $0x410] sm:$0xff]  ;;  %v2882_v9 = vpack.c.bf16 %v203_v2, %v199_v1  ;;  %v209_v12 = vld [vmem:[#allocation5 + $0x468] sm:$0xff]  ;;  %v211_v14 = vld [vmem:[#allocation5 + $0x478] sm:$0xff]  ;;  %v2372_v16 = vpack.c.bf16 %v200_v7, %v196_v6 }
  0x65   :  { %2863 = vmatprep.subr.bf16.mxu1 %v2862_v13  ;;  %v207_v13 = vld [vmem:[#allocation5 + $0x458] sm:$0xff]  ;;  %v52_v15 = vld [vmem:[#allocation2] sm:$0xff]  ;;  %v2884_v17 = vpack.c.bf16 %v202_v10, %v198_v8  ;;  %v2374_v18 = vpack.c.bf16 %v209_v12, %v205_v11  ;;  %v210_v23 = vld [vmem:[#allocation5 + $0x470] sm:$0xff] }
  0x66   :  { %v2886_v22 = vpack.c.bf16 %v211_v14, %v207_v13  ;;  %v213_v24 = vld [vmem:[#allocation5 + $0x488] sm:$0xff]  ;;  %v215_v26 = vld [vmem:[#allocation5 + $0x498] sm:$0xff]  ;;  %v218_v35 = vld [vmem:[#allocation5 + $0x4b0] sm:$0xff] }
  0x67   :  { %2353 = vmatpush1.bf16.msra.mxu0 %v2352_v19  ;;  %v204_v19 = vld [vmem:[#allocation5 + $0x440] sm:$0xff]  ;;  %v219_v27 = vld [vmem:[#allocation5 + $0x4b8] sm:$0xff]  ;;  %v221_v36 = vld [vmem:[#allocation5 + $0x4c8] sm:$0xff] }
  0x68   :  { %2865 = vmatpush1.bf16.msra.mxu1 %v2864_v20  ;;  %2355 = vmatprep.subr.bf16.mxu0 %v2354_v21  ;;  %v208_v20 = vld [vmem:[#allocation5 + $0x460] sm:$0xff]  ;;  %v206_v21 = vld [vmem:[#allocation5 + $0x450] sm:$0xff]  ;;  %v2890_v34 = vpack.c.bf16 %v219_v27, %v215_v26  ;;  %v223_v38 = vld [vmem:[#allocation5 + $0x4d8] sm:$0xff] }
  0x69   :  { %2867 = vmatprep.subr.bf16.mxu1 %v2866_v25  ;;  %v217_v25 = vld [vmem:[#allocation5 + $0x4a8] sm:$0xff]  ;;  %v2376_v28 = vpack.c.bf16 %v208_v20, %v204_v19  ;;  %v2888_v29 = vpack.c.bf16 %v210_v23, %v206_v21  ;;  %v227_v39 = vld [vmem:[#allocation5 + $0x4f8] sm:$0xff]  ;;  %v226_v47 = vld [vmem:[#allocation5 + $0x4f0] sm:$0xff] }
  0x6a   :  { %v2378_v30 = vpack.c.bf16 %v217_v25, %v213_v24  ;;  %v2894_v46 = vpack.c.bf16 %v227_v39, %v223_v38  ;;  %v229_v48 = vld [vmem:[#allocation5 + $0x508] sm:$0xff]  ;;  %v231_v50 = vld [vmem:[#allocation5 + $0x518] sm:$0xff]  ;;  %v234_v59 = vld [vmem:[#allocation5 + $0x530] sm:$0xff] }
  0x6b   :  { %2357 = vmatpush1.bf16.msra.mxu0 %v2356_v31  ;;  %v212_v31 = vld [vmem:[#allocation5 + $0x480] sm:$0xff]  ;;  %v235_v51 = vld [vmem:[#allocation5 + $0x538] sm:$0xff]  ;;  %v237_v60 = vld [vmem:[#allocation5 + $0x548] sm:$0xff] }
  0x6c   :  { %2869 = vmatpush1.bf16.msra.mxu1 %v2868_v32  ;;  %2359 = vmatprep.subr.bf16.mxu0 %v2358_v33  ;;  %v216_v32 = vld [vmem:[#allocation5 + $0x4a0] sm:$0xff]  ;;  %v214_v33 = vld [vmem:[#allocation5 + $0x490] sm:$0xff]  ;;  %v2898_v58 = vpack.c.bf16 %v235_v51, %v231_v50  ;;  %v239_v62 = vld [vmem:[#allocation5 + $0x558] sm:$0xff] }
  0x6d   :  { %2871 = vmatprep.subr.bf16.mxu1 %v2870_v37  ;;  %v225_v37 = vld [vmem:[#allocation5 + $0x4e8] sm:$0xff]  ;;  %v2380_v40 = vpack.c.bf16 %v216_v32, %v212_v31  ;;  %v2892_v41 = vpack.c.bf16 %v218_v35, %v214_v33  ;;  %v243_v63 = vld [vmem:[#allocation5 + $0x578] sm:$0xff]  ;;  %v242_v7 = vld [vmem:[#allocation5 + $0x570] sm:$0xff] }
  0x6e   :  { %v2382_v42 = vpack.c.bf16 %v225_v37, %v221_v36  ;;  %v2902_v6 = vpack.c.bf16 %v243_v63, %v239_v62  ;;  %v245_v8 = vld [vmem:[#allocation5 + $0x588] sm:$0xff]  ;;  %v247_v10 = vld [vmem:[#allocation5 + $0x598] sm:$0xff]  ;;  %v244_v13 = vld [vmem:[#allocation5 + $0x580] sm:$0xff] }
  0x6f   :  { %2361 = vmatpush1.bf16.msra.mxu0 %v2360_v43  ;;  %v220_v43 = vld [vmem:[#allocation5 + $0x4c0] sm:$0xff]  ;;  %v251_v11 = vld [vmem:[#allocation5 + $0x5b8] sm:$0xff]  ;;  %v253_v20 = vld [vmem:[#allocation5 + $0x5c8] sm:$0xff] }
  0x70   :  { %2873 = vmatpush1.bf16.msra.mxu1 %v2872_v44  ;;  %2363 = vmatprep.subr.bf16.mxu0 %v2362_v45  ;;  %v224_v44 = vld [vmem:[#allocation5 + $0x4e0] sm:$0xff]  ;;  %v222_v45 = vld [vmem:[#allocation5 + $0x4d0] sm:$0xff]  ;;  %v2906_v19 = vpack.c.bf16 %v251_v11, %v247_v10  ;;  %v257_v21 = vld [vmem:[#allocation5 + $0x5e8] sm:$0xff] }
  0x71   :  { %2875 = vmatprep.subr.bf16.mxu1 %v2874_v49  ;;  %v233_v49 = vld [vmem:[#allocation5 + $0x528] sm:$0xff]  ;;  %v2384_v52 = vpack.c.bf16 %v224_v44, %v220_v43  ;;  %v2896_v53 = vpack.c.bf16 %v226_v47, %v222_v45  ;;  %v255_v23 = vld [vmem:[#allocation5 + $0x5d8] sm:$0xff]  ;;  %v2398_v27 = vpack.c.bf16 %v257_v21, %v253_v20  ;;  %v258_v32 = vld [vmem:[#allocation5 + $0x5f0] sm:$0xff] }
  0x72   :  { %v2386_v54 = vpack.c.bf16 %v233_v49, %v229_v48  ;;  %v259_v24 = vld [vmem:[#allocation5 + $0x5f8] sm:$0xff]  ;;  %v261_v33 = vld [vmem:[#allocation5 + $0x608] sm:$0xff]  ;;  %v266_v44 = vld [vmem:[#allocation5 + $0x630] sm:$0xff] }
  0x73   :  { %2365 = vmatpush1.bf16.msra.mxu0 %v2364_v55  ;;  %v228_v55 = vld [vmem:[#allocation5 + $0x500] sm:$0xff]  ;;  %v2910_v31 = vpack.c.bf16 %v259_v24, %v255_v23  ;;  %v263_v35 = vld [vmem:[#allocation5 + $0x618] sm:$0xff]  ;;  %v269_v45 = vld [vmem:[#allocation5 + $0x648] sm:$0xff] }
  0x74   :  { %2877 = vmatpush1.bf16.msra.mxu1 %v2876_v56  ;;  %2367 = vmatprep.subr.bf16.mxu0 %v2366_v57  ;;  %v232_v56 = vld [vmem:[#allocation5 + $0x520] sm:$0xff]  ;;  %v230_v57 = vld [vmem:[#allocation5 + $0x510] sm:$0xff]  ;;  %v267_v36 = vld [vmem:[#allocation5 + $0x638] sm:$0xff] }
  0x75   :  { %2879 = vmatprep.subr.bf16.mxu1 %v2878_v61  ;;  %v241_v61 = vld [vmem:[#allocation5 + $0x568] sm:$0xff]  ;;  %v2388_v0 = vpack.c.bf16 %v232_v56, %v228_v55  ;;  %v2900_v1 = vpack.c.bf16 %v234_v59, %v230_v57  ;;  %v2914_v43 = vpack.c.bf16 %v267_v36, %v263_v35  ;;  %v271_v47 = vld [vmem:[#allocation5 + $0x658] sm:$0xff]  ;;  %v274_v56 = vld [vmem:[#allocation5 + $0x670] sm:$0xff] }
  0x76   :  { %v2390_v2 = vpack.c.bf16 %v241_v61, %v237_v60  ;;  %v275_v48 = vld [vmem:[#allocation5 + $0x678] sm:$0xff]  ;;  %v277_v57 = vld [vmem:[#allocation5 + $0x688] sm:$0xff]  ;;  %v292_v24 = vld [vmem:[#allocation5 + $0x700] sm:$0xff] }
  0x77   :  { %2369 = vmatpush1.bf16.msra.mxu0 %v2368_v3  ;;  %v236_v3 = vld [vmem:[#allocation5 + $0x540] sm:$0xff]  ;;  %v2918_v55 = vpack.c.bf16 %v275_v48, %v271_v47  ;;  %v279_v59 = vld [vmem:[#allocation5 + $0x698] sm:$0xff] }
  0x78   :  { %2881 = vmatpush1.bf16.msra.mxu1 %v2880_v4  ;;  %2371 = vmatprep.subr.bf16.mxu0 %v2370_v5  ;;  %v240_v4 = vld [vmem:[#allocation5 + $0x560] sm:$0xff]  ;;  %v238_v5 = vld [vmem:[#allocation5 + $0x550] sm:$0xff]  ;;  %v283_v60 = vld [vmem:[#allocation5 + $0x6b8] sm:$0xff] }
  0x79   :  { %2883 = vmatprep.subr.bf16.mxu1 %v2882_v9  ;;  %v249_v9 = vld [vmem:[#allocation5 + $0x5a8] sm:$0xff]  ;;  %v2392_v12 = vpack.c.bf16 %v240_v4, %v236_v3  ;;  %v2904_v14 = vpack.c.bf16 %v242_v7, %v238_v5  ;;  %v2922_v3 = vpack.c.bf16 %v283_v60, %v279_v59  ;;  %v282_v4 = vld [vmem:[#allocation5 + $0x6b0] sm:$0xff]  ;;  %v287_v7 = vld [vmem:[#allocation5 + $0x6d8] sm:$0xff] }
  0x7a   :  { %1179 = vmatmul.mubr.f32.vlgmr.msra.gmra.mrb[0].mxu0 %v52_v15  ;;  %v285_v5 = vld [vmem:[#allocation5 + $0x6c8] sm:$0xff]  ;;  %v299_v20 = vld [vmem:[#allocation5 + $0x738] sm:$0xff]  ;;  %v300_v36 = vld [vmem:[#allocation5 + $0x740] sm:$0xff] }
  0x7b   :  { %2373 = vmatpush1.bf16.msra.mxu0 %v2372_v16  ;;  %1747 = vmatmul.mubr.f32.vlgmr.msra.gmra.mrb[0].mxu1 %v52_v15  ;;  %v2394_v15 = vpack.c.bf16 %v249_v9, %v245_v8  ;;  %v248_v16 = vld [vmem:[#allocation5 + $0x5a0] sm:$0xff]  ;;  %v291_v8 = vld [vmem:[#allocation5 + $0x6f8] sm:$0xff] }
  0x7c   :  { %2885 = vmatpush1.bf16.msra.mxu1 %v2884_v17  ;;  %2375 = vmatprep.subr.bf16.mxu0 %v2374_v18  ;;  %v246_v17 = vld [vmem:[#allocation5 + $0x590] sm:$0xff]  ;;  %v2396_v25 = vpack.c.bf16 %v248_v16, %v244_v13  ;;  %v288_v13 = vld [vmem:[#allocation5 + $0x6e0] sm:$0xff] }
  0x7d   :  { %2887 = vmatprep.subr.bf16.mxu1 %v2886_v22  ;;  %v250_v18 = vld [vmem:[#allocation5 + $0x5b0] sm:$0xff]  ;;  %v55_v22 = vld [vmem:[#allocation2 + $0x18] sm:$0xff]  ;;  %v308_v48 = vld [vmem:[#allocation5 + $0x780] sm:$0xff] }
  0x7e   :  { %1249 = vmatprep.mubr.f32.mxu0 %v55_v22  ;;  %1817 = vmatprep.mubr.f32.mxu1 %v55_v22  ;;  %v2908_v26 = vpack.c.bf16 %v250_v18, %v246_v17  ;;  %v290_v16 = vld [vmem:[#allocation5 + $0x6f0] sm:$0xff]  ;;  %v293_v17 = vld [vmem:[#allocation5 + $0x708] sm:$0xff]  ;;  %v316_v60 = vld [vmem:[#allocation5 + $0x7c0] sm:$0xff] }
  0x7f   :  { %2377 = vmatpush1.bf16.msra.mxu0 %v2376_v28  ;;  %v252_v28 = vld [vmem:[#allocation5 + $0x5c0] sm:$0xff]  ;;  %v297_v18 = vld [vmem:[#allocation5 + $0x728] sm:$0xff] }
  0x80   :  { %2889 = vmatpush1.bf16.msra.mxu1 %v2888_v29  ;;  %2379 = vmatprep.subr.bf16.mxu0 %v2378_v30  ;;  %v256_v29 = vld [vmem:[#allocation5 + $0x5e0] sm:$0xff]  ;;  %v254_v30 = vld [vmem:[#allocation5 + $0x5d0] sm:$0xff]  ;;  %v2418_v23 = vpack.c.bf16 %v297_v18, %v293_v17 }
  0x81   :  { %2891 = vmatprep.subr.bf16.mxu1 %v2890_v34  ;;  %v265_v34 = vld [vmem:[#allocation5 + $0x628] sm:$0xff]  ;;  %v2400_v37 = vpack.c.bf16 %v256_v29, %v252_v28  ;;  %v2912_v38 = vpack.c.bf16 %v258_v32, %v254_v30  ;;  %v298_v28 = vld [vmem:[#allocation5 + $0x730] sm:$0xff]  ;;  %v307_v32 = vld [vmem:[#allocation5 + $0x778] sm:$0xff] }
  0x82   :  { %v2402_v39 = vpack.c.bf16 %v265_v34, %v261_v33  ;;  %v301_v29 = vld [vmem:[#allocation5 + $0x748] sm:$0xff]  ;;  %v54_v17 = vld [vmem:[#allocation2 + $0x10] sm:$0xff] }
  0x83   :  { %2381 = vmatpush1.bf16.msra.mxu0 %v2380_v40  ;;  %v260_v40 = vld [vmem:[#allocation5 + $0x600] sm:$0xff]  ;;  %v305_v30 = vld [vmem:[#allocation5 + $0x768] sm:$0xff] }
  0x84   :  { %2893 = vmatpush1.bf16.msra.mxu1 %v2892_v41  ;;  %2383 = vmatprep.subr.bf16.mxu0 %v2382_v42  ;;  %v264_v41 = vld [vmem:[#allocation5 + $0x620] sm:$0xff]  ;;  %v262_v42 = vld [vmem:[#allocation5 + $0x610] sm:$0xff]  ;;  %v2422_v35 = vpack.c.bf16 %v305_v30, %v301_v29  ;;  %v347_v29 = vld [vmem:[#allocation5 + $0x8b8] sm:$0xff] }
  0x85   :  { %2895 = vmatprep.subr.bf16.mxu1 %v2894_v46  ;;  %v273_v46 = vld [vmem:[#allocation5 + $0x668] sm:$0xff]  ;;  %v2404_v49 = vpack.c.bf16 %v264_v41, %v260_v40  ;;  %v2916_v50 = vpack.c.bf16 %v266_v44, %v262_v42  ;;  %v306_v40 = vld [vmem:[#allocation5 + $0x770] sm:$0xff]  ;;  %v315_v44 = vld [vmem:[#allocation5 + $0x7b8] sm:$0xff] }
  0x86   :  { %v2406_v51 = vpack.c.bf16 %v273_v46, %v269_v45  ;;  %v309_v41 = vld [vmem:[#allocation5 + $0x788] sm:$0xff] }
  0x87   :  { %2385 = vmatpush1.bf16.msra.mxu0 %v2384_v52  ;;  %v268_v52 = vld [vmem:[#allocation5 + $0x640] sm:$0xff]  ;;  %v313_v42 = vld [vmem:[#allocation5 + $0x7a8] sm:$0xff] }
  0x88   :  { %2897 = vmatpush1.bf16.msra.mxu1 %v2896_v53  ;;  %2387 = vmatprep.subr.bf16.mxu0 %v2386_v54  ;;  %v272_v53 = vld [vmem:[#allocation5 + $0x660] sm:$0xff]  ;;  %v270_v54 = vld [vmem:[#allocation5 + $0x650] sm:$0xff]  ;;  %v2426_v47 = vpack.c.bf16 %v313_v42, %v309_v41  ;;  %v57_v30 = vld [vmem:[#allocation2 + $0x28] sm:$0xff] }
  0x89   :  { %2899 = vmatprep.subr.bf16.mxu1 %v2898_v58  ;;  %v281_v58 = vld [vmem:[#allocation5 + $0x6a8] sm:$0xff]  ;;  %v2408_v61 = vpack.c.bf16 %v272_v53, %v268_v52  ;;  %v2920_v62 = vpack.c.bf16 %v274_v56, %v270_v54  ;;  %v314_v52 = vld [vmem:[#allocation5 + $0x7b0] sm:$0xff]  ;;  %v323_v56 = vld [vmem:[#allocation5 + $0x7f8] sm:$0xff] }
  0x8a   :  { %v2410_v63 = vpack.c.bf16 %v281_v58, %v277_v57  ;;  %v317_v53 = vld [vmem:[#allocation5 + $0x7c8] sm:$0xff]  ;;  %v351_v41 = vld [vmem:[#allocation5 + $0x8d8] sm:$0xff] }
  0x8b   :  { %2389 = vmatpush1.bf16.msra.mxu0 %v2388_v0  ;;  %v276_v0 = vld [vmem:[#allocation5 + $0x680] sm:$0xff]  ;;  %v321_v54 = vld [vmem:[#allocation5 + $0x7e8] sm:$0xff]  ;;  %v355_v42 = vld [vmem:[#allocation5 + $0x8f8] sm:$0xff] }
  0x8c   :  { %2901 = vmatpush1.bf16.msra.mxu1 %v2900_v1  ;;  %2391 = vmatprep.subr.bf16.mxu0 %v2390_v2  ;;  %v280_v1 = vld [vmem:[#allocation5 + $0x6a0] sm:$0xff]  ;;  %v278_v2 = vld [vmem:[#allocation5 + $0x690] sm:$0xff]  ;;  %v2430_v59 = vpack.c.bf16 %v321_v54, %v317_v53  ;;  %v359_v53 = vld [vmem:[#allocation5 + $0x918] sm:$0xff] }
  0x8d   :  { %2903 = vmatprep.subr.bf16.mxu1 %v2902_v6  ;;  %v289_v6 = vld [vmem:[#allocation5 + $0x6e8] sm:$0xff]  ;;  %v2412_v9 = vpack.c.bf16 %v280_v1, %v276_v0  ;;  %v2924_v10 = vpack.c.bf16 %v282_v4, %v278_v2  ;;  %v322_v0 = vld [vmem:[#allocation5 + $0x7f0] sm:$0xff]  ;;  %v331_v4 = vld [vmem:[#allocation5 + $0x838] sm:$0xff] }
  0x8e   :  { %v2414_v11 = vpack.c.bf16 %v289_v6, %v285_v5  ;;  %v325_v1 = vld [vmem:[#allocation5 + $0x808] sm:$0xff]  ;;  %v363_v54 = vld [vmem:[#allocation5 + $0x938] sm:$0xff] }
  0x8f   :  { %2393 = vmatpush1.bf16.msra.mxu0 %v2392_v12  ;;  %v284_v12 = vld [vmem:[#allocation5 + $0x6c0] sm:$0xff]  ;;  %v329_v2 = vld [vmem:[#allocation5 + $0x828] sm:$0xff] }
  0x90   :  { %2905 = vmatpush1.bf16.msra.mxu1 %v2904_v14  ;;  %2395 = vmatprep.subr.bf16.mxu0 %v2394_v15  ;;  %v286_v14 = vld [vmem:[#allocation5 + $0x6d0] sm:$0xff]  ;;  %v2926_v15 = vpack.c.bf16 %v291_v8, %v287_v7  ;;  %v2416_v21 = vpack.c.bf16 %v288_v13, %v284_v12  ;;  %v2434_v7 = vpack.c.bf16 %v329_v2, %v325_v1  ;;  %v324_v8 = vld [vmem:[#allocation5 + $0x800] sm:$0xff]  ;;  %v333_v13 = vld [vmem:[#allocation5 + $0x848] sm:$0xff] }
  0x91   :  { %2907 = vmatprep.subr.bf16.mxu1 %v2906_v19  ;;  %v295_v19 = vld [vmem:[#allocation5 + $0x718] sm:$0xff]  ;;  %v2928_v22 = vpack.c.bf16 %v290_v16, %v286_v14  ;;  %v330_v12 = vld [vmem:[#allocation5 + $0x830] sm:$0xff]  ;;  %v337_v14 = vld [vmem:[#allocation5 + $0x868] sm:$0xff] }
  0x92   :  { %v339_v16 = vld [vmem:[#allocation5 + $0x878] sm:$0xff] }
  0x93   :  { %2397 = vmatpush1.bf16.msra.mxu0 %v2396_v25  ;;  %v296_v25 = vld [vmem:[#allocation5 + $0x720] sm:$0xff]  ;;  %v367_v1 = vld [vmem:[#allocation5 + $0x958] sm:$0xff] }
  0x94   :  { %2909 = vmatpush1.bf16.msra.mxu1 %v2908_v26  ;;  %2399 = vmatprep.subr.bf16.mxu0 %v2398_v27  ;;  %v294_v26 = vld [vmem:[#allocation5 + $0x710] sm:$0xff]  ;;  %v2930_v27 = vpack.c.bf16 %v299_v20, %v295_v19  ;;  %v2420_v33 = vpack.c.bf16 %v296_v25, %v292_v24  ;;  %v2438_v20 = vpack.c.bf16 %v337_v14, %v333_v13  ;;  %v371_v2 = vld [vmem:[#allocation5 + $0x978] sm:$0xff] }
  0x95   :  { %2911 = vmatprep.subr.bf16.mxu1 %v2910_v31  ;;  %v303_v31 = vld [vmem:[#allocation5 + $0x758] sm:$0xff]  ;;  %v2932_v34 = vpack.c.bf16 %v298_v28, %v294_v26  ;;  %v338_v25 = vld [vmem:[#allocation5 + $0x870] sm:$0xff]  ;;  %v341_v26 = vld [vmem:[#allocation5 + $0x888] sm:$0xff] }
  0x96   :  { %v343_v28 = vld [vmem:[#allocation5 + $0x898] sm:$0xff] }
  0x97   :  { %2401 = vmatpush1.bf16.msra.mxu0 %v2400_v37  ;;  %v304_v37 = vld [vmem:[#allocation5 + $0x760] sm:$0xff]  ;;  %v375_v13 = vld [vmem:[#allocation5 + $0x998] sm:$0xff] }
  0x98   :  { %2913 = vmatpush1.bf16.msra.mxu1 %v2912_v38  ;;  %2403 = vmatprep.subr.bf16.mxu0 %v2402_v39  ;;  %v302_v38 = vld [vmem:[#allocation5 + $0x750] sm:$0xff]  ;;  %v2934_v39 = vpack.c.bf16 %v307_v32, %v303_v31  ;;  %v2424_v45 = vpack.c.bf16 %v304_v37, %v300_v36  ;;  %v2954_v37 = vpack.c.bf16 %v347_v29, %v343_v28  ;;  %v379_v14 = vld [vmem:[#allocation5 + $0x9b8] sm:$0xff] }
  0x99   :  { %2915 = vmatprep.subr.bf16.mxu1 %v2914_v43  ;;  %v311_v43 = vld [vmem:[#allocation5 + $0x798] sm:$0xff]  ;;  %v2936_v46 = vpack.c.bf16 %v306_v40, %v302_v38  ;;  %v342_v36 = vld [vmem:[#allocation5 + $0x890] sm:$0xff]  ;;  %v353_v40 = vld [vmem:[#allocation5 + $0x8e8] sm:$0xff] }
  0x9a   :  { %v346_v38 = vld [vmem:[#allocation5 + $0x8b0] sm:$0xff] }
  0x9b   :  { %2405 = vmatpush1.bf16.msra.mxu0 %v2404_v49  ;;  %v312_v49 = vld [vmem:[#allocation5 + $0x7a0] sm:$0xff] }
  0x9c   :  { %2917 = vmatpush1.bf16.msra.mxu1 %v2916_v50  ;;  %2407 = vmatprep.subr.bf16.mxu0 %v2406_v51  ;;  %v310_v50 = vld [vmem:[#allocation5 + $0x790] sm:$0xff]  ;;  %v2938_v51 = vpack.c.bf16 %v315_v44, %v311_v43  ;;  %v2428_v57 = vpack.c.bf16 %v312_v49, %v308_v48  ;;  %v2956_v44 = vpack.c.bf16 %v346_v38, %v342_v36  ;;  %v393_v36 = vld [vmem:[#allocation5 + $0xa28] sm:$0xff]  ;;  %v395_v38 = vld [vmem:[#allocation5 + $0xa38] sm:$0xff] }
  0x9d   :  { %2919 = vmatprep.subr.bf16.mxu1 %v2918_v55  ;;  %v319_v55 = vld [vmem:[#allocation5 + $0x7d8] sm:$0xff]  ;;  %v2940_v58 = vpack.c.bf16 %v314_v52, %v310_v50  ;;  %v350_v48 = vld [vmem:[#allocation5 + $0x8d0] sm:$0xff]  ;;  %v2958_v49 = vpack.c.bf16 %v355_v42, %v351_v41  ;;  %v361_v52 = vld [vmem:[#allocation5 + $0x928] sm:$0xff] }
  0x9e   :  { %v354_v50 = vld [vmem:[#allocation5 + $0x8f0] sm:$0xff]  ;;  %v388_v42 = vld [vmem:[#allocation5 + $0xa00] sm:$0xff] }
  0x9f   :  { %2409 = vmatpush1.bf16.msra.mxu0 %v2408_v61  ;;  %v320_v61 = vld [vmem:[#allocation5 + $0x7e0] sm:$0xff] }
  0xa0   :  { %2921 = vmatpush1.bf16.msra.mxu1 %v2920_v62  ;;  %2411 = vmatprep.subr.bf16.mxu0 %v2410_v63  ;;  %v318_v62 = vld [vmem:[#allocation5 + $0x7d0] sm:$0xff]  ;;  %v2942_v63 = vpack.c.bf16 %v323_v56, %v319_v55  ;;  %v2432_v5 = vpack.c.bf16 %v320_v61, %v316_v60  ;;  %v2960_v56 = vpack.c.bf16 %v354_v50, %v350_v48  ;;  %v401_v48 = vld [vmem:[#allocation5 + $0xa68] sm:$0xff]  ;;  %v403_v50 = vld [vmem:[#allocation5 + $0xa78] sm:$0xff] }
  0xa1   :  { %2923 = vmatprep.subr.bf16.mxu1 %v2922_v3  ;;  %v327_v3 = vld [vmem:[#allocation5 + $0x818] sm:$0xff]  ;;  %v2944_v6 = vpack.c.bf16 %v322_v0, %v318_v62  ;;  %v358_v60 = vld [vmem:[#allocation5 + $0x910] sm:$0xff]  ;;  %v2962_v61 = vpack.c.bf16 %v363_v54, %v359_v53  ;;  %v369_v0 = vld [vmem:[#allocation5 + $0x968] sm:$0xff] }
  0xa2   :  { %v362_v62 = vld [vmem:[#allocation5 + $0x930] sm:$0xff]  ;;  %v396_v54 = vld [vmem:[#allocation5 + $0xa40] sm:$0xff] }
  0xa3   :  { %2413 = vmatpush1.bf16.msra.mxu0 %v2412_v9  ;;  %v328_v9 = vld [vmem:[#allocation5 + $0x820] sm:$0xff] }
  0xa4   :  { %2925 = vmatpush1.bf16.msra.mxu1 %v2924_v10  ;;  %2415 = vmatprep.subr.bf16.mxu0 %v2414_v11  ;;  %v326_v10 = vld [vmem:[#allocation5 + $0x810] sm:$0xff]  ;;  %v2946_v11 = vpack.c.bf16 %v331_v4, %v327_v3  ;;  %v2436_v18 = vpack.c.bf16 %v328_v9, %v324_v8  ;;  %v2964_v4 = vpack.c.bf16 %v362_v62, %v358_v60  ;;  %v409_v60 = vld [vmem:[#allocation5 + $0xaa8] sm:$0xff]  ;;  %v411_v62 = vld [vmem:[#allocation5 + $0xab8] sm:$0xff] }
  0xa5   :  { %2927 = vmatprep.subr.bf16.mxu1 %v2926_v15  ;;  %v335_v15 = vld [vmem:[#allocation5 + $0x858] sm:$0xff]  ;;  %v2948_v19 = vpack.c.bf16 %v330_v12, %v326_v10  ;;  %v366_v8 = vld [vmem:[#allocation5 + $0x950] sm:$0xff]  ;;  %v2966_v9 = vpack.c.bf16 %v371_v2, %v367_v1  ;;  %v377_v12 = vld [vmem:[#allocation5 + $0x9a8] sm:$0xff] }
  0xa6   :  { %v2950_v24 = vpack.c.bf16 %v339_v16, %v335_v15  ;;  %v370_v10 = vld [vmem:[#allocation5 + $0x970] sm:$0xff]  ;;  %v404_v2 = vld [vmem:[#allocation5 + $0xa80] sm:$0xff] }
  0xa7   :  { %2417 = vmatpush1.bf16.msra.mxu0 %v2416_v21  ;;  %v332_v21 = vld [vmem:[#allocation5 + $0x840] sm:$0xff]  ;;  %v2968_v16 = vpack.c.bf16 %v370_v10, %v366_v8  ;;  %v417_v8 = vld [vmem:[#allocation5 + $0xae8] sm:$0xff]  ;;  %v419_v10 = vld [vmem:[#allocation5 + $0xaf8] sm:$0xff] }
  0xa8   :  { %2929 = vmatpush1.bf16.msra.mxu1 %v2928_v22  ;;  %2419 = vmatprep.subr.bf16.mxu0 %v2418_v23  ;;  %v336_v22 = vld [vmem:[#allocation5 + $0x860] sm:$0xff]  ;;  %v334_v23 = vld [vmem:[#allocation5 + $0x850] sm:$0xff] }
  0xa9   :  { %2931 = vmatprep.subr.bf16.mxu1 %v2930_v27  ;;  %v345_v27 = vld [vmem:[#allocation5 + $0x8a8] sm:$0xff]  ;;  %v2440_v31 = vpack.c.bf16 %v336_v22, %v332_v21  ;;  %v2952_v32 = vpack.c.bf16 %v338_v25, %v334_v23  ;;  %v2970_v21 = vpack.c.bf16 %v379_v14, %v375_v13  ;;  %v378_v22 = vld [vmem:[#allocation5 + $0x9b0] sm:$0xff]  ;;  %v383_v25 = vld [vmem:[#allocation5 + $0x9d8] sm:$0xff] }
  0xaa   :  { %v381_v23 = vld [vmem:[#allocation5 + $0x9c8] sm:$0xff]  ;;  %v412_v14 = vld [vmem:[#allocation5 + $0xac0] sm:$0xff] }
  0xab   :  { %2421 = vmatpush1.bf16.msra.mxu0 %v2420_v33  ;;  %v2442_v33 = vpack.c.bf16 %v345_v27, %v341_v26  ;;  %v387_v26 = vld [vmem:[#allocation5 + $0x9f8] sm:$0xff] }
  0xac   :  { %2933 = vmatpush1.bf16.msra.mxu1 %v2932_v34  ;;  %2423 = vmatprep.subr.bf16.mxu0 %v2422_v35  ;;  %v340_v34 = vld [vmem:[#allocation5 + $0x880] sm:$0xff] }
  0xad   :  { %2935 = vmatprep.subr.bf16.mxu1 %v2934_v39  ;;  %v344_v35 = vld [vmem:[#allocation5 + $0x8a0] sm:$0xff]  ;;  %v349_v39 = vld [vmem:[#allocation5 + $0x8c8] sm:$0xff] }
  0xae   :  { %v2444_v43 = vpack.c.bf16 %v344_v35, %v340_v34  ;;  %v386_v34 = vld [vmem:[#allocation5 + $0x9f0] sm:$0xff]  ;;  %v389_v35 = vld [vmem:[#allocation5 + $0xa08] sm:$0xff] }
  0xaf   :  { %2425 = vmatpush1.bf16.msra.mxu0 %v2424_v45  ;;  %v2446_v45 = vpack.c.bf16 %v353_v40, %v349_v39  ;;  %v2466_v41 = vpack.c.bf16 %v393_v36, %v389_v35 }
  0xb0   :  { %2937 = vmatpush1.bf16.msra.mxu1 %v2936_v46  ;;  %2427 = vmatprep.subr.bf16.mxu0 %v2426_v47  ;;  %v348_v46 = vld [vmem:[#allocation5 + $0x8c0] sm:$0xff] }
  0xb1   :  { %2939 = vmatprep.subr.bf16.mxu1 %v2938_v51  ;;  %v352_v47 = vld [vmem:[#allocation5 + $0x8e0] sm:$0xff]  ;;  %v357_v51 = vld [vmem:[#allocation5 + $0x908] sm:$0xff] }
  0xb2   :  { %v2448_v55 = vpack.c.bf16 %v352_v47, %v348_v46  ;;  %v394_v46 = vld [vmem:[#allocation5 + $0xa30] sm:$0xff]  ;;  %v397_v47 = vld [vmem:[#allocation5 + $0xa48] sm:$0xff] }
  0xb3   :  { %2429 = vmatpush1.bf16.msra.mxu0 %v2428_v57  ;;  %v2450_v57 = vpack.c.bf16 %v361_v52, %v357_v51  ;;  %v2470_v53 = vpack.c.bf16 %v401_v48, %v397_v47 }
  0xb4   :  { %2941 = vmatpush1.bf16.msra.mxu1 %v2940_v58  ;;  %2431 = vmatprep.subr.bf16.mxu0 %v2430_v59  ;;  %v356_v58 = vld [vmem:[#allocation5 + $0x900] sm:$0xff] }
  0xb5   :  { %2943 = vmatprep.subr.bf16.mxu1 %v2942_v63  ;;  %v360_v59 = vld [vmem:[#allocation5 + $0x920] sm:$0xff]  ;;  %v365_v63 = vld [vmem:[#allocation5 + $0x948] sm:$0xff] }
  0xb6   :  { %v2452_v3 = vpack.c.bf16 %v360_v59, %v356_v58  ;;  %v402_v58 = vld [vmem:[#allocation5 + $0xa70] sm:$0xff]  ;;  %v405_v59 = vld [vmem:[#allocation5 + $0xa88] sm:$0xff] }
  0xb7   :  { %2433 = vmatpush1.bf16.msra.mxu0 %v2432_v5  ;;  %v2454_v5 = vpack.c.bf16 %v369_v0, %v365_v63  ;;  %v2474_v1 = vpack.c.bf16 %v409_v60, %v405_v59 }
  0xb8   :  { %2945 = vmatpush1.bf16.msra.mxu1 %v2944_v6  ;;  %2435 = vmatprep.subr.bf16.mxu0 %v2434_v7  ;;  %v364_v6 = vld [vmem:[#allocation5 + $0x940] sm:$0xff] }
  0xb9   :  { %2947 = vmatprep.subr.bf16.mxu1 %v2946_v11  ;;  %v368_v7 = vld [vmem:[#allocation5 + $0x960] sm:$0xff]  ;;  %v373_v11 = vld [vmem:[#allocation5 + $0x988] sm:$0xff] }
  0xba   :  { %1250 = vmatmul.mubr.f32.vlgmr.msra.gmra.mrb[0].mxu0 %v54_v17  ;;  %v2456_v15 = vpack.c.bf16 %v368_v7, %v364_v6  ;;  %v410_v6 = vld [vmem:[#allocation5 + $0xab0] sm:$0xff]  ;;  %v413_v7 = vld [vmem:[#allocation5 + $0xac8] sm:$0xff] }
  0xbb   :  { %2437 = vmatpush1.bf16.msra.mxu0 %v2436_v18  ;;  %1818 = vmatmul.mubr.f32.vlgmr.msra.gmra.mrb[0].mxu1 %v54_v17  ;;  %v2458_v17 = vpack.c.bf16 %v377_v12, %v373_v11  ;;  %v372_v18 = vld [vmem:[#allocation5 + $0x980] sm:$0xff]  ;;  %v2478_v13 = vpack.c.bf16 %v417_v8, %v413_v7 }
  0xbc   :  { %2949 = vmatpush1.bf16.msra.mxu1 %v2948_v19  ;;  %2439 = vmatprep.subr.bf16.mxu0 %v2438_v20  ;;  %v376_v19 = vld [vmem:[#allocation5 + $0x9a0] sm:$0xff]  ;;  %v374_v20 = vld [vmem:[#allocation5 + $0x990] sm:$0xff] }
  0xbd   :  { %2951 = vmatprep.subr.bf16.mxu1 %v2950_v24  ;;  %1320 = vmatprep.mubr.f32.mxu0 %v57_v30  ;;  %v385_v24 = vld [vmem:[#allocation5 + $0x9e8] sm:$0xff]  ;;  %v2460_v27 = vpack.c.bf16 %v376_v19, %v372_v18  ;;  %v2972_v28 = vpack.c.bf16 %v378_v22, %v374_v20  ;;  %v418_v18 = vld [vmem:[#allocation5 + $0xaf0] sm:$0xff]  ;;  %v427_v22 = vld [vmem:[#allocation5 + $0xb38] sm:$0xff] }
  0xbe   :  { %1888 = vmatprep.mubr.f32.mxu1 %v57_v30  ;;  %v2462_v29 = vpack.c.bf16 %v385_v24, %v381_v23  ;;  %v380_v30 = vld [vmem:[#allocation5 + $0x9c0] sm:$0xff]  ;;  %v421_v19 = vld [vmem:[#allocation5 + $0xb08] sm:$0xff] }
  0xbf   :  { %2441 = vmatpush1.bf16.msra.mxu0 %v2440_v31  ;;  %v384_v31 = vld [vmem:[#allocation5 + $0x9e0] sm:$0xff]  ;;  %v425_v20 = vld [vmem:[#allocation5 + $0xb28] sm:$0xff] }
  0xc0   :  { %2953 = vmatpush1.bf16.msra.mxu1 %v2952_v32  ;;  %2443 = vmatprep.subr.bf16.mxu0 %v2442_v33  ;;  %v382_v32 = vld [vmem:[#allocation5 + $0x9d0] sm:$0xff]  ;;  %v2974_v33 = vpack.c.bf16 %v387_v26, %v383_v25  ;;  %v2464_v39 = vpack.c.bf16 %v384_v31, %v380_v30  ;;  %v2482_v25 = vpack.c.bf16 %v425_v20, %v421_v19  ;;  %v420_v26 = vld [vmem:[#allocation5 + $0xb00] sm:$0xff]  ;;  %v429_v31 = vld [vmem:[#allocation5 + $0xb48] sm:$0xff] }
  0xc1   :  { %2955 = vmatprep.subr.bf16.mxu1 %v2954_v37  ;;  %v391_v37 = vld [vmem:[#allocation5 + $0xa18] sm:$0xff]  ;;  %v2976_v40 = vpack.c.bf16 %v386_v34, %v382_v32  ;;  %v426_v30 = vld [vmem:[#allocation5 + $0xb30] sm:$0xff]  ;;  %v433_v32 = vld [vmem:[#allocation5 + $0xb68] sm:$0xff] }
  0xc2   :  { %v435_v34 = vld [vmem:[#allocation5 + $0xb78] sm:$0xff]  ;;  %v56_v19 = vld [vmem:[#allocation2 + $0x20] sm:$0xff] }
  0xc3   :  { %2445 = vmatpush1.bf16.msra.mxu0 %v2444_v43  ;;  %v392_v43 = vld [vmem:[#allocation5 + $0xa20] sm:$0xff] }
  0xc4   :  { %2957 = vmatpush1.bf16.msra.mxu1 %v2956_v44  ;;  %2447 = vmatprep.subr.bf16.mxu0 %v2446_v45  ;;  %v390_v44 = vld [vmem:[#allocation5 + $0xa10] sm:$0xff]  ;;  %v2978_v45 = vpack.c.bf16 %v395_v38, %v391_v37  ;;  %v2468_v51 = vpack.c.bf16 %v392_v43, %v388_v42  ;;  %v2486_v37 = vpack.c.bf16 %v433_v32, %v429_v31  ;;  %v428_v38 = vld [vmem:[#allocation5 + $0xb40] sm:$0xff]  ;;  %v437_v43 = vld [vmem:[#allocation5 + $0xb88] sm:$0xff] }
  0xc5   :  { %2959 = vmatprep.subr.bf16.mxu1 %v2958_v49  ;;  %v399_v49 = vld [vmem:[#allocation5 + $0xa58] sm:$0xff]  ;;  %v2980_v52 = vpack.c.bf16 %v394_v46, %v390_v44  ;;  %v434_v42 = vld [vmem:[#allocation5 + $0xb70] sm:$0xff]  ;;  %v441_v44 = vld [vmem:[#allocation5 + $0xba8] sm:$0xff] }
  0xc6   :  { %v443_v46 = vld [vmem:[#allocation5 + $0xbb8] sm:$0xff] }
  0xc7   :  { %2449 = vmatpush1.bf16.msra.mxu0 %v2448_v55  ;;  %v400_v55 = vld [vmem:[#allocation5 + $0xa60] sm:$0xff]  ;;  %v475_v31 = vld [vmem:[#allocation5 + $0xcb8] sm:$0xff] }
  0xc8   :  { %2961 = vmatpush1.bf16.msra.mxu1 %v2960_v56  ;;  %2451 = vmatprep.subr.bf16.mxu0 %v2450_v57  ;;  %v398_v56 = vld [vmem:[#allocation5 + $0xa50] sm:$0xff]  ;;  %v2982_v57 = vpack.c.bf16 %v403_v50, %v399_v49  ;;  %v2472_v63 = vpack.c.bf16 %v400_v55, %v396_v54  ;;  %v2490_v49 = vpack.c.bf16 %v441_v44, %v437_v43  ;;  %v436_v50 = vld [vmem:[#allocation5 + $0xb80] sm:$0xff]  ;;  %v445_v55 = vld [vmem:[#allocation5 + $0xbc8] sm:$0xff] }
  0xc9   :  { %2963 = vmatprep.subr.bf16.mxu1 %v2962_v61  ;;  %v407_v61 = vld [vmem:[#allocation5 + $0xa98] sm:$0xff]  ;;  %v2984_v0 = vpack.c.bf16 %v402_v58, %v398_v56  ;;  %v442_v54 = vld [vmem:[#allocation5 + $0xbb0] sm:$0xff]  ;;  %v449_v56 = vld [vmem:[#allocation5 + $0xbe8] sm:$0xff] }
  0xca   :  { %v451_v58 = vld [vmem:[#allocation5 + $0xbf8] sm:$0xff] }
  0xcb   :  { %2453 = vmatpush1.bf16.msra.mxu0 %v2452_v3  ;;  %v408_v3 = vld [vmem:[#allocation5 + $0xaa0] sm:$0xff]  ;;  %v59_v32 = vld [vmem:[#allocation2 + $0x38] sm:$0xff] }
  0xcc   :  { %2965 = vmatpush1.bf16.msra.mxu1 %v2964_v4  ;;  %2455 = vmatprep.subr.bf16.mxu0 %v2454_v5  ;;  %v406_v4 = vld [vmem:[#allocation5 + $0xa90] sm:$0xff]  ;;  %v2986_v5 = vpack.c.bf16 %v411_v62, %v407_v61  ;;  %v2476_v11 = vpack.c.bf16 %v408_v3, %v404_v2  ;;  %v2494_v61 = vpack.c.bf16 %v449_v56, %v445_v55  ;;  %v444_v62 = vld [vmem:[#allocation5 + $0xbc0] sm:$0xff]  ;;  %v453_v3 = vld [vmem:[#allocation5 + $0xc08] sm:$0xff] }
  0xcd   :  { %2967 = vmatprep.subr.bf16.mxu1 %v2966_v9  ;;  %v415_v9 = vld [vmem:[#allocation5 + $0xad8] sm:$0xff]  ;;  %v2988_v12 = vpack.c.bf16 %v410_v6, %v406_v4  ;;  %v450_v2 = vld [vmem:[#allocation5 + $0xbf0] sm:$0xff]  ;;  %v457_v4 = vld [vmem:[#allocation5 + $0xc28] sm:$0xff] }
  0xce   :  { %v459_v6 = vld [vmem:[#allocation5 + $0xc38] sm:$0xff] }
  0xcf   :  { %2457 = vmatpush1.bf16.msra.mxu0 %v2456_v15  ;;  %v416_v15 = vld [vmem:[#allocation5 + $0xae0] sm:$0xff]  ;;  %v479_v43 = vld [vmem:[#allocation5 + $0xcd8] sm:$0xff] }
  0xd0   :  { %2969 = vmatpush1.bf16.msra.mxu1 %v2968_v16  ;;  %2459 = vmatprep.subr.bf16.mxu0 %v2458_v17  ;;  %v414_v16 = vld [vmem:[#allocation5 + $0xad0] sm:$0xff]  ;;  %v2990_v17 = vpack.c.bf16 %v419_v10, %v415_v9  ;;  %v2480_v23 = vpack.c.bf16 %v416_v15, %v412_v14  ;;  %v2498_v9 = vpack.c.bf16 %v457_v4, %v453_v3  ;;  %v452_v10 = vld [vmem:[#allocation5 + $0xc00] sm:$0xff]  ;;  %v461_v15 = vld [vmem:[#allocation5 + $0xc48] sm:$0xff] }
  0xd1   :  { %2971 = vmatprep.subr.bf16.mxu1 %v2970_v21  ;;  %v423_v21 = vld [vmem:[#allocation5 + $0xb18] sm:$0xff]  ;;  %v2992_v24 = vpack.c.bf16 %v418_v18, %v414_v16  ;;  %v458_v14 = vld [vmem:[#allocation5 + $0xc30] sm:$0xff]  ;;  %v465_v16 = vld [vmem:[#allocation5 + $0xc68] sm:$0xff] }
  0xd2   :  { %v467_v18 = vld [vmem:[#allocation5 + $0xc78] sm:$0xff] }
  0xd3   :  { %2461 = vmatpush1.bf16.msra.mxu0 %v2460_v27  ;;  %v424_v27 = vld [vmem:[#allocation5 + $0xb20] sm:$0xff]  ;;  %v483_v44 = vld [vmem:[#allocation5 + $0xcf8] sm:$0xff] }
  0xd4   :  { %2973 = vmatpush1.bf16.msra.mxu1 %v2972_v28  ;;  %2463 = vmatprep.subr.bf16.mxu0 %v2462_v29  ;;  %v422_v28 = vld [vmem:[#allocation5 + $0xb10] sm:$0xff]  ;;  %v2994_v29 = vpack.c.bf16 %v427_v22, %v423_v21  ;;  %v2484_v35 = vpack.c.bf16 %v424_v27, %v420_v26  ;;  %v2502_v22 = vpack.c.bf16 %v465_v16, %v461_v15  ;;  %v487_v55 = vld [vmem:[#allocation5 + $0xd18] sm:$0xff] }
  0xd5   :  { %2975 = vmatprep.subr.bf16.mxu1 %v2974_v33  ;;  %v431_v33 = vld [vmem:[#allocation5 + $0xb58] sm:$0xff]  ;;  %v2996_v36 = vpack.c.bf16 %v426_v30, %v422_v28  ;;  %v466_v27 = vld [vmem:[#allocation5 + $0xc70] sm:$0xff]  ;;  %v469_v28 = vld [vmem:[#allocation5 + $0xc88] sm:$0xff] }
  0xd6   :  { %v471_v30 = vld [vmem:[#allocation5 + $0xc98] sm:$0xff] }
  0xd7   :  { %2465 = vmatpush1.bf16.msra.mxu0 %v2464_v39  ;;  %v432_v39 = vld [vmem:[#allocation5 + $0xb60] sm:$0xff]  ;;  %v491_v56 = vld [vmem:[#allocation5 + $0xd38] sm:$0xff] }
  0xd8   :  { %2977 = vmatpush1.bf16.msra.mxu1 %v2976_v40  ;;  %2467 = vmatprep.subr.bf16.mxu0 %v2466_v41  ;;  %v430_v40 = vld [vmem:[#allocation5 + $0xb50] sm:$0xff]  ;;  %v2998_v41 = vpack.c.bf16 %v435_v34, %v431_v33  ;;  %v2488_v47 = vpack.c.bf16 %v432_v39, %v428_v38  ;;  %v3018_v39 = vpack.c.bf16 %v475_v31, %v471_v30  ;;  %v495_v3 = vld [vmem:[#allocation5 + $0xd58] sm:$0xff] }
  0xd9   :  { %2979 = vmatprep.subr.bf16.mxu1 %v2978_v45  ;;  %v439_v45 = vld [vmem:[#allocation5 + $0xb98] sm:$0xff]  ;;  %v3000_v48 = vpack.c.bf16 %v434_v42, %v430_v40  ;;  %v470_v38 = vld [vmem:[#allocation5 + $0xc90] sm:$0xff]  ;;  %v481_v42 = vld [vmem:[#allocation5 + $0xce8] sm:$0xff] }
  0xda   :  { %v474_v40 = vld [vmem:[#allocation5 + $0xcb0] sm:$0xff]  ;;  %v499_v4 = vld [vmem:[#allocation5 + $0xd78] sm:$0xff] }
  0xdb   :  { %2469 = vmatpush1.bf16.msra.mxu0 %v2468_v51  ;;  %v440_v51 = vld [vmem:[#allocation5 + $0xba0] sm:$0xff]  ;;  %v503_v15 = vld [vmem:[#allocation5 + $0xd98] sm:$0xff] }
  0xdc   :  { %2981 = vmatpush1.bf16.msra.mxu1 %v2980_v52  ;;  %2471 = vmatprep.subr.bf16.mxu0 %v2470_v53  ;;  %v438_v52 = vld [vmem:[#allocation5 + $0xb90] sm:$0xff]  ;;  %v3002_v53 = vpack.c.bf16 %v443_v46, %v439_v45  ;;  %v2492_v59 = vpack.c.bf16 %v440_v51, %v436_v50  ;;  %v3020_v46 = vpack.c.bf16 %v474_v40, %v470_v38  ;;  %v507_v16 = vld [vmem:[#allocation5 + $0xdb8] sm:$0xff]  ;;  %v521_v38 = vld [vmem:[#allocation5 + $0xe28] sm:$0xff] }
  0xdd   :  { %2983 = vmatprep.subr.bf16.mxu1 %v2982_v57  ;;  %v447_v57 = vld [vmem:[#allocation5 + $0xbd8] sm:$0xff]  ;;  %v3004_v60 = vpack.c.bf16 %v442_v54, %v438_v52  ;;  %v478_v50 = vld [vmem:[#allocation5 + $0xcd0] sm:$0xff]  ;;  %v3022_v51 = vpack.c.bf16 %v483_v44, %v479_v43  ;;  %v489_v54 = vld [vmem:[#allocation5 + $0xd28] sm:$0xff] }
  0xde   :  { %v482_v52 = vld [vmem:[#allocation5 + $0xcf0] sm:$0xff]  ;;  %v523_v40 = vld [vmem:[#allocation5 + $0xe38] sm:$0xff]  ;;  %v516_v44 = vld [vmem:[#allocation5 + $0xe00] sm:$0xff] }
  0xdf   :  { %2473 = vmatpush1.bf16.msra.mxu0 %v2472_v63  ;;  %v448_v63 = vld [vmem:[#allocation5 + $0xbe0] sm:$0xff] }
  0xe0   :  { %2985 = vmatpush1.bf16.msra.mxu1 %v2984_v0  ;;  %2475 = vmatprep.subr.bf16.mxu0 %v2474_v1  ;;  %v446_v0 = vld [vmem:[#allocation5 + $0xbd0] sm:$0xff]  ;;  %v3006_v1 = vpack.c.bf16 %v451_v58, %v447_v57  ;;  %v2496_v7 = vpack.c.bf16 %v448_v63, %v444_v62  ;;  %v3024_v58 = vpack.c.bf16 %v482_v52, %v478_v50  ;;  %v529_v50 = vld [vmem:[#allocation5 + $0xe68] sm:$0xff]  ;;  %v531_v52 = vld [vmem:[#allocation5 + $0xe78] sm:$0xff] }
  0xe1   :  { %2987 = vmatprep.subr.bf16.mxu1 %v2986_v5  ;;  %v455_v5 = vld [vmem:[#allocation5 + $0xc18] sm:$0xff]  ;;  %v3008_v8 = vpack.c.bf16 %v450_v2, %v446_v0  ;;  %v486_v62 = vld [vmem:[#allocation5 + $0xd10] sm:$0xff]  ;;  %v3026_v63 = vpack.c.bf16 %v491_v56, %v487_v55  ;;  %v497_v2 = vld [vmem:[#allocation5 + $0xd68] sm:$0xff] }
  0xe2   :  { %v490_v0 = vld [vmem:[#allocation5 + $0xd30] sm:$0xff]  ;;  %v524_v56 = vld [vmem:[#allocation5 + $0xe40] sm:$0xff] }
  0xe3   :  { %2477 = vmatpush1.bf16.msra.mxu0 %v2476_v11  ;;  %v456_v11 = vld [vmem:[#allocation5 + $0xc20] sm:$0xff] }
  0xe4   :  { %2989 = vmatpush1.bf16.msra.mxu1 %v2988_v12  ;;  %2479 = vmatprep.subr.bf16.mxu0 %v2478_v13  ;;  %v454_v12 = vld [vmem:[#allocation5 + $0xc10] sm:$0xff]  ;;  %v3010_v13 = vpack.c.bf16 %v459_v6, %v455_v5  ;;  %v2500_v20 = vpack.c.bf16 %v456_v11, %v452_v10  ;;  %v3028_v6 = vpack.c.bf16 %v490_v0, %v486_v62  ;;  %v537_v62 = vld [vmem:[#allocation5 + $0xea8] sm:$0xff]  ;;  %v539_v0 = vld [vmem:[#allocation5 + $0xeb8] sm:$0xff] }
  0xe5   :  { %2991 = vmatprep.subr.bf16.mxu1 %v2990_v17  ;;  %v463_v17 = vld [vmem:[#allocation5 + $0xc58] sm:$0xff]  ;;  %v3012_v21 = vpack.c.bf16 %v458_v14, %v454_v12  ;;  %v494_v10 = vld [vmem:[#allocation5 + $0xd50] sm:$0xff]  ;;  %v3030_v11 = vpack.c.bf16 %v499_v4, %v495_v3  ;;  %v505_v14 = vld [vmem:[#allocation5 + $0xda8] sm:$0xff] }
  0xe6   :  { %v3014_v26 = vpack.c.bf16 %v467_v18, %v463_v17  ;;  %v498_v12 = vld [vmem:[#allocation5 + $0xd70] sm:$0xff]  ;;  %v532_v4 = vld [vmem:[#allocation5 + $0xe80] sm:$0xff] }
  0xe7   :  { %2481 = vmatpush1.bf16.msra.mxu0 %v2480_v23  ;;  %v460_v23 = vld [vmem:[#allocation5 + $0xc40] sm:$0xff]  ;;  %v3032_v18 = vpack.c.bf16 %v498_v12, %v494_v10  ;;  %v545_v10 = vld [vmem:[#allocation5 + $0xee8] sm:$0xff]  ;;  %v547_v12 = vld [vmem:[#allocation5 + $0xef8] sm:$0xff] }
  0xe8   :  { %2993 = vmatpush1.bf16.msra.mxu1 %v2992_v24  ;;  %2483 = vmatprep.subr.bf16.mxu0 %v2482_v25  ;;  %v464_v24 = vld [vmem:[#allocation5 + $0xc60] sm:$0xff]  ;;  %v462_v25 = vld [vmem:[#allocation5 + $0xc50] sm:$0xff] }
  0xe9   :  { %2995 = vmatprep.subr.bf16.mxu1 %v2994_v29  ;;  %v473_v29 = vld [vmem:[#allocation5 + $0xca8] sm:$0xff]  ;;  %v2504_v33 = vpack.c.bf16 %v464_v24, %v460_v23  ;;  %v3016_v34 = vpack.c.bf16 %v466_v27, %v462_v25  ;;  %v3034_v23 = vpack.c.bf16 %v507_v16, %v503_v15  ;;  %v506_v24 = vld [vmem:[#allocation5 + $0xdb0] sm:$0xff]  ;;  %v511_v27 = vld [vmem:[#allocation5 + $0xdd8] sm:$0xff] }
  0xea   :  { %v509_v25 = vld [vmem:[#allocation5 + $0xdc8] sm:$0xff]  ;;  %v540_v16 = vld [vmem:[#allocation5 + $0xec0] sm:$0xff] }
  0xeb   :  { %2485 = vmatpush1.bf16.msra.mxu0 %v2484_v35  ;;  %v2506_v35 = vpack.c.bf16 %v473_v29, %v469_v28  ;;  %v515_v28 = vld [vmem:[#allocation5 + $0xdf8] sm:$0xff] }
  0xec   :  { %2997 = vmatpush1.bf16.msra.mxu1 %v2996_v36  ;;  %2487 = vmatprep.subr.bf16.mxu0 %v2486_v37  ;;  %v468_v36 = vld [vmem:[#allocation5 + $0xc80] sm:$0xff] }
  0xed   :  { %2999 = vmatprep.subr.bf16.mxu1 %v2998_v41  ;;  %v472_v37 = vld [vmem:[#allocation5 + $0xca0] sm:$0xff]  ;;  %v477_v41 = vld [vmem:[#allocation5 + $0xcc8] sm:$0xff] }
  0xee   :  { %v2508_v45 = vpack.c.bf16 %v472_v37, %v468_v36  ;;  %v514_v36 = vld [vmem:[#allocation5 + $0xdf0] sm:$0xff]  ;;  %v517_v37 = vld [vmem:[#allocation5 + $0xe08] sm:$0xff] }
  0xef   :  { %2489 = vmatpush1.bf16.msra.mxu0 %v2488_v47  ;;  %v2510_v47 = vpack.c.bf16 %v481_v42, %v477_v41  ;;  %v2530_v43 = vpack.c.bf16 %v521_v38, %v517_v37 }
  0xf0   :  { %3001 = vmatpush1.bf16.msra.mxu1 %v3000_v48  ;;  %2491 = vmatprep.subr.bf16.mxu0 %v2490_v49  ;;  %v476_v48 = vld [vmem:[#allocation5 + $0xcc0] sm:$0xff] }
  0xf1   :  { %3003 = vmatprep.subr.bf16.mxu1 %v3002_v53  ;;  %v480_v49 = vld [vmem:[#allocation5 + $0xce0] sm:$0xff]  ;;  %v485_v53 = vld [vmem:[#allocation5 + $0xd08] sm:$0xff] }
  0xf2   :  { %v2512_v57 = vpack.c.bf16 %v480_v49, %v476_v48  ;;  %v522_v48 = vld [vmem:[#allocation5 + $0xe30] sm:$0xff]  ;;  %v525_v49 = vld [vmem:[#allocation5 + $0xe48] sm:$0xff] }
  0xf3   :  { %2493 = vmatpush1.bf16.msra.mxu0 %v2492_v59  ;;  %v2514_v59 = vpack.c.bf16 %v489_v54, %v485_v53  ;;  %v2534_v55 = vpack.c.bf16 %v529_v50, %v525_v49 }
  0xf4   :  { %3005 = vmatpush1.bf16.msra.mxu1 %v3004_v60  ;;  %2495 = vmatprep.subr.bf16.mxu0 %v2494_v61  ;;  %v484_v60 = vld [vmem:[#allocation5 + $0xd00] sm:$0xff] }
  0xf5   :  { %3007 = vmatprep.subr.bf16.mxu1 %v3006_v1  ;;  %v488_v61 = vld [vmem:[#allocation5 + $0xd20] sm:$0xff]  ;;  %v493_v1 = vld [vmem:[#allocation5 + $0xd48] sm:$0xff] }
  0xf6   :  { %v2516_v5 = vpack.c.bf16 %v488_v61, %v484_v60  ;;  %v530_v60 = vld [vmem:[#allocation5 + $0xe70] sm:$0xff]  ;;  %v533_v61 = vld [vmem:[#allocation5 + $0xe88] sm:$0xff] }
  0xf7   :  { %2497 = vmatpush1.bf16.msra.mxu0 %v2496_v7  ;;  %v2518_v7 = vpack.c.bf16 %v497_v2, %v493_v1  ;;  %v2538_v3 = vpack.c.bf16 %v537_v62, %v533_v61 }
  0xf8   :  { %3009 = vmatpush1.bf16.msra.mxu1 %v3008_v8  ;;  %2499 = vmatprep.subr.bf16.mxu0 %v2498_v9  ;;  %v492_v8 = vld [vmem:[#allocation5 + $0xd40] sm:$0xff] }
  0xf9   :  { %3011 = vmatprep.subr.bf16.mxu1 %v3010_v13  ;;  %v496_v9 = vld [vmem:[#allocation5 + $0xd60] sm:$0xff]  ;;  %v501_v13 = vld [vmem:[#allocation5 + $0xd88] sm:$0xff] }
  0xfa   :  { %1321 = vmatmul.mubr.f32.vlgmr.msra.gmra.mrb[0].mxu0 %v56_v19  ;;  %v2520_v17 = vpack.c.bf16 %v496_v9, %v492_v8  ;;  %v538_v8 = vld [vmem:[#allocation5 + $0xeb0] sm:$0xff]  ;;  %v541_v9 = vld [vmem:[#allocation5 + $0xec8] sm:$0xff] }
  0xfb   :  { %2501 = vmatpush1.bf16.msra.mxu0 %v2500_v20  ;;  %1889 = vmatmul.mubr.f32.vlgmr.msra.gmra.mrb[0].mxu1 %v56_v19  ;;  %v2522_v19 = vpack.c.bf16 %v505_v14, %v501_v13  ;;  %v500_v20 = vld [vmem:[#allocation5 + $0xd80] sm:$0xff]  ;;  %v2542_v15 = vpack.c.bf16 %v545_v10, %v541_v9 }
  0xfc   :  { %3013 = vmatpush1.bf16.msra.mxu1 %v3012_v21  ;;  %2503 = vmatprep.subr.bf16.mxu0 %v2502_v22  ;;  %v504_v21 = vld [vmem:[#allocation5 + $0xda0] sm:$0xff]  ;;  %v502_v22 = vld [vmem:[#allocation5 + $0xd90] sm:$0xff] }
  0xfd   :  { %3015 = vmatprep.subr.bf16.mxu1 %v3014_v26  ;;  %1391 = vmatprep.mubr.f32.mxu0 %v59_v32  ;;  %v513_v26 = vld [vmem:[#allocation5 + $0xde8] sm:$0xff]  ;;  %v2524_v29 = vpack.c.bf16 %v504_v21, %v500_v20  ;;  %v3036_v30 = vpack.c.bf16 %v506_v24, %v502_v22  ;;  %v546_v20 = vld [vmem:[#allocation5 + $0xef0] sm:$0xff]  ;;  %v555_v24 = vld [vmem:[#allocation5 + $0xf38] sm:$0xff] }
  0xfe   :  { %1959 = vmatprep.mubr.f32.mxu1 %v59_v32  ;;  %v2526_v31 = vpack.c.bf16 %v513_v26, %v509_v25  ;;  %v508_v32 = vld [vmem:[#allocation5 + $0xdc0] sm:$0xff]  ;;  %v549_v21 = vld [vmem:[#allocation5 + $0xf08] sm:$0xff] }
  0xff   :  { %2505 = vmatpush1.bf16.msra.mxu0 %v2504_v33  ;;  %v512_v33 = vld [vmem:[#allocation5 + $0xde0] sm:$0xff]  ;;  %v553_v22 = vld [vmem:[#allocation5 + $0xf28] sm:$0xff] }
 0x100   :  { %3017 = vmatpush1.bf16.msra.mxu1 %v3016_v34  ;;  %2507 = vmatprep.subr.bf16.mxu0 %v2506_v35  ;;  %v510_v34 = vld [vmem:[#allocation5 + $0xdd0] sm:$0xff]  ;;  %v3038_v35 = vpack.c.bf16 %v515_v28, %v511_v27  ;;  %v2528_v41 = vpack.c.bf16 %v512_v33, %v508_v32  ;;  %v2546_v27 = vpack.c.bf16 %v553_v22, %v549_v21  ;;  %v548_v28 = vld [vmem:[#allocation5 + $0xf00] sm:$0xff]  ;;  %v557_v33 = vld [vmem:[#allocation5 + $0xf48] sm:$0xff] }
 0x101   :  { %3019 = vmatprep.subr.bf16.mxu1 %v3018_v39  ;;  %v519_v39 = vld [vmem:[#allocation5 + $0xe18] sm:$0xff]  ;;  %v3040_v42 = vpack.c.bf16 %v514_v36, %v510_v34  ;;  %v554_v32 = vld [vmem:[#allocation5 + $0xf30] sm:$0xff]  ;;  %v561_v34 = vld [vmem:[#allocation5 + $0xf68] sm:$0xff] }
 0x102   :  { %v563_v36 = vld [vmem:[#allocation5 + $0xf78] sm:$0xff]  ;;  %v58_v21 = vld [vmem:[#allocation2 + $0x30] sm:$0xff] }
 0x103   :  { %2509 = vmatpush1.bf16.msra.mxu0 %v2508_v45  ;;  %v520_v45 = vld [vmem:[#allocation5 + $0xe20] sm:$0xff] }
 0x104   :  { %3021 = vmatpush1.bf16.msra.mxu1 %v3020_v46  ;;  %2511 = vmatprep.subr.bf16.mxu0 %v2510_v47  ;;  %v518_v46 = vld [vmem:[#allocation5 + $0xe10] sm:$0xff]  ;;  %v3042_v47 = vpack.c.bf16 %v523_v40, %v519_v39  ;;  %v2532_v53 = vpack.c.bf16 %v520_v45, %v516_v44  ;;  %v2550_v39 = vpack.c.bf16 %v561_v34, %v557_v33  ;;  %v556_v40 = vld [vmem:[#allocation5 + $0xf40] sm:$0xff]  ;;  %v565_v45 = vld [vmem:[#allocation5 + $0xf88] sm:$0xff] }
 0x105   :  { %3023 = vmatprep.subr.bf16.mxu1 %v3022_v51  ;;  %v527_v51 = vld [vmem:[#allocation5 + $0xe58] sm:$0xff]  ;;  %v3044_v54 = vpack.c.bf16 %v522_v48, %v518_v46  ;;  %v562_v44 = vld [vmem:[#allocation5 + $0xf70] sm:$0xff]  ;;  %v569_v46 = vld [vmem:[#allocation5 + $0xfa8] sm:$0xff] }
 0x106   :  { %v571_v48 = vld [vmem:[#allocation5 + $0xfb8] sm:$0xff]  ;;  %v61_v34 = vld [vmem:[#allocation2 + $0x48] sm:$0xff] }
 0x107   :  { %2513 = vmatpush1.bf16.msra.mxu0 %v2512_v57  ;;  %v528_v57 = vld [vmem:[#allocation5 + $0xe60] sm:$0xff]  ;;  %v603_v33 = vld [vmem:[#allocation5 + $0x10b8] sm:$0xff] }
 0x108   :  { %3025 = vmatpush1.bf16.msra.mxu1 %v3024_v58  ;;  %2515 = vmatprep.subr.bf16.mxu0 %v2514_v59  ;;  %v526_v58 = vld [vmem:[#allocation5 + $0xe50] sm:$0xff]  ;;  %v3046_v59 = vpack.c.bf16 %v531_v52, %v527_v51  ;;  %v2536_v1 = vpack.c.bf16 %v528_v57, %v524_v56  ;;  %v2554_v51 = vpack.c.bf16 %v569_v46, %v565_v45  ;;  %v564_v52 = vld [vmem:[#allocation5 + $0xf80] sm:$0xff]  ;;  %v573_v57 = vld [vmem:[#allocation5 + $0xfc8] sm:$0xff] }
 0x109   :  { %3027 = vmatprep.subr.bf16.mxu1 %v3026_v63  ;;  %v535_v63 = vld [vmem:[#allocation5 + $0xe98] sm:$0xff]  ;;  %v3048_v2 = vpack.c.bf16 %v530_v60, %v526_v58  ;;  %v570_v56 = vld [vmem:[#allocation5 + $0xfb0] sm:$0xff]  ;;  %v577_v58 = vld [vmem:[#allocation5 + $0xfe8] sm:$0xff] }
 0x10a   :  { %v579_v60 = vld [vmem:[#allocation5 + $0xff8] sm:$0xff] }
 0x10b   :  { %2517 = vmatpush1.bf16.msra.mxu0 %v2516_v5  ;;  %v536_v5 = vld [vmem:[#allocation5 + $0xea0] sm:$0xff]  ;;  %v607_v45 = vld [vmem:[#allocation5 + $0x10d8] sm:$0xff] }
 0x10c   :  { %3029 = vmatpush1.bf16.msra.mxu1 %v3028_v6  ;;  %2519 = vmatprep.subr.bf16.mxu0 %v2518_v7  ;;  %v534_v6 = vld [vmem:[#allocation5 + $0xe90] sm:$0xff]  ;;  %v3050_v7 = vpack.c.bf16 %v539_v0, %v535_v63  ;;  %v2540_v13 = vpack.c.bf16 %v536_v5, %v532_v4  ;;  %v2558_v63 = vpack.c.bf16 %v577_v58, %v573_v57  ;;  %v572_v0 = vld [vmem:[#allocation5 + $0xfc0] sm:$0xff]  ;;  %v581_v5 = vld [vmem:[#allocation5 + $0x1008] sm:$0xff] }
 0x10d   :  { %3031 = vmatprep.subr.bf16.mxu1 %v3030_v11  ;;  %v543_v11 = vld [vmem:[#allocation5 + $0xed8] sm:$0xff]  ;;  %v3052_v14 = vpack.c.bf16 %v538_v8, %v534_v6  ;;  %v578_v4 = vld [vmem:[#allocation5 + $0xff0] sm:$0xff]  ;;  %v585_v6 = vld [vmem:[#allocation5 + $0x1028] sm:$0xff] }
 0x10e   :  { %v587_v8 = vld [vmem:[#allocation5 + $0x1038] sm:$0xff] }
 0x10f   :  { %2521 = vmatpush1.bf16.msra.mxu0 %v2520_v17  ;;  %v544_v17 = vld [vmem:[#allocation5 + $0xee0] sm:$0xff]  ;;  %v611_v46 = vld [vmem:[#allocation5 + $0x10f8] sm:$0xff] }
 0x110   :  { %3033 = vmatpush1.bf16.msra.mxu1 %v3032_v18  ;;  %2523 = vmatprep.subr.bf16.mxu0 %v2522_v19  ;;  %v542_v18 = vld [vmem:[#allocation5 + $0xed0] sm:$0xff]  ;;  %v3054_v19 = vpack.c.bf16 %v547_v12, %v543_v11  ;;  %v2544_v25 = vpack.c.bf16 %v544_v17, %v540_v16  ;;  %v2562_v11 = vpack.c.bf16 %v585_v6, %v581_v5  ;;  %v580_v12 = vld [vmem:[#allocation5 + $0x1000] sm:$0xff]  ;;  %v589_v17 = vld [vmem:[#allocation5 + $0x1048] sm:$0xff] }
 0x111   :  { %3035 = vmatprep.subr.bf16.mxu1 %v3034_v23  ;;  %v551_v23 = vld [vmem:[#allocation5 + $0xf18] sm:$0xff]  ;;  %v3056_v26 = vpack.c.bf16 %v546_v20, %v542_v18  ;;  %v586_v16 = vld [vmem:[#allocation5 + $0x1030] sm:$0xff]  ;;  %v593_v18 = vld [vmem:[#allocation5 + $0x1068] sm:$0xff] }
 0x112   :  { %v595_v20 = vld [vmem:[#allocation5 + $0x1078] sm:$0xff] }
 0x113   :  { %2525 = vmatpush1.bf16.msra.mxu0 %v2524_v29  ;;  %v552_v29 = vld [vmem:[#allocation5 + $0xf20] sm:$0xff]  ;;  %v615_v57 = vld [vmem:[#allocation5 + $0x1118] sm:$0xff] }
 0x114   :  { %3037 = vmatpush1.bf16.msra.mxu1 %v3036_v30  ;;  %2527 = vmatprep.subr.bf16.mxu0 %v2526_v31  ;;  %v550_v30 = vld [vmem:[#allocation5 + $0xf10] sm:$0xff]  ;;  %v3058_v31 = vpack.c.bf16 %v555_v24, %v551_v23  ;;  %v2548_v37 = vpack.c.bf16 %v552_v29, %v548_v28  ;;  %v2566_v24 = vpack.c.bf16 %v593_v18, %v589_v17  ;;  %v619_v58 = vld [vmem:[#allocation5 + $0x1138] sm:$0xff] }
 0x115   :  { %3039 = vmatprep.subr.bf16.mxu1 %v3038_v35  ;;  %v559_v35 = vld [vmem:[#allocation5 + $0xf58] sm:$0xff]  ;;  %v3060_v38 = vpack.c.bf16 %v554_v32, %v550_v30  ;;  %v594_v29 = vld [vmem:[#allocation5 + $0x1070] sm:$0xff]  ;;  %v597_v30 = vld [vmem:[#allocation5 + $0x1088] sm:$0xff] }
 0x116   :  { %v599_v32 = vld [vmem:[#allocation5 + $0x1098] sm:$0xff] }
 0x117   :  { %2529 = vmatpush1.bf16.msra.mxu0 %v2528_v41  ;;  %v560_v41 = vld [vmem:[#allocation5 + $0xf60] sm:$0xff]  ;;  %v623_v5 = vld [vmem:[#allocation5 + $0x1158] sm:$0xff] }
 0x118   :  { %3041 = vmatpush1.bf16.msra.mxu1 %v3040_v42  ;;  %2531 = vmatprep.subr.bf16.mxu0 %v2530_v43  ;;  %v558_v42 = vld [vmem:[#allocation5 + $0xf50] sm:$0xff]  ;;  %v3062_v43 = vpack.c.bf16 %v563_v36, %v559_v35  ;;  %v2552_v49 = vpack.c.bf16 %v560_v41, %v556_v40  ;;  %v3082_v41 = vpack.c.bf16 %v603_v33, %v599_v32  ;;  %v627_v6 = vld [vmem:[#allocation5 + $0x1178] sm:$0xff] }
 0x119   :  { %3043 = vmatprep.subr.bf16.mxu1 %v3042_v47  ;;  %v567_v47 = vld [vmem:[#allocation5 + $0xf98] sm:$0xff]  ;;  %v3064_v50 = vpack.c.bf16 %v562_v44, %v558_v42  ;;  %v598_v40 = vld [vmem:[#allocation5 + $0x1090] sm:$0xff]  ;;  %v609_v44 = vld [vmem:[#allocation5 + $0x10e8] sm:$0xff] }
 0x11a   :  { %v602_v42 = vld [vmem:[#allocation5 + $0x10b0] sm:$0xff]  ;;  %v631_v17 = vld [vmem:[#allocation5 + $0x1198] sm:$0xff] }
 0x11b   :  { %2533 = vmatpush1.bf16.msra.mxu0 %v2532_v53  ;;  %v568_v53 = vld [vmem:[#allocation5 + $0xfa0] sm:$0xff]  ;;  %v635_v18 = vld [vmem:[#allocation5 + $0x11b8] sm:$0xff] }
 0x11c   :  { %3045 = vmatpush1.bf16.msra.mxu1 %v3044_v54  ;;  %2535 = vmatprep.subr.bf16.mxu0 %v2534_v55  ;;  %v566_v54 = vld [vmem:[#allocation5 + $0xf90] sm:$0xff]  ;;  %v3066_v55 = vpack.c.bf16 %v571_v48, %v567_v47  ;;  %v2556_v61 = vpack.c.bf16 %v568_v53, %v564_v52  ;;  %v3084_v48 = vpack.c.bf16 %v602_v42, %v598_v40  ;;  %v649_v40 = vld [vmem:[#allocation5 + $0x1228] sm:$0xff]  ;;  %v651_v42 = vld [vmem:[#allocation5 + $0x1238] sm:$0xff] }
 0x11d   :  { %3047 = vmatprep.subr.bf16.mxu1 %v3046_v59  ;;  %v575_v59 = vld [vmem:[#allocation5 + $0xfd8] sm:$0xff]  ;;  %v3068_v62 = vpack.c.bf16 %v570_v56, %v566_v54  ;;  %v606_v52 = vld [vmem:[#allocation5 + $0x10d0] sm:$0xff]  ;;  %v3086_v53 = vpack.c.bf16 %v611_v46, %v607_v45  ;;  %v617_v56 = vld [vmem:[#allocation5 + $0x1128] sm:$0xff] }
 0x11e   :  { %v610_v54 = vld [vmem:[#allocation5 + $0x10f0] sm:$0xff]  ;;  %v644_v46 = vld [vmem:[#allocation5 + $0x1200] sm:$0xff] }
 0x11f   :  { %2537 = vmatpush1.bf16.msra.mxu0 %v2536_v1  ;;  %v576_v1 = vld [vmem:[#allocation5 + $0xfe0] sm:$0xff] }
 0x120   :  { %3049 = vmatpush1.bf16.msra.mxu1 %v3048_v2  ;;  %2539 = vmatprep.subr.bf16.mxu0 %v2538_v3  ;;  %v574_v2 = vld [vmem:[#allocation5 + $0xfd0] sm:$0xff]  ;;  %v3070_v3 = vpack.c.bf16 %v579_v60, %v575_v59  ;;  %v2560_v9 = vpack.c.bf16 %v576_v1, %v572_v0  ;;  %v3088_v60 = vpack.c.bf16 %v610_v54, %v606_v52  ;;  %v657_v52 = vld [vmem:[#allocation5 + $0x1268] sm:$0xff]  ;;  %v659_v54 = vld [vmem:[#allocation5 + $0x1278] sm:$0xff] }
 0x121   :  { %3051 = vmatprep.subr.bf16.mxu1 %v3050_v7  ;;  %v583_v7 = vld [vmem:[#allocation5 + $0x1018] sm:$0xff]  ;;  %v3072_v10 = vpack.c.bf16 %v578_v4, %v574_v2  ;;  %v614_v0 = vld [vmem:[#allocation5 + $0x1110] sm:$0xff]  ;;  %v3090_v1 = vpack.c.bf16 %v619_v58, %v615_v57  ;;  %v625_v4 = vld [vmem:[#allocation5 + $0x1168] sm:$0xff] }
 0x122   :  { %v618_v2 = vld [vmem:[#allocation5 + $0x1130] sm:$0xff]  ;;  %v652_v58 = vld [vmem:[#allocation5 + $0x1240] sm:$0xff] }
 0x123   :  { %2541 = vmatpush1.bf16.msra.mxu0 %v2540_v13  ;;  %v584_v13 = vld [vmem:[#allocation5 + $0x1020] sm:$0xff] }
 0x124   :  { %3053 = vmatpush1.bf16.msra.mxu1 %v3052_v14  ;;  %2543 = vmatprep.subr.bf16.mxu0 %v2542_v15  ;;  %v582_v14 = vld [vmem:[#allocation5 + $0x1010] sm:$0xff]  ;;  %v3074_v15 = vpack.c.bf16 %v587_v8, %v583_v7  ;;  %v2564_v22 = vpack.c.bf16 %v584_v13, %v580_v12  ;;  %v3092_v8 = vpack.c.bf16 %v618_v2, %v614_v0  ;;  %v665_v0 = vld [vmem:[#allocation5 + $0x12a8] sm:$0xff]  ;;  %v667_v2 = vld [vmem:[#allocation5 + $0x12b8] sm:$0xff] }
 0x125   :  { %3055 = vmatprep.subr.bf16.mxu1 %v3054_v19  ;;  %v591_v19 = vld [vmem:[#allocation5 + $0x1058] sm:$0xff]  ;;  %v3076_v23 = vpack.c.bf16 %v586_v16, %v582_v14  ;;  %v622_v12 = vld [vmem:[#allocation5 + $0x1150] sm:$0xff]  ;;  %v3094_v13 = vpack.c.bf16 %v627_v6, %v623_v5  ;;  %v633_v16 = vld [vmem:[#allocation5 + $0x11a8] sm:$0xff] }
 0x126   :  { %v3078_v28 = vpack.c.bf16 %v595_v20, %v591_v19  ;;  %v626_v14 = vld [vmem:[#allocation5 + $0x1170] sm:$0xff]  ;;  %v660_v6 = vld [vmem:[#allocation5 + $0x1280] sm:$0xff] }
 0x127   :  { %2545 = vmatpush1.bf16.msra.mxu0 %v2544_v25  ;;  %v588_v25 = vld [vmem:[#allocation5 + $0x1040] sm:$0xff]  ;;  %v3096_v20 = vpack.c.bf16 %v626_v14, %v622_v12  ;;  %v673_v12 = vld [vmem:[#allocation5 + $0x12e8] sm:$0xff]  ;;  %v675_v14 = vld [vmem:[#allocation5 + $0x12f8] sm:$0xff] }
 0x128   :  { %3057 = vmatpush1.bf16.msra.mxu1 %v3056_v26  ;;  %2547 = vmatprep.subr.bf16.mxu0 %v2546_v27  ;;  %v592_v26 = vld [vmem:[#allocation5 + $0x1060] sm:$0xff]  ;;  %v590_v27 = vld [vmem:[#allocation5 + $0x1050] sm:$0xff] }
 0x129   :  { %3059 = vmatprep.subr.bf16.mxu1 %v3058_v31  ;;  %v601_v31 = vld [vmem:[#allocation5 + $0x10a8] sm:$0xff]  ;;  %v2568_v35 = vpack.c.bf16 %v592_v26, %v588_v25  ;;  %v3080_v36 = vpack.c.bf16 %v594_v29, %v590_v27  ;;  %v3098_v25 = vpack.c.bf16 %v635_v18, %v631_v17  ;;  %v634_v26 = vld [vmem:[#allocation5 + $0x11b0] sm:$0xff]  ;;  %v639_v29 = vld [vmem:[#allocation5 + $0x11d8] sm:$0xff] }
 0x12a   :  { %v637_v27 = vld [vmem:[#allocation5 + $0x11c8] sm:$0xff]  ;;  %v668_v18 = vld [vmem:[#allocation5 + $0x12c0] sm:$0xff] }
 0x12b   :  { %2549 = vmatpush1.bf16.msra.mxu0 %v2548_v37  ;;  %v2570_v37 = vpack.c.bf16 %v601_v31, %v597_v30  ;;  %v643_v30 = vld [vmem:[#allocation5 + $0x11f8] sm:$0xff] }
 0x12c   :  { %3061 = vmatpush1.bf16.msra.mxu1 %v3060_v38  ;;  %2551 = vmatprep.subr.bf16.mxu0 %v2550_v39  ;;  %v596_v38 = vld [vmem:[#allocation5 + $0x1080] sm:$0xff] }
 0x12d   :  { %3063 = vmatprep.subr.bf16.mxu1 %v3062_v43  ;;  %v600_v39 = vld [vmem:[#allocation5 + $0x10a0] sm:$0xff]  ;;  %v605_v43 = vld [vmem:[#allocation5 + $0x10c8] sm:$0xff] }
 0x12e   :  { %v2572_v47 = vpack.c.bf16 %v600_v39, %v596_v38  ;;  %v642_v38 = vld [vmem:[#allocation5 + $0x11f0] sm:$0xff]  ;;  %v645_v39 = vld [vmem:[#allocation5 + $0x1208] sm:$0xff] }
 0x12f   :  { %2553 = vmatpush1.bf16.msra.mxu0 %v2552_v49  ;;  %v2574_v49 = vpack.c.bf16 %v609_v44, %v605_v43  ;;  %v2594_v45 = vpack.c.bf16 %v649_v40, %v645_v39 }
 0x130   :  { %3065 = vmatpush1.bf16.msra.mxu1 %v3064_v50  ;;  %2555 = vmatprep.subr.bf16.mxu0 %v2554_v51  ;;  %v604_v50 = vld [vmem:[#allocation5 + $0x10c0] sm:$0xff] }
 0x131   :  { %3067 = vmatprep.subr.bf16.mxu1 %v3066_v55  ;;  %v608_v51 = vld [vmem:[#allocation5 + $0x10e0] sm:$0xff]  ;;  %v613_v55 = vld [vmem:[#allocation5 + $0x1108] sm:$0xff] }
 0x132   :  { %v2576_v59 = vpack.c.bf16 %v608_v51, %v604_v50  ;;  %v650_v50 = vld [vmem:[#allocation5 + $0x1230] sm:$0xff]  ;;  %v653_v51 = vld [vmem:[#allocation5 + $0x1248] sm:$0xff] }
 0x133   :  { %2557 = vmatpush1.bf16.msra.mxu0 %v2556_v61  ;;  %v2578_v61 = vpack.c.bf16 %v617_v56, %v613_v55  ;;  %v2598_v57 = vpack.c.bf16 %v657_v52, %v653_v51 }
 0x134   :  { %3069 = vmatpush1.bf16.msra.mxu1 %v3068_v62  ;;  %2559 = vmatprep.subr.bf16.mxu0 %v2558_v63  ;;  %v612_v62 = vld [vmem:[#allocation5 + $0x1100] sm:$0xff] }
 0x135   :  { %3071 = vmatprep.subr.bf16.mxu1 %v3070_v3  ;;  %v616_v63 = vld [vmem:[#allocation5 + $0x1120] sm:$0xff]  ;;  %v621_v3 = vld [vmem:[#allocation5 + $0x1148] sm:$0xff] }
 0x136   :  { %v2580_v7 = vpack.c.bf16 %v616_v63, %v612_v62  ;;  %v658_v62 = vld [vmem:[#allocation5 + $0x1270] sm:$0xff]  ;;  %v661_v63 = vld [vmem:[#allocation5 + $0x1288] sm:$0xff] }
 0x137   :  { %2561 = vmatpush1.bf16.msra.mxu0 %v2560_v9  ;;  %v2582_v9 = vpack.c.bf16 %v625_v4, %v621_v3  ;;  %v2602_v5 = vpack.c.bf16 %v665_v0, %v661_v63 }
 0x138   :  { %3073 = vmatpush1.bf16.msra.mxu1 %v3072_v10  ;;  %2563 = vmatprep.subr.bf16.mxu0 %v2562_v11  ;;  %v620_v10 = vld [vmem:[#allocation5 + $0x1140] sm:$0xff] }
 0x139   :  { %3075 = vmatprep.subr.bf16.mxu1 %v3074_v15  ;;  %v624_v11 = vld [vmem:[#allocation5 + $0x1160] sm:$0xff]  ;;  %v629_v15 = vld [vmem:[#allocation5 + $0x1188] sm:$0xff] }
 0x13a   :  { %1392 = vmatmul.mubr.f32.vlgmr.msra.gmra.mrb[0].mxu0 %v58_v21  ;;  %v2584_v19 = vpack.c.bf16 %v624_v11, %v620_v10  ;;  %v666_v10 = vld [vmem:[#allocation5 + $0x12b0] sm:$0xff]  ;;  %v669_v11 = vld [vmem:[#allocation5 + $0x12c8] sm:$0xff] }
 0x13b   :  { %2565 = vmatpush1.bf16.msra.mxu0 %v2564_v22  ;;  %1960 = vmatmul.mubr.f32.vlgmr.msra.gmra.mrb[0].mxu1 %v58_v21  ;;  %v2586_v21 = vpack.c.bf16 %v633_v16, %v629_v15  ;;  %v628_v22 = vld [vmem:[#allocation5 + $0x1180] sm:$0xff]  ;;  %v2606_v17 = vpack.c.bf16 %v673_v12, %v669_v11 }
 0x13c   :  { %3077 = vmatpush1.bf16.msra.mxu1 %v3076_v23  ;;  %2567 = vmatprep.subr.bf16.mxu0 %v2566_v24  ;;  %v632_v23 = vld [vmem:[#allocation5 + $0x11a0] sm:$0xff]  ;;  %v630_v24 = vld [vmem:[#allocation5 + $0x1190] sm:$0xff] }
 0x13d   :  { %3079 = vmatprep.subr.bf16.mxu1 %v3078_v28  ;;  %1462 = vmatprep.mubr.f32.mxu0 %v61_v34  ;;  %v641_v28 = vld [vmem:[#allocation5 + $0x11e8] sm:$0xff]  ;;  %v2588_v31 = vpack.c.bf16 %v632_v23, %v628_v22  ;;  %v3100_v32 = vpack.c.bf16 %v634_v26, %v630_v24  ;;  %v674_v22 = vld [vmem:[#allocation5 + $0x12f0] sm:$0xff]  ;;  %v683_v26 = vld [vmem:[#allocation5 + $0x1338] sm:$0xff] }
 0x13e   :  { %2030 = vmatprep.mubr.f32.mxu1 %v61_v34  ;;  %v2590_v33 = vpack.c.bf16 %v641_v28, %v637_v27  ;;  %v636_v34 = vld [vmem:[#allocation5 + $0x11c0] sm:$0xff]  ;;  %v677_v23 = vld [vmem:[#allocation5 + $0x1308] sm:$0xff] }
 0x13f   :  { %2569 = vmatpush1.bf16.msra.mxu0 %v2568_v35  ;;  %v640_v35 = vld [vmem:[#allocation5 + $0x11e0] sm:$0xff]  ;;  %v681_v24 = vld [vmem:[#allocation5 + $0x1328] sm:$0xff] }
 0x140   :  { %3081 = vmatpush1.bf16.msra.mxu1 %v3080_v36  ;;  %2571 = vmatprep.subr.bf16.mxu0 %v2570_v37  ;;  %v638_v36 = vld [vmem:[#allocation5 + $0x11d0] sm:$0xff]  ;;  %v3102_v37 = vpack.c.bf16 %v643_v30, %v639_v29  ;;  %v2592_v43 = vpack.c.bf16 %v640_v35, %v636_v34  ;;  %v2610_v29 = vpack.c.bf16 %v681_v24, %v677_v23  ;;  %v676_v30 = vld [vmem:[#allocation5 + $0x1300] sm:$0xff]  ;;  %v685_v35 = vld [vmem:[#allocation5 + $0x1348] sm:$0xff] }
 0x141   :  { %3083 = vmatprep.subr.bf16.mxu1 %v3082_v41  ;;  %v647_v41 = vld [vmem:[#allocation5 + $0x1218] sm:$0xff]  ;;  %v3104_v44 = vpack.c.bf16 %v642_v38, %v638_v36  ;;  %v682_v34 = vld [vmem:[#allocation5 + $0x1330] sm:$0xff]  ;;  %v689_v36 = vld [vmem:[#allocation5 + $0x1368] sm:$0xff] }
 0x142   :  { %v691_v38 = vld [vmem:[#allocation5 + $0x1378] sm:$0xff]  ;;  %v60_v23 = vld [vmem:[#allocation2 + $0x40] sm:$0xff] }
 0x143   :  { %2573 = vmatpush1.bf16.msra.mxu0 %v2572_v47  ;;  %v648_v47 = vld [vmem:[#allocation5 + $0x1220] sm:$0xff] }
 0x144   :  { %3085 = vmatpush1.bf16.msra.mxu1 %v3084_v48  ;;  %2575 = vmatprep.subr.bf16.mxu0 %v2574_v49  ;;  %v646_v48 = vld [vmem:[#allocation5 + $0x1210] sm:$0xff]  ;;  %v3106_v49 = vpack.c.bf16 %v651_v42, %v647_v41  ;;  %v2596_v55 = vpack.c.bf16 %v648_v47, %v644_v46  ;;  %v2614_v41 = vpack.c.bf16 %v689_v36, %v685_v35  ;;  %v684_v42 = vld [vmem:[#allocation5 + $0x1340] sm:$0xff]  ;;  %v693_v47 = vld [vmem:[#allocation5 + $0x1388] sm:$0xff] }
 0x145   :  { %3087 = vmatprep.subr.bf16.mxu1 %v3086_v53  ;;  %v655_v53 = vld [vmem:[#allocation5 + $0x1258] sm:$0xff]  ;;  %v3108_v56 = vpack.c.bf16 %v650_v50, %v646_v48  ;;  %v690_v46 = vld [vmem:[#allocation5 + $0x1370] sm:$0xff]  ;;  %v697_v48 = vld [vmem:[#allocation5 + $0x13a8] sm:$0xff] }
 0x146   :  { %v699_v50 = vld [vmem:[#allocation5 + $0x13b8] sm:$0xff] }
 0x147   :  { %2577 = vmatpush1.bf16.msra.mxu0 %v2576_v59  ;;  %v656_v59 = vld [vmem:[#allocation5 + $0x1260] sm:$0xff]  ;;  %v731_v35 = vld [vmem:[#allocation5 + $0x14b8] sm:$0xff] }
 0x148   :  { %3089 = vmatpush1.bf16.msra.mxu1 %v3088_v60  ;;  %2579 = vmatprep.subr.bf16.mxu0 %v2578_v61  ;;  %v654_v60 = vld [vmem:[#allocation5 + $0x1250] sm:$0xff]  ;;  %v3110_v61 = vpack.c.bf16 %v659_v54, %v655_v53  ;;  %v2600_v3 = vpack.c.bf16 %v656_v59, %v652_v58  ;;  %v2618_v53 = vpack.c.bf16 %v697_v48, %v693_v47  ;;  %v692_v54 = vld [vmem:[#allocation5 + $0x1380] sm:$0xff]  ;;  %v701_v59 = vld [vmem:[#allocation5 + $0x13c8] sm:$0xff] }
 0x149   :  { %3091 = vmatprep.subr.bf16.mxu1 %v3090_v1  ;;  %v663_v1 = vld [vmem:[#allocation5 + $0x1298] sm:$0xff]  ;;  %v3112_v4 = vpack.c.bf16 %v658_v62, %v654_v60  ;;  %v698_v58 = vld [vmem:[#allocation5 + $0x13b0] sm:$0xff]  ;;  %v705_v60 = vld [vmem:[#allocation5 + $0x13e8] sm:$0xff] }
 0x14a   :  { %v707_v62 = vld [vmem:[#allocation5 + $0x13f8] sm:$0xff] }
 0x14b   :  { %2581 = vmatpush1.bf16.msra.mxu0 %v2580_v7  ;;  %v664_v7 = vld [vmem:[#allocation5 + $0x12a0] sm:$0xff]  ;;  %v63_v36 = vld [vmem:[#allocation2 + $0x58] sm:$0xff] }
 0x14c   :  { %3093 = vmatpush1.bf16.msra.mxu1 %v3092_v8  ;;  %2583 = vmatprep.subr.bf16.mxu0 %v2582_v9  ;;  %v662_v8 = vld [vmem:[#allocation5 + $0x1290] sm:$0xff]  ;;  %v3114_v9 = vpack.c.bf16 %v667_v2, %v663_v1  ;;  %v2604_v15 = vpack.c.bf16 %v664_v7, %v660_v6  ;;  %v2622_v1 = vpack.c.bf16 %v705_v60, %v701_v59  ;;  %v700_v2 = vld [vmem:[#allocation5 + $0x13c0] sm:$0xff]  ;;  %v709_v7 = vld [vmem:[#allocation5 + $0x1408] sm:$0xff] }
 0x14d   :  { %3095 = vmatprep.subr.bf16.mxu1 %v3094_v13  ;;  %v671_v13 = vld [vmem:[#allocation5 + $0x12d8] sm:$0xff]  ;;  %v3116_v16 = vpack.c.bf16 %v666_v10, %v662_v8  ;;  %v706_v6 = vld [vmem:[#allocation5 + $0x13f0] sm:$0xff]  ;;  %v713_v8 = vld [vmem:[#allocation5 + $0x1428] sm:$0xff] }
 0x14e   :  { %v715_v10 = vld [vmem:[#allocation5 + $0x1438] sm:$0xff] }
 0x14f   :  { %2585 = vmatpush1.bf16.msra.mxu0 %v2584_v19  ;;  %v672_v19 = vld [vmem:[#allocation5 + $0x12e0] sm:$0xff]  ;;  %v735_v47 = vld [vmem:[#allocation5 + $0x14d8] sm:$0xff] }
 0x150   :  { %3097 = vmatpush1.bf16.msra.mxu1 %v3096_v20  ;;  %2587 = vmatprep.subr.bf16.mxu0 %v2586_v21  ;;  %v670_v20 = vld [vmem:[#allocation5 + $0x12d0] sm:$0xff]  ;;  %v3118_v21 = vpack.c.bf16 %v675_v14, %v671_v13  ;;  %v2608_v27 = vpack.c.bf16 %v672_v19, %v668_v18  ;;  %v2626_v13 = vpack.c.bf16 %v713_v8, %v709_v7  ;;  %v708_v14 = vld [vmem:[#allocation5 + $0x1400] sm:$0xff]  ;;  %v717_v19 = vld [vmem:[#allocation5 + $0x1448] sm:$0xff] }
 0x151   :  { %3099 = vmatprep.subr.bf16.mxu1 %v3098_v25  ;;  %v679_v25 = vld [vmem:[#allocation5 + $0x1318] sm:$0xff]  ;;  %v3120_v28 = vpack.c.bf16 %v674_v22, %v670_v20  ;;  %v714_v18 = vld [vmem:[#allocation5 + $0x1430] sm:$0xff]  ;;  %v721_v20 = vld [vmem:[#allocation5 + $0x1468] sm:$0xff] }
 0x152   :  { %v723_v22 = vld [vmem:[#allocation5 + $0x1478] sm:$0xff] }
 0x153   :  { %2589 = vmatpush1.bf16.msra.mxu0 %v2588_v31  ;;  %v680_v31 = vld [vmem:[#allocation5 + $0x1320] sm:$0xff]  ;;  %v739_v48 = vld [vmem:[#allocation5 + $0x14f8] sm:$0xff] }
 0x154   :  { %3101 = vmatpush1.bf16.msra.mxu1 %v3100_v32  ;;  %2591 = vmatprep.subr.bf16.mxu0 %v2590_v33  ;;  %v678_v32 = vld [vmem:[#allocation5 + $0x1310] sm:$0xff]  ;;  %v3122_v33 = vpack.c.bf16 %v683_v26, %v679_v25  ;;  %v2612_v39 = vpack.c.bf16 %v680_v31, %v676_v30  ;;  %v2630_v26 = vpack.c.bf16 %v721_v20, %v717_v19  ;;  %v743_v59 = vld [vmem:[#allocation5 + $0x1518] sm:$0xff] }
 0x155   :  { %3103 = vmatprep.subr.bf16.mxu1 %v3102_v37  ;;  %v687_v37 = vld [vmem:[#allocation5 + $0x1358] sm:$0xff]  ;;  %v3124_v40 = vpack.c.bf16 %v682_v34, %v678_v32  ;;  %v722_v31 = vld [vmem:[#allocation5 + $0x1470] sm:$0xff]  ;;  %v725_v32 = vld [vmem:[#allocation5 + $0x1488] sm:$0xff] }
 0x156   :  { %v727_v34 = vld [vmem:[#allocation5 + $0x1498] sm:$0xff] }
 0x157   :  { %2593 = vmatpush1.bf16.msra.mxu0 %v2592_v43  ;;  %v688_v43 = vld [vmem:[#allocation5 + $0x1360] sm:$0xff]  ;;  %v747_v60 = vld [vmem:[#allocation5 + $0x1538] sm:$0xff] }
 0x158   :  { %3105 = vmatpush1.bf16.msra.mxu1 %v3104_v44  ;;  %2595 = vmatprep.subr.bf16.mxu0 %v2594_v45  ;;  %v686_v44 = vld [vmem:[#allocation5 + $0x1350] sm:$0xff]  ;;  %v3126_v45 = vpack.c.bf16 %v691_v38, %v687_v37  ;;  %v2616_v51 = vpack.c.bf16 %v688_v43, %v684_v42  ;;  %v3146_v43 = vpack.c.bf16 %v731_v35, %v727_v34  ;;  %v751_v7 = vld [vmem:[#allocation5 + $0x1558] sm:$0xff] }
 0x159   :  { %3107 = vmatprep.subr.bf16.mxu1 %v3106_v49  ;;  %v695_v49 = vld [vmem:[#allocation5 + $0x1398] sm:$0xff]  ;;  %v3128_v52 = vpack.c.bf16 %v690_v46, %v686_v44  ;;  %v726_v42 = vld [vmem:[#allocation5 + $0x1490] sm:$0xff]  ;;  %v737_v46 = vld [vmem:[#allocation5 + $0x14e8] sm:$0xff] }
 0x15a   :  { %v730_v44 = vld [vmem:[#allocation5 + $0x14b0] sm:$0xff]  ;;  %v755_v8 = vld [vmem:[#allocation5 + $0x1578] sm:$0xff] }
 0x15b   :  { %2597 = vmatpush1.bf16.msra.mxu0 %v2596_v55  ;;  %v696_v55 = vld [vmem:[#allocation5 + $0x13a0] sm:$0xff]  ;;  %v759_v19 = vld [vmem:[#allocation5 + $0x1598] sm:$0xff] }
 0x15c   :  { %3109 = vmatpush1.bf16.msra.mxu1 %v3108_v56  ;;  %2599 = vmatprep.subr.bf16.mxu0 %v2598_v57  ;;  %v694_v56 = vld [vmem:[#allocation5 + $0x1390] sm:$0xff]  ;;  %v3130_v57 = vpack.c.bf16 %v699_v50, %v695_v49  ;;  %v2620_v63 = vpack.c.bf16 %v696_v55, %v692_v54  ;;  %v3148_v50 = vpack.c.bf16 %v730_v44, %v726_v42  ;;  %v763_v20 = vld [vmem:[#allocation5 + $0x15b8] sm:$0xff]  ;;  %v777_v42 = vld [vmem:[#allocation5 + $0x1628] sm:$0xff] }
 0x15d   :  { %3111 = vmatprep.subr.bf16.mxu1 %v3110_v61  ;;  %v703_v61 = vld [vmem:[#allocation5 + $0x13d8] sm:$0xff]  ;;  %v3132_v0 = vpack.c.bf16 %v698_v58, %v694_v56  ;;  %v734_v54 = vld [vmem:[#allocation5 + $0x14d0] sm:$0xff]  ;;  %v3150_v55 = vpack.c.bf16 %v739_v48, %v735_v47  ;;  %v745_v58 = vld [vmem:[#allocation5 + $0x1528] sm:$0xff] }
 0x15e   :  { %v738_v56 = vld [vmem:[#allocation5 + $0x14f0] sm:$0xff]  ;;  %v779_v44 = vld [vmem:[#allocation5 + $0x1638] sm:$0xff]  ;;  %v772_v48 = vld [vmem:[#allocation5 + $0x1600] sm:$0xff] }
 0x15f   :  { %2601 = vmatpush1.bf16.msra.mxu0 %v2600_v3  ;;  %v704_v3 = vld [vmem:[#allocation5 + $0x13e0] sm:$0xff] }
 0x160   :  { %3113 = vmatpush1.bf16.msra.mxu1 %v3112_v4  ;;  %2603 = vmatprep.subr.bf16.mxu0 %v2602_v5  ;;  %v702_v4 = vld [vmem:[#allocation5 + $0x13d0] sm:$0xff]  ;;  %v3134_v5 = vpack.c.bf16 %v707_v62, %v703_v61  ;;  %v2624_v11 = vpack.c.bf16 %v704_v3, %v700_v2  ;;  %v3152_v62 = vpack.c.bf16 %v738_v56, %v734_v54  ;;  %v785_v54 = vld [vmem:[#allocation5 + $0x1668] sm:$0xff]  ;;  %v787_v56 = vld [vmem:[#allocation5 + $0x1678] sm:$0xff] }
 0x161   :  { %3115 = vmatprep.subr.bf16.mxu1 %v3114_v9  ;;  %v711_v9 = vld [vmem:[#allocation5 + $0x1418] sm:$0xff]  ;;  %v3136_v12 = vpack.c.bf16 %v706_v6, %v702_v4  ;;  %v742_v2 = vld [vmem:[#allocation5 + $0x1510] sm:$0xff]  ;;  %v3154_v3 = vpack.c.bf16 %v747_v60, %v743_v59  ;;  %v753_v6 = vld [vmem:[#allocation5 + $0x1568] sm:$0xff] }
 0x162   :  { %v746_v4 = vld [vmem:[#allocation5 + $0x1530] sm:$0xff]  ;;  %v780_v60 = vld [vmem:[#allocation5 + $0x1640] sm:$0xff] }
 0x163   :  { %2605 = vmatpush1.bf16.msra.mxu0 %v2604_v15  ;;  %v712_v15 = vld [vmem:[#allocation5 + $0x1420] sm:$0xff] }
 0x164   :  { %3117 = vmatpush1.bf16.msra.mxu1 %v3116_v16  ;;  %2607 = vmatprep.subr.bf16.mxu0 %v2606_v17  ;;  %v710_v16 = vld [vmem:[#allocation5 + $0x1410] sm:$0xff]  ;;  %v3138_v17 = vpack.c.bf16 %v715_v10, %v711_v9  ;;  %v2628_v24 = vpack.c.bf16 %v712_v15, %v708_v14  ;;  %v3156_v10 = vpack.c.bf16 %v746_v4, %v742_v2  ;;  %v793_v2 = vld [vmem:[#allocation5 + $0x16a8] sm:$0xff]  ;;  %v795_v4 = vld [vmem:[#allocation5 + $0x16b8] sm:$0xff] }
 0x165   :  { %3119 = vmatprep.subr.bf16.mxu1 %v3118_v21  ;;  %v719_v21 = vld [vmem:[#allocation5 + $0x1458] sm:$0xff]  ;;  %v3140_v25 = vpack.c.bf16 %v714_v18, %v710_v16  ;;  %v750_v14 = vld [vmem:[#allocation5 + $0x1550] sm:$0xff]  ;;  %v3158_v15 = vpack.c.bf16 %v755_v8, %v751_v7  ;;  %v761_v18 = vld [vmem:[#allocation5 + $0x15a8] sm:$0xff] }
 0x166   :  { %v3142_v30 = vpack.c.bf16 %v723_v22, %v719_v21  ;;  %v754_v16 = vld [vmem:[#allocation5 + $0x1570] sm:$0xff]  ;;  %v788_v8 = vld [vmem:[#allocation5 + $0x1680] sm:$0xff] }
 0x167   :  { %2609 = vmatpush1.bf16.msra.mxu0 %v2608_v27  ;;  %v716_v27 = vld [vmem:[#allocation5 + $0x1440] sm:$0xff]  ;;  %v3160_v22 = vpack.c.bf16 %v754_v16, %v750_v14  ;;  %v801_v14 = vld [vmem:[#allocation5 + $0x16e8] sm:$0xff]  ;;  %v803_v16 = vld [vmem:[#allocation5 + $0x16f8] sm:$0xff] }
 0x168   :  { %3121 = vmatpush1.bf16.msra.mxu1 %v3120_v28  ;;  %2611 = vmatprep.subr.bf16.mxu0 %v2610_v29  ;;  %v720_v28 = vld [vmem:[#allocation5 + $0x1460] sm:$0xff]  ;;  %v718_v29 = vld [vmem:[#allocation5 + $0x1450] sm:$0xff] }
 0x169   :  { %3123 = vmatprep.subr.bf16.mxu1 %v3122_v33  ;;  %v729_v33 = vld [vmem:[#allocation5 + $0x14a8] sm:$0xff]  ;;  %v2632_v37 = vpack.c.bf16 %v720_v28, %v716_v27  ;;  %v3144_v38 = vpack.c.bf16 %v722_v31, %v718_v29  ;;  %v3162_v27 = vpack.c.bf16 %v763_v20, %v759_v19  ;;  %v762_v28 = vld [vmem:[#allocation5 + $0x15b0] sm:$0xff]  ;;  %v767_v31 = vld [vmem:[#allocation5 + $0x15d8] sm:$0xff] }
 0x16a   :  { %v765_v29 = vld [vmem:[#allocation5 + $0x15c8] sm:$0xff]  ;;  %v796_v20 = vld [vmem:[#allocation5 + $0x16c0] sm:$0xff] }
 0x16b   :  { %2613 = vmatpush1.bf16.msra.mxu0 %v2612_v39  ;;  %v2634_v39 = vpack.c.bf16 %v729_v33, %v725_v32  ;;  %v771_v32 = vld [vmem:[#allocation5 + $0x15f8] sm:$0xff] }
 0x16c   :  { %3125 = vmatpush1.bf16.msra.mxu1 %v3124_v40  ;;  %2615 = vmatprep.subr.bf16.mxu0 %v2614_v41  ;;  %v724_v40 = vld [vmem:[#allocation5 + $0x1480] sm:$0xff] }
 0x16d   :  { %3127 = vmatprep.subr.bf16.mxu1 %v3126_v45  ;;  %v728_v41 = vld [vmem:[#allocation5 + $0x14a0] sm:$0xff]  ;;  %v733_v45 = vld [vmem:[#allocation5 + $0x14c8] sm:$0xff] }
 0x16e   :  { %v2636_v49 = vpack.c.bf16 %v728_v41, %v724_v40  ;;  %v770_v40 = vld [vmem:[#allocation5 + $0x15f0] sm:$0xff]  ;;  %v773_v41 = vld [vmem:[#allocation5 + $0x1608] sm:$0xff] }
 0x16f   :  { %2617 = vmatpush1.bf16.msra.mxu0 %v2616_v51  ;;  %v2638_v51 = vpack.c.bf16 %v737_v46, %v733_v45  ;;  %v2658_v47 = vpack.c.bf16 %v777_v42, %v773_v41 }
 0x170   :  { %3129 = vmatpush1.bf16.msra.mxu1 %v3128_v52  ;;  %2619 = vmatprep.subr.bf16.mxu0 %v2618_v53  ;;  %v732_v52 = vld [vmem:[#allocation5 + $0x14c0] sm:$0xff] }
 0x171   :  { %3131 = vmatprep.subr.bf16.mxu1 %v3130_v57  ;;  %v736_v53 = vld [vmem:[#allocation5 + $0x14e0] sm:$0xff]  ;;  %v741_v57 = vld [vmem:[#allocation5 + $0x1508] sm:$0xff] }
 0x172   :  { %v2640_v61 = vpack.c.bf16 %v736_v53, %v732_v52  ;;  %v778_v52 = vld [vmem:[#allocation5 + $0x1630] sm:$0xff]  ;;  %v781_v53 = vld [vmem:[#allocation5 + $0x1648] sm:$0xff] }
 0x173   :  { %2621 = vmatpush1.bf16.msra.mxu0 %v2620_v63  ;;  %v2642_v63 = vpack.c.bf16 %v745_v58, %v741_v57  ;;  %v2662_v59 = vpack.c.bf16 %v785_v54, %v781_v53 }
 0x174   :  { %3133 = vmatpush1.bf16.msra.mxu1 %v3132_v0  ;;  %2623 = vmatprep.subr.bf16.mxu0 %v2622_v1  ;;  %v740_v0 = vld [vmem:[#allocation5 + $0x1500] sm:$0xff] }
 0x175   :  { %3135 = vmatprep.subr.bf16.mxu1 %v3134_v5  ;;  %v744_v1 = vld [vmem:[#allocation5 + $0x1520] sm:$0xff]  ;;  %v749_v5 = vld [vmem:[#allocation5 + $0x1548] sm:$0xff] }
 0x176   :  { %v2644_v9 = vpack.c.bf16 %v744_v1, %v740_v0  ;;  %v786_v0 = vld [vmem:[#allocation5 + $0x1670] sm:$0xff]  ;;  %v789_v1 = vld [vmem:[#allocation5 + $0x1688] sm:$0xff] }
 0x177   :  { %2625 = vmatpush1.bf16.msra.mxu0 %v2624_v11  ;;  %v2646_v11 = vpack.c.bf16 %v753_v6, %v749_v5  ;;  %v2666_v7 = vpack.c.bf16 %v793_v2, %v789_v1 }
 0x178   :  { %3137 = vmatpush1.bf16.msra.mxu1 %v3136_v12  ;;  %2627 = vmatprep.subr.bf16.mxu0 %v2626_v13  ;;  %v748_v12 = vld [vmem:[#allocation5 + $0x1540] sm:$0xff] }
 0x179   :  { %3139 = vmatprep.subr.bf16.mxu1 %v3138_v17  ;;  %v752_v13 = vld [vmem:[#allocation5 + $0x1560] sm:$0xff]  ;;  %v757_v17 = vld [vmem:[#allocation5 + $0x1588] sm:$0xff] }
 0x17a   :  { %1463 = vmatmul.mubr.f32.vlgmr.msra.gmra.mrb[0].mxu0 %v60_v23  ;;  %v2648_v21 = vpack.c.bf16 %v752_v13, %v748_v12  ;;  %v794_v12 = vld [vmem:[#allocation5 + $0x16b0] sm:$0xff]  ;;  %v797_v13 = vld [vmem:[#allocation5 + $0x16c8] sm:$0xff] }
 0x17b   :  { %2629 = vmatpush1.bf16.msra.mxu0 %v2628_v24  ;;  %2031 = vmatmul.mubr.f32.vlgmr.msra.gmra.mrb[0].mxu1 %v60_v23  ;;  %v2650_v23 = vpack.c.bf16 %v761_v18, %v757_v17  ;;  %v756_v24 = vld [vmem:[#allocation5 + $0x1580] sm:$0xff]  ;;  %v2670_v19 = vpack.c.bf16 %v801_v14, %v797_v13 }
 0x17c   :  { %3141 = vmatpush1.bf16.msra.mxu1 %v3140_v25  ;;  %2631 = vmatprep.subr.bf16.mxu0 %v2630_v26  ;;  %v760_v25 = vld [vmem:[#allocation5 + $0x15a0] sm:$0xff]  ;;  %v758_v26 = vld [vmem:[#allocation5 + $0x1590] sm:$0xff] }
 0x17d   :  { %3143 = vmatprep.subr.bf16.mxu1 %v3142_v30  ;;  %1533 = vmatprep.mubr.f32.mxu0 %v63_v36  ;;  %v769_v30 = vld [vmem:[#allocation5 + $0x15e8] sm:$0xff]  ;;  %v2652_v33 = vpack.c.bf16 %v760_v25, %v756_v24  ;;  %v3164_v34 = vpack.c.bf16 %v762_v28, %v758_v26  ;;  %v802_v24 = vld [vmem:[#allocation5 + $0x16f0] sm:$0xff]  ;;  %v811_v28 = vld [vmem:[#allocation5 + $0x1738] sm:$0xff] }
 0x17e   :  { %2101 = vmatprep.mubr.f32.mxu1 %v63_v36  ;;  %v2654_v35 = vpack.c.bf16 %v769_v30, %v765_v29  ;;  %v764_v36 = vld [vmem:[#allocation5 + $0x15c0] sm:$0xff]  ;;  %v805_v25 = vld [vmem:[#allocation5 + $0x1708] sm:$0xff] }
 0x17f   :  { %2633 = vmatpush1.bf16.msra.mxu0 %v2632_v37  ;;  %v768_v37 = vld [vmem:[#allocation5 + $0x15e0] sm:$0xff]  ;;  %v809_v26 = vld [vmem:[#allocation5 + $0x1728] sm:$0xff] }
 0x180   :  { %3145 = vmatpush1.bf16.msra.mxu1 %v3144_v38  ;;  %2635 = vmatprep.subr.bf16.mxu0 %v2634_v39  ;;  %v766_v38 = vld [vmem:[#allocation5 + $0x15d0] sm:$0xff]  ;;  %v3166_v39 = vpack.c.bf16 %v771_v32, %v767_v31  ;;  %v2656_v45 = vpack.c.bf16 %v768_v37, %v764_v36  ;;  %v2674_v31 = vpack.c.bf16 %v809_v26, %v805_v25  ;;  %v804_v32 = vld [vmem:[#allocation5 + $0x1700] sm:$0xff]  ;;  %v813_v37 = vld [vmem:[#allocation5 + $0x1748] sm:$0xff] }
 0x181   :  { %3147 = vmatprep.subr.bf16.mxu1 %v3146_v43  ;;  %v775_v43 = vld [vmem:[#allocation5 + $0x1618] sm:$0xff]  ;;  %v3168_v46 = vpack.c.bf16 %v770_v40, %v766_v38  ;;  %v810_v36 = vld [vmem:[#allocation5 + $0x1730] sm:$0xff]  ;;  %v817_v38 = vld [vmem:[#allocation5 + $0x1768] sm:$0xff] }
 0x182   :  { %v819_v40 = vld [vmem:[#allocation5 + $0x1778] sm:$0xff]  ;;  %v62_v25 = vld [vmem:[#allocation2 + $0x50] sm:$0xff] }
 0x183   :  { %2637 = vmatpush1.bf16.msra.mxu0 %v2636_v49  ;;  %v776_v49 = vld [vmem:[#allocation5 + $0x1620] sm:$0xff] }
 0x184   :  { %3149 = vmatpush1.bf16.msra.mxu1 %v3148_v50  ;;  %2639 = vmatprep.subr.bf16.mxu0 %v2638_v51  ;;  %v774_v50 = vld [vmem:[#allocation5 + $0x1610] sm:$0xff]  ;;  %v3170_v51 = vpack.c.bf16 %v779_v44, %v775_v43  ;;  %v2660_v57 = vpack.c.bf16 %v776_v49, %v772_v48  ;;  %v2678_v43 = vpack.c.bf16 %v817_v38, %v813_v37  ;;  %v812_v44 = vld [vmem:[#allocation5 + $0x1740] sm:$0xff]  ;;  %v821_v49 = vld [vmem:[#allocation5 + $0x1788] sm:$0xff] }
 0x185   :  { %3151 = vmatprep.subr.bf16.mxu1 %v3150_v55  ;;  %v783_v55 = vld [vmem:[#allocation5 + $0x1658] sm:$0xff]  ;;  %v3172_v58 = vpack.c.bf16 %v778_v52, %v774_v50  ;;  %v818_v48 = vld [vmem:[#allocation5 + $0x1770] sm:$0xff]  ;;  %v825_v50 = vld [vmem:[#allocation5 + $0x17a8] sm:$0xff] }
 0x186   :  { %v827_v52 = vld [vmem:[#allocation5 + $0x17b8] sm:$0xff]  ;;  %v65_v38 = vld [vmem:[#allocation2 + $0x68] sm:$0xff] }
 0x187   :  { %2641 = vmatpush1.bf16.msra.mxu0 %v2640_v61  ;;  %v784_v61 = vld [vmem:[#allocation5 + $0x1660] sm:$0xff]  ;;  %v859_v37 = vld [vmem:[#allocation5 + $0x18b8] sm:$0xff] }
 0x188   :  { %3153 = vmatpush1.bf16.msra.mxu1 %v3152_v62  ;;  %2643 = vmatprep.subr.bf16.mxu0 %v2642_v63  ;;  %v782_v62 = vld [vmem:[#allocation5 + $0x1650] sm:$0xff]  ;;  %v3174_v63 = vpack.c.bf16 %v787_v56, %v783_v55  ;;  %v2664_v5 = vpack.c.bf16 %v784_v61, %v780_v60  ;;  %v2682_v55 = vpack.c.bf16 %v825_v50, %v821_v49  ;;  %v820_v56 = vld [vmem:[#allocation5 + $0x1780] sm:$0xff]  ;;  %v829_v61 = vld [vmem:[#allocation5 + $0x17c8] sm:$0xff] }
 0x189   :  { %3155 = vmatprep.subr.bf16.mxu1 %v3154_v3  ;;  %v791_v3 = vld [vmem:[#allocation5 + $0x1698] sm:$0xff]  ;;  %v3176_v6 = vpack.c.bf16 %v786_v0, %v782_v62  ;;  %v826_v60 = vld [vmem:[#allocation5 + $0x17b0] sm:$0xff]  ;;  %v833_v62 = vld [vmem:[#allocation5 + $0x17e8] sm:$0xff] }
 0x18a   :  { %v835_v0 = vld [vmem:[#allocation5 + $0x17f8] sm:$0xff] }
 0x18b   :  { %2645 = vmatpush1.bf16.msra.mxu0 %v2644_v9  ;;  %v792_v9 = vld [vmem:[#allocation5 + $0x16a0] sm:$0xff]  ;;  %v863_v49 = vld [vmem:[#allocation5 + $0x18d8] sm:$0xff] }
 0x18c   :  { %3157 = vmatpush1.bf16.msra.mxu1 %v3156_v10  ;;  %2647 = vmatprep.subr.bf16.mxu0 %v2646_v11  ;;  %v790_v10 = vld [vmem:[#allocation5 + $0x1690] sm:$0xff]  ;;  %v3178_v11 = vpack.c.bf16 %v795_v4, %v791_v3  ;;  %v2668_v17 = vpack.c.bf16 %v792_v9, %v788_v8  ;;  %v2686_v3 = vpack.c.bf16 %v833_v62, %v829_v61  ;;  %v828_v4 = vld [vmem:[#allocation5 + $0x17c0] sm:$0xff]  ;;  %v837_v9 = vld [vmem:[#allocation5 + $0x1808] sm:$0xff] }
 0x18d   :  { %3159 = vmatprep.subr.bf16.mxu1 %v3158_v15  ;;  %v799_v15 = vld [vmem:[#allocation5 + $0x16d8] sm:$0xff]  ;;  %v3180_v18 = vpack.c.bf16 %v794_v12, %v790_v10  ;;  %v834_v8 = vld [vmem:[#allocation5 + $0x17f0] sm:$0xff]  ;;  %v841_v10 = vld [vmem:[#allocation5 + $0x1828] sm:$0xff] }
 0x18e   :  { %v843_v12 = vld [vmem:[#allocation5 + $0x1838] sm:$0xff] }
 0x18f   :  { %2649 = vmatpush1.bf16.msra.mxu0 %v2648_v21  ;;  %v800_v21 = vld [vmem:[#allocation5 + $0x16e0] sm:$0xff]  ;;  %v867_v50 = vld [vmem:[#allocation5 + $0x18f8] sm:$0xff] }
 0x190   :  { %3161 = vmatpush1.bf16.msra.mxu1 %v3160_v22  ;;  %2651 = vmatprep.subr.bf16.mxu0 %v2650_v23  ;;  %v798_v22 = vld [vmem:[#allocation5 + $0x16d0] sm:$0xff]  ;;  %v3182_v23 = vpack.c.bf16 %v803_v16, %v799_v15  ;;  %v2672_v29 = vpack.c.bf16 %v800_v21, %v796_v20  ;;  %v2690_v15 = vpack.c.bf16 %v841_v10, %v837_v9  ;;  %v836_v16 = vld [vmem:[#allocation5 + $0x1800] sm:$0xff]  ;;  %v845_v21 = vld [vmem:[#allocation5 + $0x1848] sm:$0xff] }
 0x191   :  { %3163 = vmatprep.subr.bf16.mxu1 %v3162_v27  ;;  %v807_v27 = vld [vmem:[#allocation5 + $0x1718] sm:$0xff]  ;;  %v3184_v30 = vpack.c.bf16 %v802_v24, %v798_v22  ;;  %v842_v20 = vld [vmem:[#allocation5 + $0x1830] sm:$0xff]  ;;  %v849_v22 = vld [vmem:[#allocation5 + $0x1868] sm:$0xff] }
 0x192   :  { %v851_v24 = vld [vmem:[#allocation5 + $0x1878] sm:$0xff] }
 0x193   :  { %2653 = vmatpush1.bf16.msra.mxu0 %v2652_v33  ;;  %v808_v33 = vld [vmem:[#allocation5 + $0x1720] sm:$0xff]  ;;  %v871_v61 = vld [vmem:[#allocation5 + $0x1918] sm:$0xff] }
 0x194   :  { %3165 = vmatpush1.bf16.msra.mxu1 %v3164_v34  ;;  %2655 = vmatprep.subr.bf16.mxu0 %v2654_v35  ;;  %v806_v34 = vld [vmem:[#allocation5 + $0x1710] sm:$0xff]  ;;  %v3186_v35 = vpack.c.bf16 %v811_v28, %v807_v27  ;;  %v2676_v41 = vpack.c.bf16 %v808_v33, %v804_v32  ;;  %v2694_v28 = vpack.c.bf16 %v849_v22, %v845_v21  ;;  %v875_v62 = vld [vmem:[#allocation5 + $0x1938] sm:$0xff] }
 0x195   :  { %3167 = vmatprep.subr.bf16.mxu1 %v3166_v39  ;;  %v815_v39 = vld [vmem:[#allocation5 + $0x1758] sm:$0xff]  ;;  %v3188_v42 = vpack.c.bf16 %v810_v36, %v806_v34  ;;  %v850_v33 = vld [vmem:[#allocation5 + $0x1870] sm:$0xff]  ;;  %v853_v34 = vld [vmem:[#allocation5 + $0x1888] sm:$0xff] }
 0x196   :  { %v855_v36 = vld [vmem:[#allocation5 + $0x1898] sm:$0xff] }
 0x197   :  { %2657 = vmatpush1.bf16.msra.mxu0 %v2656_v45  ;;  %v816_v45 = vld [vmem:[#allocation5 + $0x1760] sm:$0xff]  ;;  %v879_v9 = vld [vmem:[#allocation5 + $0x1958] sm:$0xff] }
 0x198   :  { %3169 = vmatpush1.bf16.msra.mxu1 %v3168_v46  ;;  %2659 = vmatprep.subr.bf16.mxu0 %v2658_v47  ;;  %v814_v46 = vld [vmem:[#allocation5 + $0x1750] sm:$0xff]  ;;  %v3190_v47 = vpack.c.bf16 %v819_v40, %v815_v39  ;;  %v2680_v53 = vpack.c.bf16 %v816_v45, %v812_v44  ;;  %v3210_v45 = vpack.c.bf16 %v859_v37, %v855_v36  ;;  %v883_v10 = vld [vmem:[#allocation5 + $0x1978] sm:$0xff] }
 0x199   :  { %3171 = vmatprep.subr.bf16.mxu1 %v3170_v51  ;;  %v823_v51 = vld [vmem:[#allocation5 + $0x1798] sm:$0xff]  ;;  %v3192_v54 = vpack.c.bf16 %v818_v48, %v814_v46  ;;  %v854_v44 = vld [vmem:[#allocation5 + $0x1890] sm:$0xff]  ;;  %v865_v48 = vld [vmem:[#allocation5 + $0x18e8] sm:$0xff] }
 0x19a   :  { %v858_v46 = vld [vmem:[#allocation5 + $0x18b0] sm:$0xff]  ;;  %v887_v21 = vld [vmem:[#allocation5 + $0x1998] sm:$0xff] }
 0x19b   :  { %2661 = vmatpush1.bf16.msra.mxu0 %v2660_v57  ;;  %v824_v57 = vld [vmem:[#allocation5 + $0x17a0] sm:$0xff]  ;;  %v891_v22 = vld [vmem:[#allocation5 + $0x19b8] sm:$0xff] }
 0x19c   :  { %3173 = vmatpush1.bf16.msra.mxu1 %v3172_v58  ;;  %2663 = vmatprep.subr.bf16.mxu0 %v2662_v59  ;;  %v822_v58 = vld [vmem:[#allocation5 + $0x1790] sm:$0xff]  ;;  %v3194_v59 = vpack.c.bf16 %v827_v52, %v823_v51  ;;  %v2684_v1 = vpack.c.bf16 %v824_v57, %v820_v56  ;;  %v3212_v52 = vpack.c.bf16 %v858_v46, %v854_v44  ;;  %v905_v44 = vld [vmem:[#allocation5 + $0x1a28] sm:$0xff]  ;;  %v907_v46 = vld [vmem:[#allocation5 + $0x1a38] sm:$0xff] }
 0x19d   :  { %3175 = vmatprep.subr.bf16.mxu1 %v3174_v63  ;;  %v831_v63 = vld [vmem:[#allocation5 + $0x17d8] sm:$0xff]  ;;  %v3196_v2 = vpack.c.bf16 %v826_v60, %v822_v58  ;;  %v862_v56 = vld [vmem:[#allocation5 + $0x18d0] sm:$0xff]  ;;  %v3214_v57 = vpack.c.bf16 %v867_v50, %v863_v49  ;;  %v873_v60 = vld [vmem:[#allocation5 + $0x1928] sm:$0xff] }
 0x19e   :  { %v866_v58 = vld [vmem:[#allocation5 + $0x18f0] sm:$0xff]  ;;  %v900_v50 = vld [vmem:[#allocation5 + $0x1a00] sm:$0xff] }
 0x19f   :  { %2665 = vmatpush1.bf16.msra.mxu0 %v2664_v5  ;;  %v832_v5 = vld [vmem:[#allocation5 + $0x17e0] sm:$0xff] }
 0x1a0   :  { %3177 = vmatpush1.bf16.msra.mxu1 %v3176_v6  ;;  %2667 = vmatprep.subr.bf16.mxu0 %v2666_v7  ;;  %v830_v6 = vld [vmem:[#allocation5 + $0x17d0] sm:$0xff]  ;;  %v3198_v7 = vpack.c.bf16 %v835_v0, %v831_v63  ;;  %v2688_v13 = vpack.c.bf16 %v832_v5, %v828_v4  ;;  %v3216_v0 = vpack.c.bf16 %v866_v58, %v862_v56  ;;  %v913_v56 = vld [vmem:[#allocation5 + $0x1a68] sm:$0xff]  ;;  %v915_v58 = vld [vmem:[#allocation5 + $0x1a78] sm:$0xff] }
 0x1a1   :  { %3179 = vmatprep.subr.bf16.mxu1 %v3178_v11  ;;  %v839_v11 = vld [vmem:[#allocation5 + $0x1818] sm:$0xff]  ;;  %v3200_v14 = vpack.c.bf16 %v834_v8, %v830_v6  ;;  %v870_v4 = vld [vmem:[#allocation5 + $0x1910] sm:$0xff]  ;;  %v3218_v5 = vpack.c.bf16 %v875_v62, %v871_v61  ;;  %v881_v8 = vld [vmem:[#allocation5 + $0x1968] sm:$0xff] }
 0x1a2   :  { %v874_v6 = vld [vmem:[#allocation5 + $0x1930] sm:$0xff]  ;;  %v908_v62 = vld [vmem:[#allocation5 + $0x1a40] sm:$0xff] }
 0x1a3   :  { %2669 = vmatpush1.bf16.msra.mxu0 %v2668_v17  ;;  %v840_v17 = vld [vmem:[#allocation5 + $0x1820] sm:$0xff] }
 0x1a4   :  { %3181 = vmatpush1.bf16.msra.mxu1 %v3180_v18  ;;  %2671 = vmatprep.subr.bf16.mxu0 %v2670_v19  ;;  %v838_v18 = vld [vmem:[#allocation5 + $0x1810] sm:$0xff]  ;;  %v3202_v19 = vpack.c.bf16 %v843_v12, %v839_v11  ;;  %v2692_v26 = vpack.c.bf16 %v840_v17, %v836_v16  ;;  %v3220_v12 = vpack.c.bf16 %v874_v6, %v870_v4  ;;  %v921_v4 = vld [vmem:[#allocation5 + $0x1aa8] sm:$0xff]  ;;  %v923_v6 = vld [vmem:[#allocation5 + $0x1ab8] sm:$0xff] }
 0x1a5   :  { %3183 = vmatprep.subr.bf16.mxu1 %v3182_v23  ;;  %v847_v23 = vld [vmem:[#allocation5 + $0x1858] sm:$0xff]  ;;  %v3204_v27 = vpack.c.bf16 %v842_v20, %v838_v18  ;;  %v878_v16 = vld [vmem:[#allocation5 + $0x1950] sm:$0xff]  ;;  %v3222_v17 = vpack.c.bf16 %v883_v10, %v879_v9  ;;  %v889_v20 = vld [vmem:[#allocation5 + $0x19a8] sm:$0xff] }
 0x1a6   :  { %v3206_v32 = vpack.c.bf16 %v851_v24, %v847_v23  ;;  %v882_v18 = vld [vmem:[#allocation5 + $0x1970] sm:$0xff]  ;;  %v916_v10 = vld [vmem:[#allocation5 + $0x1a80] sm:$0xff] }
 0x1a7   :  { %2673 = vmatpush1.bf16.msra.mxu0 %v2672_v29  ;;  %v844_v29 = vld [vmem:[#allocation5 + $0x1840] sm:$0xff]  ;;  %v3224_v24 = vpack.c.bf16 %v882_v18, %v878_v16  ;;  %v929_v16 = vld [vmem:[#allocation5 + $0x1ae8] sm:$0xff]  ;;  %v931_v18 = vld [vmem:[#allocation5 + $0x1af8] sm:$0xff] }
 0x1a8   :  { %3185 = vmatpush1.bf16.msra.mxu1 %v3184_v30  ;;  %2675 = vmatprep.subr.bf16.mxu0 %v2674_v31  ;;  %v848_v30 = vld [vmem:[#allocation5 + $0x1860] sm:$0xff]  ;;  %v846_v31 = vld [vmem:[#allocation5 + $0x1850] sm:$0xff] }
 0x1a9   :  { %3187 = vmatprep.subr.bf16.mxu1 %v3186_v35  ;;  %v857_v35 = vld [vmem:[#allocation5 + $0x18a8] sm:$0xff]  ;;  %v2696_v39 = vpack.c.bf16 %v848_v30, %v844_v29  ;;  %v3208_v40 = vpack.c.bf16 %v850_v33, %v846_v31  ;;  %v3226_v29 = vpack.c.bf16 %v891_v22, %v887_v21  ;;  %v890_v30 = vld [vmem:[#allocation5 + $0x19b0] sm:$0xff]  ;;  %v895_v33 = vld [vmem:[#allocation5 + $0x19d8] sm:$0xff] }
 0x1aa   :  { %v893_v31 = vld [vmem:[#allocation5 + $0x19c8] sm:$0xff]  ;;  %v924_v22 = vld [vmem:[#allocation5 + $0x1ac0] sm:$0xff] }
 0x1ab   :  { %2677 = vmatpush1.bf16.msra.mxu0 %v2676_v41  ;;  %v2698_v41 = vpack.c.bf16 %v857_v35, %v853_v34  ;;  %v899_v34 = vld [vmem:[#allocation5 + $0x19f8] sm:$0xff] }
 0x1ac   :  { %3189 = vmatpush1.bf16.msra.mxu1 %v3188_v42  ;;  %2679 = vmatprep.subr.bf16.mxu0 %v2678_v43  ;;  %v852_v42 = vld [vmem:[#allocation5 + $0x1880] sm:$0xff] }
 0x1ad   :  { %3191 = vmatprep.subr.bf16.mxu1 %v3190_v47  ;;  %v856_v43 = vld [vmem:[#allocation5 + $0x18a0] sm:$0xff]  ;;  %v861_v47 = vld [vmem:[#allocation5 + $0x18c8] sm:$0xff] }
 0x1ae   :  { %v2700_v51 = vpack.c.bf16 %v856_v43, %v852_v42  ;;  %v898_v42 = vld [vmem:[#allocation5 + $0x19f0] sm:$0xff]  ;;  %v901_v43 = vld [vmem:[#allocation5 + $0x1a08] sm:$0xff] }
 0x1af   :  { %2681 = vmatpush1.bf16.msra.mxu0 %v2680_v53  ;;  %v2702_v53 = vpack.c.bf16 %v865_v48, %v861_v47  ;;  %v2722_v49 = vpack.c.bf16 %v905_v44, %v901_v43 }
 0x1b0   :  { %3193 = vmatpush1.bf16.msra.mxu1 %v3192_v54  ;;  %2683 = vmatprep.subr.bf16.mxu0 %v2682_v55  ;;  %v860_v54 = vld [vmem:[#allocation5 + $0x18c0] sm:$0xff] }
 0x1b1   :  { %3195 = vmatprep.subr.bf16.mxu1 %v3194_v59  ;;  %v864_v55 = vld [vmem:[#allocation5 + $0x18e0] sm:$0xff]  ;;  %v869_v59 = vld [vmem:[#allocation5 + $0x1908] sm:$0xff] }
 0x1b2   :  { %v2704_v63 = vpack.c.bf16 %v864_v55, %v860_v54  ;;  %v906_v54 = vld [vmem:[#allocation5 + $0x1a30] sm:$0xff]  ;;  %v909_v55 = vld [vmem:[#allocation5 + $0x1a48] sm:$0xff] }
 0x1b3   :  { %2685 = vmatpush1.bf16.msra.mxu0 %v2684_v1  ;;  %v2706_v1 = vpack.c.bf16 %v873_v60, %v869_v59  ;;  %v2726_v61 = vpack.c.bf16 %v913_v56, %v909_v55 }
 0x1b4   :  { %3197 = vmatpush1.bf16.msra.mxu1 %v3196_v2  ;;  %2687 = vmatprep.subr.bf16.mxu0 %v2686_v3  ;;  %v868_v2 = vld [vmem:[#allocation5 + $0x1900] sm:$0xff] }
 0x1b5   :  { %3199 = vmatprep.subr.bf16.mxu1 %v3198_v7  ;;  %v872_v3 = vld [vmem:[#allocation5 + $0x1920] sm:$0xff]  ;;  %v877_v7 = vld [vmem:[#allocation5 + $0x1948] sm:$0xff] }
 0x1b6   :  { %v2708_v11 = vpack.c.bf16 %v872_v3, %v868_v2  ;;  %v914_v2 = vld [vmem:[#allocation5 + $0x1a70] sm:$0xff]  ;;  %v917_v3 = vld [vmem:[#allocation5 + $0x1a88] sm:$0xff] }
 0x1b7   :  { %2689 = vmatpush1.bf16.msra.mxu0 %v2688_v13  ;;  %v2710_v13 = vpack.c.bf16 %v881_v8, %v877_v7  ;;  %v2730_v9 = vpack.c.bf16 %v921_v4, %v917_v3 }
 0x1b8   :  { %3201 = vmatpush1.bf16.msra.mxu1 %v3200_v14  ;;  %2691 = vmatprep.subr.bf16.mxu0 %v2690_v15  ;;  %v876_v14 = vld [vmem:[#allocation5 + $0x1940] sm:$0xff] }
 0x1b9   :  { %3203 = vmatprep.subr.bf16.mxu1 %v3202_v19  ;;  %v880_v15 = vld [vmem:[#allocation5 + $0x1960] sm:$0xff]  ;;  %v885_v19 = vld [vmem:[#allocation5 + $0x1988] sm:$0xff] }
 0x1ba   :  { %1534 = vmatmul.mubr.f32.vlgmr.msra.gmra.mrb[0].mxu0 %v62_v25  ;;  %v2712_v23 = vpack.c.bf16 %v880_v15, %v876_v14  ;;  %v922_v14 = vld [vmem:[#allocation5 + $0x1ab0] sm:$0xff]  ;;  %v925_v15 = vld [vmem:[#allocation5 + $0x1ac8] sm:$0xff] }
 0x1bb   :  { %2693 = vmatpush1.bf16.msra.mxu0 %v2692_v26  ;;  %2102 = vmatmul.mubr.f32.vlgmr.msra.gmra.mrb[0].mxu1 %v62_v25  ;;  %v2714_v25 = vpack.c.bf16 %v889_v20, %v885_v19  ;;  %v884_v26 = vld [vmem:[#allocation5 + $0x1980] sm:$0xff]  ;;  %v2734_v21 = vpack.c.bf16 %v929_v16, %v925_v15 }
 0x1bc   :  { %3205 = vmatpush1.bf16.msra.mxu1 %v3204_v27  ;;  %2695 = vmatprep.subr.bf16.mxu0 %v2694_v28  ;;  %v888_v27 = vld [vmem:[#allocation5 + $0x19a0] sm:$0xff]  ;;  %v886_v28 = vld [vmem:[#allocation5 + $0x1990] sm:$0xff] }
 0x1bd   :  { %3207 = vmatprep.subr.bf16.mxu1 %v3206_v32  ;;  %1604 = vmatprep.mubr.f32.mxu0 %v65_v38  ;;  %v897_v32 = vld [vmem:[#allocation5 + $0x19e8] sm:$0xff]  ;;  %v2716_v35 = vpack.c.bf16 %v888_v27, %v884_v26  ;;  %v3228_v36 = vpack.c.bf16 %v890_v30, %v886_v28  ;;  %v930_v26 = vld [vmem:[#allocation5 + $0x1af0] sm:$0xff]  ;;  %v939_v30 = vld [vmem:[#allocation5 + $0x1b38] sm:$0xff] }
 0x1be   :  { %2172 = vmatprep.mubr.f32.mxu1 %v65_v38  ;;  %v2718_v37 = vpack.c.bf16 %v897_v32, %v893_v31  ;;  %v892_v38 = vld [vmem:[#allocation5 + $0x19c0] sm:$0xff]  ;;  %v933_v27 = vld [vmem:[#allocation5 + $0x1b08] sm:$0xff] }
 0x1bf   :  { %2697 = vmatpush1.bf16.msra.mxu0 %v2696_v39  ;;  %v896_v39 = vld [vmem:[#allocation5 + $0x19e0] sm:$0xff]  ;;  %v937_v28 = vld [vmem:[#allocation5 + $0x1b28] sm:$0xff] }
 0x1c0   :  { %3209 = vmatpush1.bf16.msra.mxu1 %v3208_v40  ;;  %2699 = vmatprep.subr.bf16.mxu0 %v2698_v41  ;;  %v894_v40 = vld [vmem:[#allocation5 + $0x19d0] sm:$0xff]  ;;  %v3230_v41 = vpack.c.bf16 %v899_v34, %v895_v33  ;;  %v2720_v47 = vpack.c.bf16 %v896_v39, %v892_v38  ;;  %v2738_v33 = vpack.c.bf16 %v937_v28, %v933_v27  ;;  %v932_v34 = vld [vmem:[#allocation5 + $0x1b00] sm:$0xff]  ;;  %v941_v39 = vld [vmem:[#allocation5 + $0x1b48] sm:$0xff] }
 0x1c1   :  { %3211 = vmatprep.subr.bf16.mxu1 %v3210_v45  ;;  %v903_v45 = vld [vmem:[#allocation5 + $0x1a18] sm:$0xff]  ;;  %v3232_v48 = vpack.c.bf16 %v898_v42, %v894_v40  ;;  %v938_v38 = vld [vmem:[#allocation5 + $0x1b30] sm:$0xff]  ;;  %v945_v40 = vld [vmem:[#allocation5 + $0x1b68] sm:$0xff] }
 0x1c2   :  { %v947_v42 = vld [vmem:[#allocation5 + $0x1b78] sm:$0xff]  ;;  %v64_v27 = vld [vmem:[#allocation2 + $0x60] sm:$0xff] }
 0x1c3   :  { %2701 = vmatpush1.bf16.msra.mxu0 %v2700_v51  ;;  %v904_v51 = vld [vmem:[#allocation5 + $0x1a20] sm:$0xff] }
 0x1c4   :  { %3213 = vmatpush1.bf16.msra.mxu1 %v3212_v52  ;;  %2703 = vmatprep.subr.bf16.mxu0 %v2702_v53  ;;  %v902_v52 = vld [vmem:[#allocation5 + $0x1a10] sm:$0xff]  ;;  %v3234_v53 = vpack.c.bf16 %v907_v46, %v903_v45  ;;  %v2724_v59 = vpack.c.bf16 %v904_v51, %v900_v50  ;;  %v2742_v45 = vpack.c.bf16 %v945_v40, %v941_v39  ;;  %v940_v46 = vld [vmem:[#allocation5 + $0x1b40] sm:$0xff]  ;;  %v949_v51 = vld [vmem:[#allocation5 + $0x1b88] sm:$0xff] }
 0x1c5   :  { %3215 = vmatprep.subr.bf16.mxu1 %v3214_v57  ;;  %v911_v57 = vld [vmem:[#allocation5 + $0x1a58] sm:$0xff]  ;;  %v3236_v60 = vpack.c.bf16 %v906_v54, %v902_v52  ;;  %v946_v50 = vld [vmem:[#allocation5 + $0x1b70] sm:$0xff]  ;;  %v953_v52 = vld [vmem:[#allocation5 + $0x1ba8] sm:$0xff] }
 0x1c6   :  { %v955_v54 = vld [vmem:[#allocation5 + $0x1bb8] sm:$0xff] }
 0x1c7   :  { %2705 = vmatpush1.bf16.msra.mxu0 %v2704_v63  ;;  %v912_v63 = vld [vmem:[#allocation5 + $0x1a60] sm:$0xff]  ;;  %v987_v39 = vld [vmem:[#allocation5 + $0x1cb8] sm:$0xff] }
 0x1c8   :  { %3217 = vmatpush1.bf16.msra.mxu1 %v3216_v0  ;;  %2707 = vmatprep.subr.bf16.mxu0 %v2706_v1  ;;  %v910_v0 = vld [vmem:[#allocation5 + $0x1a50] sm:$0xff]  ;;  %v3238_v1 = vpack.c.bf16 %v915_v58, %v911_v57  ;;  %v2728_v7 = vpack.c.bf16 %v912_v63, %v908_v62  ;;  %v2746_v57 = vpack.c.bf16 %v953_v52, %v949_v51  ;;  %v948_v58 = vld [vmem:[#allocation5 + $0x1b80] sm:$0xff]  ;;  %v957_v63 = vld [vmem:[#allocation5 + $0x1bc8] sm:$0xff] }
 0x1c9   :  { %3219 = vmatprep.subr.bf16.mxu1 %v3218_v5  ;;  %v919_v5 = vld [vmem:[#allocation5 + $0x1a98] sm:$0xff]  ;;  %v3240_v8 = vpack.c.bf16 %v914_v2, %v910_v0  ;;  %v954_v62 = vld [vmem:[#allocation5 + $0x1bb0] sm:$0xff]  ;;  %v961_v0 = vld [vmem:[#allocation5 + $0x1be8] sm:$0xff] }
 0x1ca   :  { %v963_v2 = vld [vmem:[#allocation5 + $0x1bf8] sm:$0xff] }
 0x1cb   :  { %2709 = vmatpush1.bf16.msra.mxu0 %v2708_v11  ;;  %v920_v11 = vld [vmem:[#allocation5 + $0x1aa0] sm:$0xff]  ;;  %v67_v40 = vld [vmem:[#allocation2 + $0x78] sm:$0xff] }
 0x1cc   :  { %3221 = vmatpush1.bf16.msra.mxu1 %v3220_v12  ;;  %2711 = vmatprep.subr.bf16.mxu0 %v2710_v13  ;;  %v918_v12 = vld [vmem:[#allocation5 + $0x1a90] sm:$0xff]  ;;  %v3242_v13 = vpack.c.bf16 %v923_v6, %v919_v5  ;;  %v2732_v19 = vpack.c.bf16 %v920_v11, %v916_v10  ;;  %v2750_v5 = vpack.c.bf16 %v961_v0, %v957_v63  ;;  %v956_v6 = vld [vmem:[#allocation5 + $0x1bc0] sm:$0xff]  ;;  %v965_v11 = vld [vmem:[#allocation5 + $0x1c08] sm:$0xff] }
 0x1cd   :  { %3223 = vmatprep.subr.bf16.mxu1 %v3222_v17  ;;  %v927_v17 = vld [vmem:[#allocation5 + $0x1ad8] sm:$0xff]  ;;  %v3244_v20 = vpack.c.bf16 %v922_v14, %v918_v12  ;;  %v962_v10 = vld [vmem:[#allocation5 + $0x1bf0] sm:$0xff]  ;;  %v969_v12 = vld [vmem:[#allocation5 + $0x1c28] sm:$0xff] }
 0x1ce   :  { %v971_v14 = vld [vmem:[#allocation5 + $0x1c38] sm:$0xff] }
 0x1cf   :  { %2713 = vmatpush1.bf16.msra.mxu0 %v2712_v23  ;;  %v928_v23 = vld [vmem:[#allocation5 + $0x1ae0] sm:$0xff]  ;;  %v991_v51 = vld [vmem:[#allocation5 + $0x1cd8] sm:$0xff] }
 0x1d0   :  { %3225 = vmatpush1.bf16.msra.mxu1 %v3224_v24  ;;  %2715 = vmatprep.subr.bf16.mxu0 %v2714_v25  ;;  %v926_v24 = vld [vmem:[#allocation5 + $0x1ad0] sm:$0xff]  ;;  %v3246_v25 = vpack.c.bf16 %v931_v18, %v927_v17  ;;  %v2736_v31 = vpack.c.bf16 %v928_v23, %v924_v22  ;;  %v2754_v17 = vpack.c.bf16 %v969_v12, %v965_v11  ;;  %v964_v18 = vld [vmem:[#allocation5 + $0x1c00] sm:$0xff]  ;;  %v973_v23 = vld [vmem:[#allocation5 + $0x1c48] sm:$0xff] }
 0x1d1   :  { %3227 = vmatprep.subr.bf16.mxu1 %v3226_v29  ;;  %v935_v29 = vld [vmem:[#allocation5 + $0x1b18] sm:$0xff]  ;;  %v3248_v32 = vpack.c.bf16 %v930_v26, %v926_v24  ;;  %v970_v22 = vld [vmem:[#allocation5 + $0x1c30] sm:$0xff]  ;;  %v977_v24 = vld [vmem:[#allocation5 + $0x1c68] sm:$0xff] }
 0x1d2   :  { %v979_v26 = vld [vmem:[#allocation5 + $0x1c78] sm:$0xff] }
 0x1d3   :  { %2717 = vmatpush1.bf16.msra.mxu0 %v2716_v35  ;;  %v936_v35 = vld [vmem:[#allocation5 + $0x1b20] sm:$0xff]  ;;  %v995_v52 = vld [vmem:[#allocation5 + $0x1cf8] sm:$0xff] }
 0x1d4   :  { %3229 = vmatpush1.bf16.msra.mxu1 %v3228_v36  ;;  %2719 = vmatprep.subr.bf16.mxu0 %v2718_v37  ;;  %v934_v36 = vld [vmem:[#allocation5 + $0x1b10] sm:$0xff]  ;;  %v3250_v37 = vpack.c.bf16 %v939_v30, %v935_v29  ;;  %v2740_v43 = vpack.c.bf16 %v936_v35, %v932_v34  ;;  %v2758_v30 = vpack.c.bf16 %v977_v24, %v973_v23  ;;  %v999_v63 = vld [vmem:[#allocation5 + $0x1d18] sm:$0xff] }
 0x1d5   :  { %3231 = vmatprep.subr.bf16.mxu1 %v3230_v41  ;;  %v943_v41 = vld [vmem:[#allocation5 + $0x1b58] sm:$0xff]  ;;  %v3252_v44 = vpack.c.bf16 %v938_v38, %v934_v36  ;;  %v978_v35 = vld [vmem:[#allocation5 + $0x1c70] sm:$0xff]  ;;  %v981_v36 = vld [vmem:[#allocation5 + $0x1c88] sm:$0xff] }
 0x1d6   :  { %v983_v38 = vld [vmem:[#allocation5 + $0x1c98] sm:$0xff] }
 0x1d7   :  { %2721 = vmatpush1.bf16.msra.mxu0 %v2720_v47  ;;  %v944_v47 = vld [vmem:[#allocation5 + $0x1b60] sm:$0xff]  ;;  %v1003_v0 = vld [vmem:[#allocation5 + $0x1d38] sm:$0xff] }
 0x1d8   :  { %3233 = vmatpush1.bf16.msra.mxu1 %v3232_v48  ;;  %2723 = vmatprep.subr.bf16.mxu0 %v2722_v49  ;;  %v942_v48 = vld [vmem:[#allocation5 + $0x1b50] sm:$0xff]  ;;  %v3254_v49 = vpack.c.bf16 %v947_v42, %v943_v41  ;;  %v2744_v55 = vpack.c.bf16 %v944_v47, %v940_v46  ;;  %v3274_v47 = vpack.c.bf16 %v987_v39, %v983_v38  ;;  %v1007_v11 = vld [vmem:[#allocation5 + $0x1d58] sm:$0xff] }
 0x1d9   :  { %3235 = vmatprep.subr.bf16.mxu1 %v3234_v53  ;;  %v951_v53 = vld [vmem:[#allocation5 + $0x1b98] sm:$0xff]  ;;  %v3256_v56 = vpack.c.bf16 %v946_v50, %v942_v48  ;;  %v982_v46 = vld [vmem:[#allocation5 + $0x1c90] sm:$0xff]  ;;  %v993_v50 = vld [vmem:[#allocation5 + $0x1ce8] sm:$0xff] }
 0x1da   :  { %v986_v48 = vld [vmem:[#allocation5 + $0x1cb0] sm:$0xff]  ;;  %v1011_v12 = vld [vmem:[#allocation5 + $0x1d78] sm:$0xff] }
 0x1db   :  { %2725 = vmatpush1.bf16.msra.mxu0 %v2724_v59  ;;  %v952_v59 = vld [vmem:[#allocation5 + $0x1ba0] sm:$0xff]  ;;  %v1015_v23 = vld [vmem:[#allocation5 + $0x1d98] sm:$0xff] }
 0x1dc   :  { %3237 = vmatpush1.bf16.msra.mxu1 %v3236_v60  ;;  %2727 = vmatprep.subr.bf16.mxu0 %v2726_v61  ;;  %v950_v60 = vld [vmem:[#allocation5 + $0x1b90] sm:$0xff]  ;;  %v3258_v61 = vpack.c.bf16 %v955_v54, %v951_v53  ;;  %v2748_v3 = vpack.c.bf16 %v952_v59, %v948_v58  ;;  %v3276_v54 = vpack.c.bf16 %v986_v48, %v982_v46  ;;  %v1019_v24 = vld [vmem:[#allocation5 + $0x1db8] sm:$0xff]  ;;  %v1033_v46 = vld [vmem:[#allocation5 + $0x1e28] sm:$0xff] }
 0x1dd   :  { %3239 = vmatprep.subr.bf16.mxu1 %v3238_v1  ;;  %v959_v1 = vld [vmem:[#allocation5 + $0x1bd8] sm:$0xff]  ;;  %v3260_v4 = vpack.c.bf16 %v954_v62, %v950_v60  ;;  %v990_v58 = vld [vmem:[#allocation5 + $0x1cd0] sm:$0xff]  ;;  %v3278_v59 = vpack.c.bf16 %v995_v52, %v991_v51  ;;  %v1001_v62 = vld [vmem:[#allocation5 + $0x1d28] sm:$0xff] }
 0x1de   :  { %v994_v60 = vld [vmem:[#allocation5 + $0x1cf0] sm:$0xff]  ;;  %v1035_v48 = vld [vmem:[#allocation5 + $0x1e38] sm:$0xff]  ;;  %v1028_v52 = vld [vmem:[#allocation5 + $0x1e00] sm:$0xff] }
 0x1df   :  { %2729 = vmatpush1.bf16.msra.mxu0 %v2728_v7  ;;  %v960_v7 = vld [vmem:[#allocation5 + $0x1be0] sm:$0xff] }
 0x1e0   :  { %3241 = vmatpush1.bf16.msra.mxu1 %v3240_v8  ;;  %2731 = vmatprep.subr.bf16.mxu0 %v2730_v9  ;;  %v958_v8 = vld [vmem:[#allocation5 + $0x1bd0] sm:$0xff]  ;;  %v3262_v9 = vpack.c.bf16 %v963_v2, %v959_v1  ;;  %v2752_v15 = vpack.c.bf16 %v960_v7, %v956_v6  ;;  %v3280_v2 = vpack.c.bf16 %v994_v60, %v990_v58  ;;  %v1041_v58 = vld [vmem:[#allocation5 + $0x1e68] sm:$0xff]  ;;  %v1043_v60 = vld [vmem:[#allocation5 + $0x1e78] sm:$0xff] }
 0x1e1   :  { %3243 = vmatprep.subr.bf16.mxu1 %v3242_v13  ;;  %v967_v13 = vld [vmem:[#allocation5 + $0x1c18] sm:$0xff]  ;;  %v3264_v16 = vpack.c.bf16 %v962_v10, %v958_v8  ;;  %v998_v6 = vld [vmem:[#allocation5 + $0x1d10] sm:$0xff]  ;;  %v3282_v7 = vpack.c.bf16 %v1003_v0, %v999_v63  ;;  %v1009_v10 = vld [vmem:[#allocation5 + $0x1d68] sm:$0xff] }
 0x1e2   :  { %v1002_v8 = vld [vmem:[#allocation5 + $0x1d30] sm:$0xff]  ;;  %v1036_v0 = vld [vmem:[#allocation5 + $0x1e40] sm:$0xff] }
 0x1e3   :  { %2733 = vmatpush1.bf16.msra.mxu0 %v2732_v19  ;;  %v968_v19 = vld [vmem:[#allocation5 + $0x1c20] sm:$0xff] }
 0x1e4   :  { %3245 = vmatpush1.bf16.msra.mxu1 %v3244_v20  ;;  %2735 = vmatprep.subr.bf16.mxu0 %v2734_v21  ;;  %v966_v20 = vld [vmem:[#allocation5 + $0x1c10] sm:$0xff]  ;;  %v3266_v21 = vpack.c.bf16 %v971_v14, %v967_v13  ;;  %v2756_v28 = vpack.c.bf16 %v968_v19, %v964_v18  ;;  %v3284_v14 = vpack.c.bf16 %v1002_v8, %v998_v6  ;;  %v1049_v6 = vld [vmem:[#allocation5 + $0x1ea8] sm:$0xff]  ;;  %v1051_v8 = vld [vmem:[#allocation5 + $0x1eb8] sm:$0xff] }
 0x1e5   :  { %3247 = vmatprep.subr.bf16.mxu1 %v3246_v25  ;;  %v975_v25 = vld [vmem:[#allocation5 + $0x1c58] sm:$0xff]  ;;  %v3268_v29 = vpack.c.bf16 %v970_v22, %v966_v20  ;;  %v1006_v18 = vld [vmem:[#allocation5 + $0x1d50] sm:$0xff]  ;;  %v3286_v19 = vpack.c.bf16 %v1011_v12, %v1007_v11  ;;  %v1017_v22 = vld [vmem:[#allocation5 + $0x1da8] sm:$0xff] }
 0x1e6   :  { %v3270_v34 = vpack.c.bf16 %v979_v26, %v975_v25  ;;  %v1010_v20 = vld [vmem:[#allocation5 + $0x1d70] sm:$0xff]  ;;  %v1044_v12 = vld [vmem:[#allocation5 + $0x1e80] sm:$0xff] }
 0x1e7   :  { %2737 = vmatpush1.bf16.msra.mxu0 %v2736_v31  ;;  %v972_v31 = vld [vmem:[#allocation5 + $0x1c40] sm:$0xff]  ;;  %v3288_v26 = vpack.c.bf16 %v1010_v20, %v1006_v18  ;;  %v1057_v18 = vld [vmem:[#allocation5 + $0x1ee8] sm:$0xff]  ;;  %v1059_v20 = vld [vmem:[#allocation5 + $0x1ef8] sm:$0xff] }
 0x1e8   :  { %3249 = vmatpush1.bf16.msra.mxu1 %v3248_v32  ;;  %2739 = vmatprep.subr.bf16.mxu0 %v2738_v33  ;;  %v976_v32 = vld [vmem:[#allocation5 + $0x1c60] sm:$0xff]  ;;  %v974_v33 = vld [vmem:[#allocation5 + $0x1c50] sm:$0xff] }
 0x1e9   :  { %3251 = vmatprep.subr.bf16.mxu1 %v3250_v37  ;;  %v985_v37 = vld [vmem:[#allocation5 + $0x1ca8] sm:$0xff]  ;;  %v2760_v41 = vpack.c.bf16 %v976_v32, %v972_v31  ;;  %v3272_v42 = vpack.c.bf16 %v978_v35, %v974_v33  ;;  %v3290_v31 = vpack.c.bf16 %v1019_v24, %v1015_v23  ;;  %v1018_v32 = vld [vmem:[#allocation5 + $0x1db0] sm:$0xff]  ;;  %v1023_v35 = vld [vmem:[#allocation5 + $0x1dd8] sm:$0xff] }
 0x1ea   :  { %v1021_v33 = vld [vmem:[#allocation5 + $0x1dc8] sm:$0xff]  ;;  %v1052_v24 = vld [vmem:[#allocation5 + $0x1ec0] sm:$0xff] }
 0x1eb   :  { %2741 = vmatpush1.bf16.msra.mxu0 %v2740_v43  ;;  %v2762_v43 = vpack.c.bf16 %v985_v37, %v981_v36  ;;  %v1027_v36 = vld [vmem:[#allocation5 + $0x1df8] sm:$0xff] }
 0x1ec   :  { %3253 = vmatpush1.bf16.msra.mxu1 %v3252_v44  ;;  %2743 = vmatprep.subr.bf16.mxu0 %v2742_v45  ;;  %v980_v44 = vld [vmem:[#allocation5 + $0x1c80] sm:$0xff] }
 0x1ed   :  { %3255 = vmatprep.subr.bf16.mxu1 %v3254_v49  ;;  %v984_v45 = vld [vmem:[#allocation5 + $0x1ca0] sm:$0xff]  ;;  %v989_v49 = vld [vmem:[#allocation5 + $0x1cc8] sm:$0xff] }
 0x1ee   :  { %v2764_v53 = vpack.c.bf16 %v984_v45, %v980_v44  ;;  %v1026_v44 = vld [vmem:[#allocation5 + $0x1df0] sm:$0xff]  ;;  %v1029_v45 = vld [vmem:[#allocation5 + $0x1e08] sm:$0xff] }
 0x1ef   :  { %2745 = vmatpush1.bf16.msra.mxu0 %v2744_v55  ;;  %v2766_v55 = vpack.c.bf16 %v993_v50, %v989_v49  ;;  %v2786_v51 = vpack.c.bf16 %v1033_v46, %v1029_v45 }
 0x1f0   :  { %3257 = vmatpush1.bf16.msra.mxu1 %v3256_v56  ;;  %2747 = vmatprep.subr.bf16.mxu0 %v2746_v57  ;;  %v988_v56 = vld [vmem:[#allocation5 + $0x1cc0] sm:$0xff] }
 0x1f1   :  { %3259 = vmatprep.subr.bf16.mxu1 %v3258_v61  ;;  %v992_v57 = vld [vmem:[#allocation5 + $0x1ce0] sm:$0xff]  ;;  %v997_v61 = vld [vmem:[#allocation5 + $0x1d08] sm:$0xff] }
 0x1f2   :  { %v2768_v1 = vpack.c.bf16 %v992_v57, %v988_v56  ;;  %v1034_v56 = vld [vmem:[#allocation5 + $0x1e30] sm:$0xff]  ;;  %v1037_v57 = vld [vmem:[#allocation5 + $0x1e48] sm:$0xff] }
 0x1f3   :  { %2749 = vmatpush1.bf16.msra.mxu0 %v2748_v3  ;;  %v2770_v3 = vpack.c.bf16 %v1001_v62, %v997_v61  ;;  %v2790_v63 = vpack.c.bf16 %v1041_v58, %v1037_v57 }
 0x1f4   :  { %3261 = vmatpush1.bf16.msra.mxu1 %v3260_v4  ;;  %2751 = vmatprep.subr.bf16.mxu0 %v2750_v5  ;;  %v996_v4 = vld [vmem:[#allocation5 + $0x1d00] sm:$0xff] }
 0x1f5   :  { %3263 = vmatprep.subr.bf16.mxu1 %v3262_v9  ;;  %v1000_v5 = vld [vmem:[#allocation5 + $0x1d20] sm:$0xff]  ;;  %v1005_v9 = vld [vmem:[#allocation5 + $0x1d48] sm:$0xff] }
 0x1f6   :  { %v2772_v13 = vpack.c.bf16 %v1000_v5, %v996_v4  ;;  %v1042_v4 = vld [vmem:[#allocation5 + $0x1e70] sm:$0xff]  ;;  %v1045_v5 = vld [vmem:[#allocation5 + $0x1e88] sm:$0xff] }
 0x1f7   :  { %2753 = vmatpush1.bf16.msra.mxu0 %v2752_v15  ;;  %v2774_v15 = vpack.c.bf16 %v1009_v10, %v1005_v9  ;;  %v2794_v11 = vpack.c.bf16 %v1049_v6, %v1045_v5 }
 0x1f8   :  { %3265 = vmatpush1.bf16.msra.mxu1 %v3264_v16  ;;  %2755 = vmatprep.subr.bf16.mxu0 %v2754_v17  ;;  %v1004_v16 = vld [vmem:[#allocation5 + $0x1d40] sm:$0xff] }
 0x1f9   :  { %3267 = vmatprep.subr.bf16.mxu1 %v3266_v21  ;;  %v1008_v17 = vld [vmem:[#allocation5 + $0x1d60] sm:$0xff]  ;;  %v1013_v21 = vld [vmem:[#allocation5 + $0x1d88] sm:$0xff] }
 0x1fa   :  { %1605 = vmatmul.mubr.f32.vlgmr.msra.gmra.mrb[0].mxu0 %v64_v27  ;;  %v2776_v25 = vpack.c.bf16 %v1008_v17, %v1004_v16  ;;  %v1050_v16 = vld [vmem:[#allocation5 + $0x1eb0] sm:$0xff]  ;;  %v1053_v17 = vld [vmem:[#allocation5 + $0x1ec8] sm:$0xff] }
 0x1fb   :  { %2757 = vmatpush1.bf16.msra.mxu0 %v2756_v28  ;;  %2173 = vmatmul.mubr.f32.vlgmr.msra.gmra.mrb[0].mxu1 %v64_v27  ;;  %v2778_v27 = vpack.c.bf16 %v1017_v22, %v1013_v21  ;;  %v1012_v28 = vld [vmem:[#allocation5 + $0x1d80] sm:$0xff]  ;;  %v2798_v23 = vpack.c.bf16 %v1057_v18, %v1053_v17 }
 0x1fc   :  { %3269 = vmatpush1.bf16.msra.mxu1 %v3268_v29  ;;  %2759 = vmatprep.subr.bf16.mxu0 %v2758_v30  ;;  %v1016_v29 = vld [vmem:[#allocation5 + $0x1da0] sm:$0xff]  ;;  %v1014_v30 = vld [vmem:[#allocation5 + $0x1d90] sm:$0xff] }
 0x1fd   :  { %3271 = vmatprep.subr.bf16.mxu1 %v3270_v34  ;;  %1675 = vmatprep.mubr.f32.mxu0 %v67_v40  ;;  %v1025_v34 = vld [vmem:[#allocation5 + $0x1de8] sm:$0xff]  ;;  %v2780_v37 = vpack.c.bf16 %v1016_v29, %v1012_v28  ;;  %v3292_v38 = vpack.c.bf16 %v1018_v32, %v1014_v30  ;;  %v1058_v28 = vld [vmem:[#allocation5 + $0x1ef0] sm:$0xff]  ;;  %v1067_v32 = vld [vmem:[#allocation5 + $0x1f38] sm:$0xff] }
 0x1fe   :  { %2243 = vmatprep.mubr.f32.mxu1 %v67_v40  ;;  %v2782_v39 = vpack.c.bf16 %v1025_v34, %v1021_v33  ;;  %v1020_v40 = vld [vmem:[#allocation5 + $0x1dc0] sm:$0xff]  ;;  %v1061_v29 = vld [vmem:[#allocation5 + $0x1f08] sm:$0xff] }
 0x1ff   :  { %2761 = vmatpush1.bf16.msra.mxu0 %v2760_v41  ;;  %v1024_v41 = vld [vmem:[#allocation5 + $0x1de0] sm:$0xff]  ;;  %v1065_v30 = vld [vmem:[#allocation5 + $0x1f28] sm:$0xff] }
 0x200   :  { %3273 = vmatpush1.bf16.msra.mxu1 %v3272_v42  ;;  %2763 = vmatprep.subr.bf16.mxu0 %v2762_v43  ;;  %v1022_v42 = vld [vmem:[#allocation5 + $0x1dd0] sm:$0xff]  ;;  %v3294_v43 = vpack.c.bf16 %v1027_v36, %v1023_v35  ;;  %v2784_v49 = vpack.c.bf16 %v1024_v41, %v1020_v40  ;;  %v2802_v35 = vpack.c.bf16 %v1065_v30, %v1061_v29  ;;  %v1060_v36 = vld [vmem:[#allocation5 + $0x1f00] sm:$0xff]  ;;  %v1069_v41 = vld [vmem:[#allocation5 + $0x1f48] sm:$0xff] }
 0x201   :  { %3275 = vmatprep.subr.bf16.mxu1 %v3274_v47  ;;  %v1031_v47 = vld [vmem:[#allocation5 + $0x1e18] sm:$0xff]  ;;  %v3296_v50 = vpack.c.bf16 %v1026_v44, %v1022_v42  ;;  %v1066_v40 = vld [vmem:[#allocation5 + $0x1f30] sm:$0xff]  ;;  %v1073_v42 = vld [vmem:[#allocation5 + $0x1f68] sm:$0xff] }
 0x202   :  { %v1075_v44 = vld [vmem:[#allocation5 + $0x1f78] sm:$0xff] }
 0x203   :  { %2765 = vmatpush1.bf16.msra.mxu0 %v2764_v53  ;;  %v1032_v53 = vld [vmem:[#allocation5 + $0x1e20] sm:$0xff] }
 0x204   :  { %3277 = vmatpush1.bf16.msra.mxu1 %v3276_v54  ;;  %2767 = vmatprep.subr.bf16.mxu0 %v2766_v55  ;;  %v1030_v54 = vld [vmem:[#allocation5 + $0x1e10] sm:$0xff]  ;;  %v3298_v55 = vpack.c.bf16 %v1035_v48, %v1031_v47  ;;  %v2788_v61 = vpack.c.bf16 %v1032_v53, %v1028_v52  ;;  %v2806_v47 = vpack.c.bf16 %v1073_v42, %v1069_v41  ;;  %v1068_v48 = vld [vmem:[#allocation5 + $0x1f40] sm:$0xff]  ;;  %v1077_v53 = vld [vmem:[#allocation5 + $0x1f88] sm:$0xff] }
 0x205   :  { %3279 = vmatprep.subr.bf16.mxu1 %v3278_v59  ;;  %v1039_v59 = vld [vmem:[#allocation5 + $0x1e58] sm:$0xff]  ;;  %v3300_v62 = vpack.c.bf16 %v1034_v56, %v1030_v54  ;;  %v1074_v52 = vld [vmem:[#allocation5 + $0x1f70] sm:$0xff]  ;;  %v1081_v54 = vld [vmem:[#allocation5 + $0x1fa8] sm:$0xff] }
 0x206   :  { %v1083_v56 = vld [vmem:[#allocation5 + $0x1fb8] sm:$0xff] }
 0x207   :  { %2769 = vmatpush1.bf16.msra.mxu0 %v2768_v1  ;;  %v1040_v1 = vld [vmem:[#allocation5 + $0x1e60] sm:$0xff] }
 0x208   :  { %3281 = vmatpush1.bf16.msra.mxu1 %v3280_v2  ;;  %2771 = vmatprep.subr.bf16.mxu0 %v2770_v3  ;;  %v1038_v2 = vld [vmem:[#allocation5 + $0x1e50] sm:$0xff]  ;;  %v3302_v3 = vpack.c.bf16 %v1043_v60, %v1039_v59  ;;  %v2792_v9 = vpack.c.bf16 %v1040_v1, %v1036_v0  ;;  %v2810_v59 = vpack.c.bf16 %v1081_v54, %v1077_v53  ;;  %v1076_v60 = vld [vmem:[#allocation5 + $0x1f80] sm:$0xff]  ;;  %v1085_v1 = vld [vmem:[#allocation5 + $0x1fc8] sm:$0xff] }
 0x209   :  { %3283 = vmatprep.subr.bf16.mxu1 %v3282_v7  ;;  %v1047_v7 = vld [vmem:[#allocation5 + $0x1e98] sm:$0xff]  ;;  %v3304_v10 = vpack.c.bf16 %v1042_v4, %v1038_v2  ;;  %v1082_v0 = vld [vmem:[#allocation5 + $0x1fb0] sm:$0xff]  ;;  %v1089_v2 = vld [vmem:[#allocation5 + $0x1fe8] sm:$0xff] }
 0x20a   :  { %v1091_v4 = vld [vmem:[#allocation5 + $0x1ff8] sm:$0xff] }
 0x20b   :  { %2773 = vmatpush1.bf16.msra.mxu0 %v2772_v13  ;;  %v1048_v13 = vld [vmem:[#allocation5 + $0x1ea0] sm:$0xff] }
 0x20c   :  { %3285 = vmatpush1.bf16.msra.mxu1 %v3284_v14  ;;  %2775 = vmatprep.subr.bf16.mxu0 %v2774_v15  ;;  %v1046_v14 = vld [vmem:[#allocation5 + $0x1e90] sm:$0xff]  ;;  %v3306_v15 = vpack.c.bf16 %v1051_v8, %v1047_v7  ;;  %v2796_v21 = vpack.c.bf16 %v1048_v13, %v1044_v12  ;;  %v2814_v7 = vpack.c.bf16 %v1089_v2, %v1085_v1  ;;  %v1084_v8 = vld [vmem:[#allocation5 + $0x1fc0] sm:$0xff] }
 0x20d   :  { %3287 = vmatprep.subr.bf16.mxu1 %v3286_v19  ;;  %v1055_v19 = vld [vmem:[#allocation5 + $0x1ed8] sm:$0xff]  ;;  %v3308_v22 = vpack.c.bf16 %v1050_v16, %v1046_v14  ;;  %v1090_v12 = vld [vmem:[#allocation5 + $0x1ff0] sm:$0xff]  ;;  %v1094_v16 = vlaneseq }
 0x20f   :  { %2777 = vmatpush1.bf16.msra.mxu0 %v2776_v25  ;;  %v1056_v25 = vld [vmem:[#allocation5 + $0x1ee0] sm:$0xff]  ;;  %v1095_v17 = vshrl.u32 %v1094_v16, 7 }
 0x210   :  { %3289 = vmatpush1.bf16.msra.mxu1 %v3288_v26  ;;  %2779 = vmatprep.subr.bf16.mxu0 %v2778_v27  ;;  %v1054_v26 = vld [vmem:[#allocation5 + $0x1ed0] sm:$0xff]  ;;  %v3310_v27 = vpack.c.bf16 %v1059_v20, %v1055_v19  ;;  %v2800_v33 = vpack.c.bf16 %v1056_v25, %v1052_v24  ;;  %v1092_v19 = vld [vmem:[#allocation7] sm:$0xf] }
 0x211   :  { %3291 = vmatprep.subr.bf16.mxu1 %v3290_v31  ;;  %v1063_v31 = vld [vmem:[#allocation5 + $0x1f18] sm:$0xff]  ;;  %v3312_v34 = vpack.c.bf16 %v1058_v28, %v1054_v26  ;;  %v1096_v18 = vsub.s32 0, %v1095_v17  ;;  %v1104_v20 = vsub.s32 2, %v1095_v17  ;;  %v1108_v24 = vsub.s32 3, %v1095_v17 }
 0x213   :  { %2781 = vmatpush1.bf16.msra.mxu0 %v2780_v37  ;;  %v1064_v37 = vld [vmem:[#allocation5 + $0x1f20] sm:$0xff] }
 0x214   :  { %3293 = vmatpush1.bf16.msra.mxu1 %v3292_v38  ;;  %2783 = vmatprep.subr.bf16.mxu0 %v2782_v39  ;;  %v1062_v38 = vld [vmem:[#allocation5 + $0x1f10] sm:$0xff]  ;;  %v3314_v39 = vpack.c.bf16 %v1067_v32, %v1063_v31  ;;  %v2804_v45 = vpack.c.bf16 %v1064_v37, %v1060_v36  ;;  %v1109_v31 = vrot.slane %v1092_v19, %v1108_v24 }
 0x215   :  { %3295 = vmatprep.subr.bf16.mxu1 %v3294_v43  ;;  %v1071_v43 = vld [vmem:[#allocation5 + $0x1f58] sm:$0xff]  ;;  %v3316_v46 = vpack.c.bf16 %v1066_v40, %v1062_v38 }
 0x217   :  { %2785 = vmatpush1.bf16.msra.mxu0 %v2784_v49  ;;  %v1072_v49 = vld [vmem:[#allocation5 + $0x1f60] sm:$0xff] }
 0x218   :  { %3297 = vmatpush1.bf16.msra.mxu1 %v3296_v50  ;;  %2787 = vmatprep.subr.bf16.mxu0 %v2786_v51  ;;  %v1070_v50 = vld [vmem:[#allocation5 + $0x1f50] sm:$0xff]  ;;  %v3318_v51 = vpack.c.bf16 %v1075_v44, %v1071_v43  ;;  %v2808_v57 = vpack.c.bf16 %v1072_v49, %v1068_v48 }
 0x219   :  { %3299 = vmatprep.subr.bf16.mxu1 %v3298_v55  ;;  %v1079_v55 = vld [vmem:[#allocation5 + $0x1f98] sm:$0xff]  ;;  %v3320_v58 = vpack.c.bf16 %v1074_v52, %v1070_v50 }
 0x21b   :  { %2789 = vmatpush1.bf16.msra.mxu0 %v2788_v61  ;;  %v1080_v61 = vld [vmem:[#allocation5 + $0x1fa0] sm:$0xff] }
 0x21c   :  { %3301 = vmatpush1.bf16.msra.mxu1 %v3300_v62  ;;  %2791 = vmatprep.subr.bf16.mxu0 %v2790_v63  ;;  %v1078_v62 = vld [vmem:[#allocation5 + $0x1f90] sm:$0xff]  ;;  %v3322_v63 = vpack.c.bf16 %v1083_v56, %v1079_v55  ;;  %v2812_v5 = vpack.c.bf16 %v1080_v61, %v1076_v60 }
 0x21d   :  { %3303 = vmatprep.subr.bf16.mxu1 %v3302_v3  ;;  %v1087_v3 = vld [vmem:[#allocation5 + $0x1fd8] sm:$0xff]  ;;  %v3324_v6 = vpack.c.bf16 %v1082_v0, %v1078_v62 }
 0x21f   :  { %2793 = vmatpush1.bf16.msra.mxu0 %v2792_v9  ;;  %v1088_v9 = vld [vmem:[#allocation5 + $0x1fe0] sm:$0xff] }
 0x220   :  { %3305 = vmatpush1.bf16.msra.mxu1 %v3304_v10  ;;  %2795 = vmatprep.subr.bf16.mxu0 %v2794_v11  ;;  %v3326_v10 = vpack.c.bf16 %v1091_v4, %v1087_v3  ;;  %v1086_v11 = vld [vmem:[#allocation5 + $0x1fd0] sm:$0xff]  ;;  %v2816_v13 = vpack.c.bf16 %v1088_v9, %v1084_v8 }
 0x221   :  { %3307 = vmatprep.subr.bf16.mxu1 %v3306_v15  ;;  %v3328_v14 = vpack.c.bf16 %v1090_v12, %v1086_v11  ;;  %v66_v15 = vld [vmem:[#allocation2 + $0x70] sm:$0xff] }
 0x223   :  { %2797 = vmatpush1.bf16.msra.mxu0 %v2796_v21  ;;  %v1097_v21 = vrot.slane %v1092_v19, %v1096_v18 }
 0x224   :  { %3309 = vmatpush1.bf16.msra.mxu1 %v3308_v22  ;;  %2799 = vmatprep.subr.bf16.mxu0 %v2798_v23  ;;  %v1100_v22 = vsub.s32 1, %v1095_v17  ;;  %v1105_v23 = vrot.slane %v1092_v19, %v1104_v20 }
 0x225   :  { %3311 = vmatprep.subr.bf16.mxu1 %v3310_v27 }
 0x226   :  { %v1101_v28 = vrot.slane %v1092_v19, %v1100_v22 }
 0x227   :  { %2801 = vmatpush1.bf16.msra.mxu0 %v2800_v33 }
 0x228   :  { %3313 = vmatpush1.bf16.msra.mxu1 %v3312_v34  ;;  %2803 = vmatprep.subr.bf16.mxu0 %v2802_v35 }
 0x229   :  { %3315 = vmatprep.subr.bf16.mxu1 %v3314_v39 }
 0x22b   :  { %2805 = vmatpush1.bf16.msra.mxu0 %v2804_v45 }
 0x22c   :  { %3317 = vmatpush1.bf16.msra.mxu1 %v3316_v46  ;;  %2807 = vmatprep.subr.bf16.mxu0 %v2806_v47 }
 0x22d   :  { %3319 = vmatprep.subr.bf16.mxu1 %v3318_v51 }
 0x22f   :  { %2809 = vmatpush1.bf16.msra.mxu0 %v2808_v57 }
 0x230   :  { %3321 = vmatpush1.bf16.msra.mxu1 %v3320_v58  ;;  %2811 = vmatprep.subr.bf16.mxu0 %v2810_v59 }
 0x231   :  { %3323 = vmatprep.subr.bf16.mxu1 %v3322_v63 }
 0x233   :  { %2813 = vmatpush1.bf16.msra.mxu0 %v2812_v5 }
 0x234   :  { %3325 = vmatpush1.bf16.msra.mxu1 %v3324_v6  ;;  %2815 = vmatprep.subr.bf16.mxu0 %v2814_v7 }
 0x235   :  { %3327 = vmatprep.subr.bf16.mxu1 %v3326_v10 }
 0x237   :  { %2817 = vmatpush1.bf16.msra.mxu0 %v2816_v13 }
 0x238   :  { %3329 = vmatpush1.bf16.msra.mxu1 %v3328_v14 }
 0x23a   :  { %1676 = vmatmul.mubr.f32.vlgmr.msra.gmra.mrb[0].mxu0 %v66_v15 }
 0x23b   :  { %2244 = vmatmul.mubr.f32.vlgmr.msra.gmra.mrb[0].mxu1 %v66_v15 }
 0x30d   :  { %v1677_v25 = vpop.f32.mrb[0].mxu0 }
 0x30e   :  { %v3330_v26 = vadd.f32 %v1677_v25, %v1097_v21  ;;  %v2245_v27 = vpop.f32.mrb[0].mxu1  ;;  %v1679_v29 = vpop.f32.mrb[1].mxu0 }
 0x30f   :  { %v3332_v30 = vadd.f32 %v2245_v27, %v1105_v23  ;;  %v2247_v32 = vpop.f32.mrb[1].mxu1  ;;  %v3331_v33 = vadd.f32 %v1679_v29, %v1101_v28 }
 0x310   :  { %2250 = vmax.xlane.f32.xlu0 %v3330_v26  ;;  %v3333_v34 = vadd.f32 %v2247_v32, %v1109_v31 }
 0x311   :  { %2270 = vmax.xlane.f32.xlu1 %v3332_v30 }
 0x314   :  { %2260 = vmax.xlane.f32.xlu0 %v3331_v33 }
 0x315   :  { %2280 = vmax.xlane.f32.xlu1 %v3333_v34 }
 0x39d   :  { %v2251_v35 = vpop.xlane.xlu0 %2250 }
 0x39e   :  { %v2271_v36 = vpop.xlane.xlu1 %2270  ;;  %v2252_v37 = vsub.f32 %v3330_v26, %v2251_v35 }
 0x39f   :  { %v2272_v38 = vsub.f32 %v3332_v30, %v2271_v36 }
 0x3a0   :  { %v2253_v39 = vmul.f32 1.442695, %v2252_v37 }
 0x3a1   :  { %v2273_v40 = vmul.f32 1.442695, %v2272_v38  ;;  %v2261_v41 = vpop.xlane.xlu0 %2260 }
 0x3a2   :  { %3368 = vpow2.f32 %v2253_v39  ;;  %v2281_v42 = vpop.xlane.xlu1 %2280  ;;  %v2262_v43 = vsub.f32 %v3331_v33, %v2261_v41 }
 0x3a3   :  { %v2282_v44 = vsub.f32 %v3333_v34, %v2281_v42  ;;  %3370 = vpow2.f32 %v2273_v40 }
 0x3a4   :  { %v2263_v45 = vmul.f32 1.442695, %v2262_v43 }
 0x3a5   :  { %v2283_v46 = vmul.f32 1.442695, %v2282_v44 }
 0x3a6   :  { %3372 = vpow2.f32 %v2263_v45 }
 0x3a7   :  { %3374 = vpow2.f32 %v2283_v46 }
 0x3ac   :  { %v3369_v47 = vpop.eup %3368 }
 0x3ad   :  { %2255 = vadd.xlane.f32.xlu0 %v3369_v47  ;;  %v3371_v48 = vpop.eup %3370 }
 0x3b0   :  { %v3373_v49 = vpop.eup %3372 }
 0x3b1   :  { %2275 = vadd.xlane.f32.xlu0 %v3371_v48  ;;  %2265 = vadd.xlane.f32.xlu1 %v3373_v49  ;;  %v3375_v50 = vpop.eup %3374 }
 0x3b5   :  { %2285 = vadd.xlane.f32.xlu1 %v3375_v50 }
 0x43a   :  { %v2256_v51 = vpop.xlane.xlu0 %2255 }
 0x43b   :  { %3376 = vrcp.f32 %v2256_v51 }
 0x43e   :  { %v2266_v52 = vpop.xlane.xlu1 %2265  ;;  %v2276_v53 = vpop.xlane.xlu0 %2275 }
 0x43f   :  { %3378 = vrcp.f32 %v2266_v52 }
 0x440   :  { %3380 = vrcp.f32 %v2276_v53 }
 0x442   :  { %v2286_v54 = vpop.xlane.xlu1 %2285 }
 0x443   :  { %3382 = vrcp.f32 %v2286_v54 }
 0x445   :  { %v3377_v55 = vpop.eup %3376 }
 0x446   :  { %v2258_v56 = vmul.f32 %v3377_v55, %v3369_v47 }
 0x448   :  { %2259 = vst [vmem:[#allocation8] sm:$0xff] %v2258_v56 }
 0x449   :  { %v3379_v57 = vpop.eup %3378 }
 0x44a   :  { %v3381_v58 = vpop.eup %3380  ;;  %v2268_v59 = vmul.f32 %v3379_v57, %v3373_v49 }
 0x44b   :  { %v2278_v60 = vmul.f32 %v3381_v58, %v3371_v48 }
 0x44c   :  { %2269 = vst [vmem:[#allocation8 + $0x8] sm:$0xff] %v2268_v59 }
 0x44d   :  { %v3383_v61 = vpop.eup %3382  ;;  %2279 = vst [vmem:[#allocation8 + $0x10] sm:$0xff] %v2278_v60 }
 0x44e   :  { %v2288_v62 = vmul.f32 %v3383_v61, %v3375_v50 }
 0x450   :  { %2289 = vst [vmem:[#allocation8 + $0x18] sm:$0xff] %v2288_v62 }
 0x451   :  { %3461 = shalt.err (!%p3458_p0)
}
 0x452   :  { %s3462_s25 = scalar_lea.hbm %s3555_s3, 512 }
 0x453   :  { %p3463_p1 = scmp.ne.s32.totalorder %s3555_s3, %s3462_s25  ;;  %p3466_p2 = scmp.lt.u32.totalorder %s3462_s25, %s3555_s3 }
 0x455   :  { %p3468_p3 = pnand %p3466_p2, %p3463_p1 }
 0x457   :  { %3471 = shalt.err (!%p3468_p3)
}
 0x458   :  { %2299 = dma.vmem_to_hbm [thread:$0]  %s2297_s21, 512, %s3555_s3, [#allocation4]  }
 0x459   :  { %3476 = dma.done.wait [#allocation4], 512  }
 0x45a   :  { %3477 = vsyncadd [#allocation4], 4294966784 }
 0x45b   :  { %2303 = vsyncpa [#allocation3], 1 }
 0x45c   :  { %2304 = vsyncpa [#allocation6], 1 }
 0x45d   :  { %2305 = vsyncpa [#allocation4], 1 }

</bundles_post_ra>
